<compile_context>
chip_gen: v5e
topology: v5e:2x2
jax: 0.10.0
libtpu: 0.0.40
codegen_flags: <defaults>
</compile_context>

<pallas_src>
import jax
import jax.numpy as jnp
from jax.experimental import pallas as pl
from jax.experimental.pallas import tpu as pltpu

FIRST_IN = 768
H_DIM = 512
MULTI_DIM = 31
BI_DIM = 1
OUT_PAD = 128        # lane-dense packed output width (multi in 0:31, bi at 31)
TILE_B_MAX = 512     # batch tile (multiple of 16 for bf16 sublane packing)


def _round_up(x, m):
    return (x + m - 1) // m * m


def _heads_kernel(x_ref,
                  w1_ref, b1_ref,
                  w2a_ref, b2a_ref, w2b_ref, b2b_ref,
                  wo_ref, bo_ref,
                  out_ref):
    # In-kernel cast (rides the free VPU slot); x stays f32 in HBM.
    x = x_ref[...].astype(jnp.bfloat16)                     # [tb, 768]

    # Fused first layer of both branches: W1 = [w1 | w1_1] -> [768, 1024].
    h_all = jnp.dot(x, w1_ref[...], preferred_element_type=jnp.float32)
    h_all = jnp.maximum(h_all + b1_ref[...], 0.0).astype(jnp.bfloat16)
    h = h_all[:, :H_DIM]                                    # multiclass branch
    g = h_all[:, H_DIM:]                                    # binary branch

    # Second layer per branch (block-diagonal -> two 512x512 matmuls, no
    # wasted MXU work), relu in f32 then cast.
    h2 = jnp.dot(h, w2a_ref[...], preferred_element_type=jnp.float32)
    h2 = jnp.maximum(h2 + b2a_ref[...], 0.0).astype(jnp.bfloat16)
    g2 = jnp.dot(g, w2b_ref[...], preferred_element_type=jnp.float32)
    g2 = jnp.maximum(g2 + b2b_ref[...], 0.0).astype(jnp.bfloat16)

    # Fused output projection: Wo = [wo_pad ; wo_1_pad] stacked along K
    # -> [1024, 128]; concat(h2, g2) is lane-aligned (512 | 512) so it is a
    # layout-only op. One K=1024 matmul instead of two K=512, N=128 matmuls.
    hg = jnp.concatenate([h2, g2], axis=1)                  # [tb, 1024] bf16
    out = (jnp.dot(hg, wo_ref[...], preferred_element_type=jnp.float32)
           + bo_ref[...])

    # Sigmoid only applies to the bi logit (lane 31). Computing it on all 128
    # lanes and selecting is free (exp goes to the otherwise-idle EUP slot).
    lane = jax.lax.broadcasted_iota(jnp.int32, out.shape, 1)
    out = jnp.where(lane == MULTI_DIM, jax.nn.sigmoid(out), out)
    out_ref[...] = out.astype(out_ref.dtype)


def full_clasifi_heads(x, params):
    """x: [B, FIRST_IN] f32 (or bf16); params: packed bf16 weights / f32 biases.

    Returns (multi_class [B, 31] f32, bi_class [B, 1] f32)."""
    B = x.shape[0]

    b16 = _round_up(max(B, 1), 16)
    if b16 <= 256:
        # Small batch: single grid step; kernel is weight-DMA bound, splitting
        # across cores would only duplicate the weight fetch.
        tile_b = b16
    else:
        # Large batch: ensure >=2 grid steps so ("parallel",) can shard the
        # batch axis across both TensorCores on v7x, capped at TILE_B_MAX.
        tile_b = min(TILE_B_MAX, _round_up((b16 + 1) // 2, 16))
    b_pad = _round_up(B, tile_b)
    if b_pad != B:
        x = jnp.pad(x, ((0, b_pad - B), (0, 0)))

    grid = (b_pad // tile_b,)

    def resident(shape):
        # Full-array block with constant index map -> stays VMEM-resident.
        return pl.BlockSpec(shape, lambda i: (0, 0))

    in_specs = [
        pl.BlockSpec((tile_b, FIRST_IN), lambda i: (i, 0)),   # x tile, pipelined
        resident((FIRST_IN, 2 * H_DIM)),                      # w1 packed
        resident((1, 2 * H_DIM)),                             # b1 packed
        resident((H_DIM, H_DIM)),                             # w2 (multi)
        resident((1, H_DIM)),                                 # b2 (multi)
        resident((H_DIM, H_DIM)),                             # w2_1 (bi)
        resident((1, H_DIM)),                                 # b2_1 (bi)
        resident((2 * H_DIM, OUT_PAD)),                       # wo fused/padded
        resident((1, OUT_PAD)),                               # bo packed
    ]
    out_spec = pl.BlockSpec((tile_b, OUT_PAD), lambda i: (i, 0))

    x_bytes = jnp.dtype(x.dtype).itemsize
    weight_bytes = (FIRST_IN * 2 * H_DIM + 2 * H_DIM * H_DIM
                    + 2 * H_DIM * OUT_PAD) * 2               # bf16
    flops = 2 * b_pad * (FIRST_IN * 2 * H_DIM + 2 * H_DIM * H_DIM
                         + 2 * H_DIM * OUT_PAD)
    bytes_accessed = (b_pad * FIRST_IN * x_bytes
                      + b_pad * OUT_PAD * 4 + weight_bytes)
    cost = pl.CostEstimate(flops=flops,
                           transcendentals=b_pad * OUT_PAD,
                           bytes_accessed=bytes_accessed)

    packed = pl.pallas_call(
        _heads_kernel,
        out_shape=jax.ShapeDtypeStruct((b_pad, OUT_PAD), jnp.float32),
        grid=grid,
        in_specs=in_specs,
        out_specs=out_spec,
        compiler_params=pltpu.CompilerParams(
            dimension_semantics=("parallel",),
            vmem_limit_bytes=24 * 1024 * 1024),
        cost_estimate=cost,
    )(x,
      params["w1p"], params["b1p"],
      params["w2a"], params["b2a"], params["w2b"], params["b2b"],
      params["wop"], params["bop"])

    multi = packed[:B, :MULTI_DIM]
    bi = packed[:B, MULTI_DIM:MULTI_DIM + BI_DIM]
    return multi, bi


def init_params(key):
    """Deterministic init matching PyTorch Linear (uniform +-1/sqrt(fan_in)),
    stored transposed to [in, out] and packed for the fused kernel."""
    def linear(k, fan_in, fan_out):
        k_w, k_b = jax.random.split(k)
        bound = 1.0 / jnp.sqrt(fan_in)
        w = jax.random.uniform(k_w, (fan_in, fan_out), jnp.float32, -bound, bound)
        b = jax.random.uniform(k_b, (fan_out,), jnp.float32, -bound, bound)
        return w, b

    keys = jax.random.split(key, 6)
    w1, b1 = linear(keys[0], FIRST_IN, H_DIM)
    w2, b2 = linear(keys[1], H_DIM, H_DIM)
    wo, bo = linear(keys[2], H_DIM, MULTI_DIM)
    w1_1, b1_1 = linear(keys[3], FIRST_IN, H_DIM)
    w2_1, b2_1 = linear(keys[4], H_DIM, H_DIM)
    wo_1, bo_1 = linear(keys[5], H_DIM, BI_DIM)

    p = {}
    # Fused first layer: [768, 1024] = [w1 | w1_1]
    p["w1p"] = jnp.concatenate([w1, w1_1], axis=1).astype(jnp.bfloat16)
    p["b1p"] = jnp.concatenate([b1, b1_1])[None, :].astype(jnp.float32)
    # Second layers (per branch)
    p["w2a"] = w2.astype(jnp.bfloat16)
    p["b2a"] = b2[None, :].astype(jnp.float32)
    p["w2b"] = w2_1.astype(jnp.bfloat16)
    p["b2b"] = b2_1[None, :].astype(jnp.float32)
    # Fused output weight: K-stacked [1024, 128].
    # Rows 0:512 -> multi head into lanes 0:31; rows 512:1024 -> bi head into
    # lane 31; all other (padded) lanes are zero so unused columns stay benign.
    woa = jnp.zeros((H_DIM, OUT_PAD), jnp.float32).at[:, :MULTI_DIM].set(wo)
    wob = jnp.zeros((H_DIM, OUT_PAD), jnp.float32).at[
        :, MULTI_DIM:MULTI_DIM + BI_DIM].set(wo_1)
    p["wop"] = jnp.concatenate([woa, wob], axis=0).astype(jnp.bfloat16)
    bop = jnp.zeros((1, OUT_PAD), jnp.float32)
    bop = bop.at[0, :MULTI_DIM].set(bo).at[0, MULTI_DIM].set(bo_1[0])
    p["bop"] = bop
    return p


def transformer_stub(idz, attentions, token_types, emb_table, type_table):
    """Deterministic stand-in for `self.transformer(...)[0]` -> [B, S, 768].
    Plain-JAX glue; the Pallas kernel only needs the [CLS] slice [:, 0, :]."""
    h = emb_table[idz] + type_table[token_types]
    h = h * attentions[..., None].astype(h.dtype)
    return h


if __name__ == "__main__":
    B, S, VOCAB = 2, 8, 64
    key = jax.random.PRNGKey(0)
    k_params, k_emb, k_type, k_ids, k_types = jax.random.split(key, 5)

    params = init_params(k_params)

    # Example transformer-style inputs.
    idz = jax.random.randint(k_ids, (B, S), 0, VOCAB, dtype=jnp.int32)
    attentions = jnp.ones((B, S), dtype=jnp.int32)
    token_types = jax.random.randint(k_types, (B, S), 0, 2, dtype=jnp.int32)

    emb_table = jax.random.normal(k_emb, (VOCAB, FIRST_IN), jnp.float32) * 0.02
    type_table = jax.random.normal(k_type, (2, FIRST_IN), jnp.float32) * 0.02

    # transformer(...)[0][:, 0, :]  -> [B, 768]
    hidden = transformer_stub(idz, attentions, token_types, emb_table, type_table)
    x_cls = hidden[:, 0, :]

    multi_class, bi_class = full_clasifi_heads(x_cls, params)
    jax.block_until_ready((multi_class, bi_class))

    # Reference check in plain JAX (bf16 weights -> loose tolerance).
    def ref_heads(x, p):
        w1p = p["w1p"].astype(jnp.float32)
        h_all = jnp.maximum(x @ w1p + p["b1p"], 0.0)
        h, g = h_all[:, :H_DIM], h_all[:, H_DIM:]
        h2 = jnp.maximum(h @ p["w2a"].astype(jnp.float32) + p["b2a"], 0.0)
        g2 = jnp.maximum(g @ p["w2b"].astype(jnp.float32) + p["b2b"], 0.0)
        out = (jnp.concatenate([h2, g2], axis=1)
               @ p["wop"].astype(jnp.float32) + p["bop"])
        return out[:, :MULTI_DIM], jax.nn.sigmoid(out[:, MULTI_DIM:MULTI_DIM + 1])

    ref_multi, ref_bi = ref_heads(x_cls, params)

    assert multi_class.shape == (B, MULTI_DIM)
    assert bi_class.shape == (B, BI_DIM)
    assert bool(jnp.all((bi_class >= 0.0) & (bi_class <= 1.0)))
    assert bool(jnp.all(jnp.isfinite(multi_class)))
    assert bool(jnp.all(jnp.abs(multi_class - ref_multi) < 5e-2))
    assert bool(jnp.all(jnp.abs(bi_class - ref_bi) < 5e-2))
    print("KERNEL_OK")
</pallas_src>

<mosaic_0001>
module attributes {stable_mosaic.version = 11 : i64} {
  func.func @_heads_kernel(%arg0: i32, %arg1: memref<16x768xf32, #tpu.memory_space<vmem>>, %arg2: memref<768x1024xbf16, #tpu.memory_space<vmem>>, %arg3: memref<1x1024xf32, #tpu.memory_space<vmem>>, %arg4: memref<512x512xbf16, #tpu.memory_space<vmem>>, %arg5: memref<1x512xf32, #tpu.memory_space<vmem>>, %arg6: memref<512x512xbf16, #tpu.memory_space<vmem>>, %arg7: memref<1x512xf32, #tpu.memory_space<vmem>>, %arg8: memref<1024x128xbf16, #tpu.memory_space<vmem>>, %arg9: memref<1x128xf32, #tpu.memory_space<vmem>>, %arg10: memref<16x128xf32, #tpu.memory_space<vmem>>) attributes {dimension_semantics = [#tpu.dimension_semantics<parallel>], iteration_bounds = array<i64: 1>, scalar_prefetch = 0 : i64, scratch_operands = 0 : i64, tpu.core_type = #tpu.core_type<tc>, window_params = [{transform_indices = @transform_0, window_bounds = array<i64: 16, 768>}, {pipeline_mode = #tpu.pipeline_mode<synchronous>, transform_indices = @transform_1, window_bounds = array<i64: 768, 1024>}, {pipeline_mode = #tpu.pipeline_mode<synchronous>, transform_indices = @transform_2, window_bounds = array<i64: 1, 1024>}, {pipeline_mode = #tpu.pipeline_mode<synchronous>, transform_indices = @transform_3, window_bounds = array<i64: 512, 512>}, {pipeline_mode = #tpu.pipeline_mode<synchronous>, transform_indices = @transform_4, window_bounds = array<i64: 1, 512>}, {pipeline_mode = #tpu.pipeline_mode<synchronous>, transform_indices = @transform_5, window_bounds = array<i64: 512, 512>}, {pipeline_mode = #tpu.pipeline_mode<synchronous>, transform_indices = @transform_6, window_bounds = array<i64: 1, 512>}, {pipeline_mode = #tpu.pipeline_mode<synchronous>, transform_indices = @transform_7, window_bounds = array<i64: 1024, 128>}, {pipeline_mode = #tpu.pipeline_mode<synchronous>, transform_indices = @transform_8, window_bounds = array<i64: 1, 128>}, {transform_indices = @transform_9, window_bounds = array<i64: 16, 128>}]} {
    %c0 = arith.constant 0 : index
    %c0_0 = arith.constant 0 : index
    %0 = vector.load %arg1[%c0, %c0_0] : memref<16x768xf32, #tpu.memory_space<vmem>>, vector<16x768xf32>
    %1 = arith.truncf %0 : vector<16x768xf32> to vector<16x768xbf16>
    %c0_1 = arith.constant 0 : index
    %c0_2 = arith.constant 0 : index
    %2 = vector.load %arg2[%c0_1, %c0_2] : memref<768x1024xbf16, #tpu.memory_space<vmem>>, vector<768x1024xbf16>
    %cst = arith.constant dense<0.000000e+00> : vector<16x1024xf32>
    %3 = tpu.matmul %1, %2, %cst {dimension_numbers = #tpu.dot_dimension_numbers<[1], [0], [0], [1], [0, 0, 1, 1], [], []>} : vector<16x768xbf16>, vector<768x1024xbf16>, vector<16x1024xf32> -> vector<16x1024xf32>
    %c0_3 = arith.constant 0 : index
    %c0_4 = arith.constant 0 : index
    %4 = vector.load %arg3[%c0_3, %c0_4] : memref<1x1024xf32, #tpu.memory_space<vmem>>, vector<1x1024xf32>
    %5 = vector.broadcast %4 : vector<1x1024xf32> to vector<16x1024xf32>
    %6 = arith.addf %3, %5 : vector<16x1024xf32>
    %cst_5 = arith.constant 0.000000e+00 : f32
    %7 = vector.broadcast %cst_5 : f32 to vector<16x1024xf32>
    %8 = arith.maximumf %6, %7 : vector<16x1024xf32>
    %9 = arith.truncf %8 : vector<16x1024xf32> to vector<16x1024xbf16>
    %10 = vector.extract_strided_slice %9 {offsets = [0, 0], sizes = [16, 512], strides = [1, 1]} : vector<16x1024xbf16> to vector<16x512xbf16>
    %11 = vector.extract_strided_slice %9 {offsets = [0, 512], sizes = [16, 512], strides = [1, 1]} : vector<16x1024xbf16> to vector<16x512xbf16>
    %c0_6 = arith.constant 0 : index
    %c0_7 = arith.constant 0 : index
    %12 = vector.load %arg4[%c0_6, %c0_7] : memref<512x512xbf16, #tpu.memory_space<vmem>>, vector<512x512xbf16>
    %cst_8 = arith.constant dense<0.000000e+00> : vector<16x512xf32>
    %13 = tpu.matmul %10, %12, %cst_8 {dimension_numbers = #tpu.dot_dimension_numbers<[1], [0], [0], [1], [0, 0, 1, 1], [], []>} : vector<16x512xbf16>, vector<512x512xbf16>, vector<16x512xf32> -> vector<16x512xf32>
    %c0_9 = arith.constant 0 : index
    %c0_10 = arith.constant 0 : index
    %14 = vector.load %arg5[%c0_9, %c0_10] : memref<1x512xf32, #tpu.memory_space<vmem>>, vector<1x512xf32>
    %15 = vector.broadcast %14 : vector<1x512xf32> to vector<16x512xf32>
    %16 = arith.addf %13, %15 : vector<16x512xf32>
    %cst_11 = arith.constant 0.000000e+00 : f32
    %17 = vector.broadcast %cst_11 : f32 to vector<16x512xf32>
    %18 = arith.maximumf %16, %17 : vector<16x512xf32>
    %19 = arith.truncf %18 : vector<16x512xf32> to vector<16x512xbf16>
    %c0_12 = arith.constant 0 : index
    %c0_13 = arith.constant 0 : index
    %20 = vector.load %arg6[%c0_12, %c0_13] : memref<512x512xbf16, #tpu.memory_space<vmem>>, vector<512x512xbf16>
    %cst_14 = arith.constant dense<0.000000e+00> : vector<16x512xf32>
    %21 = tpu.matmul %11, %20, %cst_14 {dimension_numbers = #tpu.dot_dimension_numbers<[1], [0], [0], [1], [0, 0, 1, 1], [], []>} : vector<16x512xbf16>, vector<512x512xbf16>, vector<16x512xf32> -> vector<16x512xf32>
    %c0_15 = arith.constant 0 : index
    %c0_16 = arith.constant 0 : index
    %22 = vector.load %arg7[%c0_15, %c0_16] : memref<1x512xf32, #tpu.memory_space<vmem>>, vector<1x512xf32>
    %23 = vector.broadcast %22 : vector<1x512xf32> to vector<16x512xf32>
    %24 = arith.addf %21, %23 : vector<16x512xf32>
    %cst_17 = arith.constant 0.000000e+00 : f32
    %25 = vector.broadcast %cst_17 : f32 to vector<16x512xf32>
    %26 = arith.maximumf %24, %25 : vector<16x512xf32>
    %27 = arith.truncf %26 : vector<16x512xf32> to vector<16x512xbf16>
    %28 = tpu.concatenate %19, %27 in 1 : vector<16x512xbf16>, vector<16x512xbf16> -> vector<16x1024xbf16>
    %c0_18 = arith.constant 0 : index
    %c0_19 = arith.constant 0 : index
    %29 = vector.load %arg8[%c0_18, %c0_19] : memref<1024x128xbf16, #tpu.memory_space<vmem>>, vector<1024x128xbf16>
    %cst_20 = arith.constant dense<0.000000e+00> : vector<16x128xf32>
    %30 = tpu.matmul %28, %29, %cst_20 {dimension_numbers = #tpu.dot_dimension_numbers<[1], [0], [0], [1], [0, 0, 1, 1], [], []>} : vector<16x1024xbf16>, vector<1024x128xbf16>, vector<16x128xf32> -> vector<16x128xf32>
    %c0_21 = arith.constant 0 : index
    %c0_22 = arith.constant 0 : index
    %31 = vector.load %arg9[%c0_21, %c0_22] : memref<1x128xf32, #tpu.memory_space<vmem>>, vector<1x128xf32>
    %32 = vector.broadcast %31 : vector<1x128xf32> to vector<16x128xf32>
    %33 = arith.addf %30, %32 : vector<16x128xf32>
    %34 = tpu.iota {dimensions = array<i32: 1>} : vector<16x128xi32>
    %c31_i32 = arith.constant 31 : i32
    %35 = vector.broadcast %c31_i32 : i32 to vector<16x128xi32>
    %36 = arith.cmpi eq, %34, %35 : vector<16x128xi32>
    %37 = arith.negf %33 : vector<16x128xf32>
    %38 = math.exp %37 : vector<16x128xf32>
    %cst_23 = arith.constant 1.000000e+00 : f32
    %39 = vector.broadcast %cst_23 : f32 to vector<16x128xf32>
    %40 = arith.addf %39, %38 : vector<16x128xf32>
    %41 = arith.divf %39, %40 : vector<16x128xf32>
    %42 = arith.select %36, %41, %33 : vector<16x128xi1>, vector<16x128xf32>
    %c0_24 = arith.constant 0 : index
    %c0_25 = arith.constant 0 : index
    %43 = vector.load %arg10[%c0_24, %c0_25] : memref<16x128xf32, #tpu.memory_space<vmem>>, vector<16x128xf32>
    tpu.vector_store %arg10[%c0_24, %c0_25], %42 {strides = array<i32>} : memref<16x128xf32, #tpu.memory_space<vmem>>, vector<16x128xf32>,
    return
  }
  func.func @transform_0(%arg0: i32) -> (i32, i32) {
    %c0_i32 = arith.constant 0 : i32
    %c0_i32_0 = arith.constant 0 : i32
    return %arg0, %c0_i32 : i32, i32
  }
  func.func @transform_1(%arg0: i32) -> (i32, i32) {
    %c0_i32 = arith.constant 0 : i32
    %c0_i32_0 = arith.constant 0 : i32
    %c0_i32_1 = arith.constant 0 : i32
    return %c0_i32, %c0_i32_0 : i32, i32
  }
  func.func @transform_2(%arg0: i32) -> (i32, i32) {
    %c0_i32 = arith.constant 0 : i32
    %c0_i32_0 = arith.constant 0 : i32
    %c0_i32_1 = arith.constant 0 : i32
    return %c0_i32, %c0_i32_0 : i32, i32
  }
  func.func @transform_3(%arg0: i32) -> (i32, i32) {
    %c0_i32 = arith.constant 0 : i32
    %c0_i32_0 = arith.constant 0 : i32
    %c0_i32_1 = arith.constant 0 : i32
    return %c0_i32, %c0_i32_0 : i32, i32
  }
  func.func @transform_4(%arg0: i32) -> (i32, i32) {
    %c0_i32 = arith.constant 0 : i32
    %c0_i32_0 = arith.constant 0 : i32
    %c0_i32_1 = arith.constant 0 : i32
    return %c0_i32, %c0_i32_0 : i32, i32
  }
  func.func @transform_5(%arg0: i32) -> (i32, i32) {
    %c0_i32 = arith.constant 0 : i32
    %c0_i32_0 = arith.constant 0 : i32
    %c0_i32_1 = arith.constant 0 : i32
    return %c0_i32, %c0_i32_0 : i32, i32
  }
  func.func @transform_6(%arg0: i32) -> (i32, i32) {
    %c0_i32 = arith.constant 0 : i32
    %c0_i32_0 = arith.constant 0 : i32
    %c0_i32_1 = arith.constant 0 : i32
    return %c0_i32, %c0_i32_0 : i32, i32
  }
  func.func @transform_7(%arg0: i32) -> (i32, i32) {
    %c0_i32 = arith.constant 0 : i32
    %c0_i32_0 = arith.constant 0 : i32
    %c0_i32_1 = arith.constant 0 : i32
    return %c0_i32, %c0_i32_0 : i32, i32
  }
  func.func @transform_8(%arg0: i32) -> (i32, i32) {
    %c0_i32 = arith.constant 0 : i32
    %c0_i32_0 = arith.constant 0 : i32
    %c0_i32_1 = arith.constant 0 : i32
    return %c0_i32, %c0_i32_0 : i32, i32
  }
  func.func @transform_9(%arg0: i32) -> (i32, i32) {
    %c0_i32 = arith.constant 0 : i32
    %c0_i32_0 = arith.constant 0 : i32
    return %arg0, %c0_i32 : i32, i32
  }
}

</mosaic_0001>

<bundles_post_ra>
// kernel: tpu_custom_call.1
= control target key start
LH: loop header
LB: loop body
LE: loop exit
PB: predicated region body
PF: predicated region fallthrough
CT: control target
= control target key end

     0   :  { %14 = vsyncpa [#allocation3], 0  ;;  %s10369_s0 = inlined_call_operand.hbm [shape: f32[16,768], index: 0, kind: input, shape index: {}]   ;;  %s10370_s1 = inlined_call_operand.hbm [shape: bf16[768,1024], index: 1, kind: input, shape index: {}]   ;;  %s10371_s2 = inlined_call_operand.hbm [shape: f32[1,1024], index: 2, kind: input, shape index: {}]   ;;  %s10372_s3 = inlined_call_operand.hbm [shape: bf16[512,512], index: 3, kind: input, shape index: {}]   ;;  %s10373_s4 = inlined_call_operand.hbm [shape: f32[1,512], index: 4, kind: input, shape index: {}]   ;;  %s10374_s5 = inlined_call_operand.hbm [shape: bf16[512,512], index: 5, kind: input, shape index: {}]   ;;  %s10375_s6 = inlined_call_operand.hbm [shape: f32[1,512], index: 6, kind: input, shape index: {}]   ;;  %s10376_s7 = inlined_call_operand.hbm [shape: bf16[1024,128], index: 7, kind: input, shape index: {}]   ;;  %s10377_s8 = inlined_call_operand.hbm [shape: f32[1,128], index: 8, kind: input, shape index: {}]   ;;  %s10378_s9 = inlined_call_operand.hbm [shape: f32[16,128], index: 9, kind: output, shape index: {}]  }
   0x1   :  { %15 = vsyncpa [#allocation6], 0 }
   0x2   :  { %16 = vsyncpa [#allocation9], 0 }
   0x3   :  { %17 = vsyncpa [#allocation12], 0 }
   0x4   :  { %18 = vsyncpa [#allocation15], 0  ;;  %s37_s11 = sshll.u32 %s10370_s1, 4  ;;  %s38_s11 = int_to_ptr.hbm [resolvable:$true] %s37_s11 }
   0x5   :  { %19 = vsyncpa [#allocation4], 0  ;;  %s9810_s12 = smov [#allocation5]   ;;  %s61_s16 = sshll.u32 %s10372_s3, 4  ;;  %s62_s16 = int_to_ptr.hbm [resolvable:$true] %s61_s16 }
   0x6   :  { %s39_s13 = sshll.u32 %s9810_s12, 4  ;;  %s9811_s17 = smov 512   ;;  %s40_s13 = int_to_ptr.vmem [resolvable:$true] %s39_s13 }
   0x7   :  { %s9812_s18 = smov 32   ;;  %s9813_s19 = smov [#allocation8]  }
   0x8   :  { %45 = dma.hbm_to_vmem [thread:$0]  %s38_s11, 49152, %s40_s13, [#allocation6], %s9811_s17, %s9811_s17, %s9812_s18  }
   0x9   :  { %s63_s20 = sshll.u32 %s9813_s19, 4  ;;  %s9814_s21 = smov 256   ;;  %s64_s20 = int_to_ptr.vmem [resolvable:$true] %s63_s20 }
   0xa   :  { %s9815_s22 = smov 16   ;;  %s85_s24 = sshll.u32 %s10374_s5, 4  ;;  %s86_s24 = int_to_ptr.hbm [resolvable:$true] %s85_s24 }
   0xb   :  { %69 = dma.hbm_to_vmem [thread:$0]  %s62_s16, 16384, %s64_s20, [#allocation9], %s9814_s21, %s9814_s21, %s9815_s22  }
   0xc   :  { %s9816_s25 = smov [#allocation11]   ;;  %s109_s28 = sshll.u32 %s10376_s7, 4  ;;  %s110_s28 = int_to_ptr.hbm [resolvable:$true] %s109_s28 }
   0xd   :  { %s87_s26 = sshll.u32 %s9816_s25, 4  ;;  %s9817_s29 = smov [#allocation14]   ;;  %s88_s26 = int_to_ptr.vmem [resolvable:$true] %s87_s26 }
   0xe   :  { %93 = dma.hbm_to_vmem [thread:$0]  %s86_s24, 16384, %s88_s26, [#allocation12], %s9814_s21, %s9814_s21, %s9815_s22  }
   0xf   :  { %s111_s30 = sshll.u32 %s9817_s29, 4  ;;  %s9818_s10 = smov 64   ;;  %s112_s30 = int_to_ptr.vmem [resolvable:$true] %s111_s30 }
  0x10   :  { %s9819_s11 = smov 4   ;;  %s24_s5 = sshll.u32 %s10369_s0, 4  ;;  %s25_s5 = int_to_ptr.hbm [resolvable:$true] %s24_s5 }
  0x11   :  { %117 = dma.hbm_to_vmem [thread:$0]  %s110_s28, 8192, %s112_s30, [#allocation15], %s9818_s10, %s9818_s10, %s9819_s11  }
  0x12   :  { %s9820_s14 = smov [#allocation2]   ;;  %s51_s7 = sshll.u32 %s10371_s2, 4  ;;  %s52_s7 = int_to_ptr.hbm [resolvable:$true] %s51_s7 }
  0x13   :  { %s26_s15 = sshll.u32 %s9820_s14, 4  ;;  %s9821_s18 = smov 768   ;;  %s27_s15 = int_to_ptr.vmem [resolvable:$true] %s26_s15 }
  0x14   :  { %s9822_s19 = smov 48   ;;  %s9823_s20 = smov [#allocation7]  }
  0x15   :  { %32 = dma.hbm_to_vmem [thread:$0]  %s25_s5, 1536, %s27_s15, [#allocation3], %s9821_s18, %s9821_s18, %s9822_s19  }
  0x16   :  { %s53_s21 = sshll.u32 %s9823_s20, 4  ;;  %s75_s23 = sshll.u32 %s10373_s4, 4  ;;  %s54_s21 = int_to_ptr.vmem [resolvable:$true] %s53_s21  ;;  %s76_s23 = int_to_ptr.hbm [resolvable:$true] %s75_s23 }
  0x17   :  { %56 = dma.hbm_to_vmem [thread:$0]  %s52_s7, 128, %s54_s21, [#allocation6]  }
  0x18   :  { %s99_s25 = sshll.u32 %s10375_s6, 4  ;;  %s9824_s26 = smov [#allocation10]   ;;  %s100_s25 = int_to_ptr.hbm [resolvable:$true] %s99_s25 }
  0x19   :  { %s77_s27 = sshll.u32 %s9824_s26, 4  ;;  %s9825_s2 = smov [#allocation13]   ;;  %s78_s27 = int_to_ptr.vmem [resolvable:$true] %s77_s27 }
  0x1a   :  { %80 = dma.hbm_to_vmem [thread:$0]  %s76_s23, 64, %s78_s27, [#allocation9]  }
  0x1b   :  { %s101_s3 = sshll.u32 %s9825_s2, 4  ;;  %s123_s30 = sshll.u32 %s10377_s8, 4  ;;  %s102_s3 = int_to_ptr.vmem [resolvable:$true] %s101_s3  ;;  %s124_s30 = int_to_ptr.hbm [resolvable:$true] %s123_s30 }
  0x1c   :  { %104 = dma.hbm_to_vmem [thread:$0]  %s100_s25, 64, %s102_s3, [#allocation12]  }
  0x1d   :  { %s9826_s4 = smov [#allocation16]  }
  0x1e   :  { %s125_s10 = sshll.u32 %s9826_s4, 4  ;;  %s126_s10 = int_to_ptr.vmem [resolvable:$true] %s125_s10 }
  0x1f   :  { %128 = dma.hbm_to_vmem [thread:$0]  %s124_s30, 16, %s126_s10, [#allocation15]  }
  0x20   :  { %9798 = dma.done.wait [#allocation3], 1536  }
  0x21   :  { %9799 = vsyncadd [#allocation3], 4294965760 }
  0x22   :  { %9800 = dma.done.wait [#allocation6], 49280  }
  0x23   :  { %9801 = vsyncadd [#allocation6], 4294918016 }
  0x24   :  { %9802 = dma.done.wait [#allocation9], 16448  }
  0x25   :  { %9803 = vsyncadd [#allocation9], 4294950848 }
  0x26   :  { %9804 = dma.done.wait [#allocation12], 16448  }
  0x27   :  { %9805 = vsyncadd [#allocation12], 4294950848 }
  0x28   :  { %9806 = dma.done.wait [#allocation15], 8208  }
  0x29   :  { %9807 = vsyncadd [#allocation15], 4294959088  ;;  %v6231_v0 = vld [vmem:[#allocation5 + $0x1c0] sm:$0xf]  ;;  %s9827_s6 = smov [#allocation17]   ;;  %s5988_s13 = sshll.u32 %s10378_s9, 4  ;;  %s5989_s13 = int_to_ptr.hbm [resolvable:$true] %s5988_s13 }
  0x2a   :  { %v8883_v1 = vld [vmem:[#allocation5 + $0x1dc] sm:$0xf0]  ;;  %s5986_s8 = sshll.u32 %s9827_s6, 4  ;;  %s9828_s5 = smov 128   ;;  %s5987_s8 = int_to_ptr.vmem [resolvable:$true] %s5986_s8 }
  0x2b   :  { %v6487_v2 = vld [vmem:[#allocation5 + $0x3c0] sm:$0xf]  ;;  %v6232_v3 = vor.u32 %v8883_v1, %v6231_v0  ;;  %s9829_s14 = smov 8  }
  0x2c   :  { %v8947_v4 = vld [vmem:[#allocation5 + $0x3dc] sm:$0xf0] }
  0x2d   :  { %v6743_v5 = vld [vmem:[#allocation5 + $0x5c0] sm:$0xf]  ;;  %v6488_v7 = vor.u32 %v8947_v4, %v6487_v2  ;;  %2505 = vmatpush.bf16.msra.mxu0 %v6232_v3 }
  0x2e   :  { %v9011_v6 = vld [vmem:[#allocation5 + $0x5dc] sm:$0xf0] }
  0x2f   :  { %v6744_v8 = vor.u32 %v9011_v6, %v6743_v5  ;;  %v6999_v9 = vld [vmem:[#allocation5 + $0x7c0] sm:$0xf]  ;;  %2519 = vmatpush.bf16.msra.mxu1 %v6488_v7 }
  0x30   :  { %v9075_v10 = vld [vmem:[#allocation5 + $0x7dc] sm:$0xf0] }
  0x31   :  { %v6199_v11 = vld [vmem:[#allocation5 + $0x180] sm:$0xf]  ;;  %v7000_v12 = vor.u32 %v9075_v10, %v6999_v9  ;;  %2533 = vmatpush.bf16.msra.mxu2 %v6744_v8 }
  0x32   :  { %v8875_v13 = vld [vmem:[#allocation5 + $0x19c] sm:$0xf0] }
  0x33   :  { %v6455_v14 = vld [vmem:[#allocation5 + $0x380] sm:$0xf]  ;;  %v6200_v16 = vor.u32 %v8875_v13, %v6199_v11  ;;  %2547 = vmatpush.bf16.msra.mxu3 %v7000_v12 }
  0x34   :  { %v8939_v15 = vld [vmem:[#allocation5 + $0x39c] sm:$0xf0] }
  0x35   :  { %v6456_v17 = vor.u32 %v8939_v15, %v6455_v14  ;;  %v6711_v18 = vld [vmem:[#allocation5 + $0x580] sm:$0xf]  ;;  %2506 = vmatpush.bf16.msra.mxu0 %v6200_v16 }
  0x36   :  { %v9003_v19 = vld [vmem:[#allocation5 + $0x59c] sm:$0xf0] }
  0x37   :  { %v6967_v20 = vld [vmem:[#allocation5 + $0x780] sm:$0xf]  ;;  %v6712_v21 = vor.u32 %v9003_v19, %v6711_v18  ;;  %2520 = vmatpush.bf16.msra.mxu1 %v6456_v17 }
  0x38   :  { %v9067_v22 = vld [vmem:[#allocation5 + $0x79c] sm:$0xf0] }
  0x39   :  { %v6167_v23 = vld [vmem:[#allocation5 + $0x140] sm:$0xf]  ;;  %v6968_v25 = vor.u32 %v9067_v22, %v6967_v20  ;;  %2534 = vmatpush.bf16.msra.mxu2 %v6712_v21 }
  0x3a   :  { %v8867_v24 = vld [vmem:[#allocation5 + $0x15c] sm:$0xf0] }
  0x3b   :  { %v6423_v26 = vld [vmem:[#allocation5 + $0x340] sm:$0xf]  ;;  %v6168_v29 = vor.u32 %v8867_v24, %v6167_v23  ;;  %2548 = vmatpush.bf16.msra.mxu3 %v6968_v25 }
  0x3c   :  { %v8931_v27 = vld [vmem:[#allocation5 + $0x35c] sm:$0xf0] }
  0x3d   :  { %v6679_v28 = vld [vmem:[#allocation5 + $0x540] sm:$0xf]  ;;  %v6424_v33 = vor.u32 %v8931_v27, %v6423_v26  ;;  %2507 = vmatpush.bf16.msra.mxu0 %v6168_v29 }
  0x3e   :  { %v8995_v30 = vld [vmem:[#allocation5 + $0x55c] sm:$0xf0] }
  0x3f   :  { %v6935_v31 = vld [vmem:[#allocation5 + $0x740] sm:$0xf]  ;;  %v6680_v34 = vor.u32 %v8995_v30, %v6679_v28  ;;  %2521 = vmatpush.bf16.msra.mxu1 %v6424_v33  ;;  %v8879_v33 = vld [vmem:[#allocation5 + $0x1c4] sm:$0xf] }
  0x40   :  { %v9059_v32 = vld [vmem:[#allocation5 + $0x75c] sm:$0xf0] }
  0x41   :  { %v6135_v35 = vld [vmem:[#allocation5 + $0x100] sm:$0xf]  ;;  %v6936_v38 = vor.u32 %v9059_v32, %v6935_v31  ;;  %2535 = vmatpush.bf16.msra.mxu2 %v6680_v34  ;;  %v6233_v34 = vld [vmem:[#allocation5 + $0x1e0] sm:$0xf0] }
  0x42   :  { %v8859_v36 = vld [vmem:[#allocation5 + $0x11c] sm:$0xf0] }
  0x43   :  { %v6391_v37 = vld [vmem:[#allocation5 + $0x300] sm:$0xf]  ;;  %v6136_v44 = vor.u32 %v8859_v36, %v6135_v35  ;;  %2549 = vmatpush.bf16.msra.mxu3 %v6936_v38  ;;  %v6489_v38 = vld [vmem:[#allocation5 + $0x3e0] sm:$0xf0] }
  0x44   :  { %v8923_v39 = vld [vmem:[#allocation5 + $0x31c] sm:$0xf0] }
  0x45   :  { %v6647_v40 = vld [vmem:[#allocation5 + $0x500] sm:$0xf]  ;;  %v6392_v45 = vor.u32 %v8923_v39, %v6391_v37  ;;  %2508 = vmatpush.bf16.msra.mxu0 %v6136_v44  ;;  %v8943_v37 = vld [vmem:[#allocation5 + $0x3c4] sm:$0xf] }
  0x46   :  { %v8987_v41 = vld [vmem:[#allocation5 + $0x51c] sm:$0xf0] }
  0x47   :  { %v6903_v42 = vld [vmem:[#allocation5 + $0x700] sm:$0xf]  ;;  %v6648_v46 = vor.u32 %v8987_v41, %v6647_v40  ;;  %2522 = vmatpush.bf16.msra.mxu1 %v6392_v45 }
  0x48   :  { %v9051_v43 = vld [vmem:[#allocation5 + $0x71c] sm:$0xf0] }
  0x49   :  { %v6103_v47 = vld [vmem:[#allocation5 + $0xc0] sm:$0xf]  ;;  %v6904_v50 = vor.u32 %v9051_v43, %v6903_v42  ;;  %2536 = vmatpush.bf16.msra.mxu2 %v6648_v46  ;;  %v6236_v43 = vor.u32 %v8879_v33, %v6233_v34  ;;  %v6105_v33 = vld [vmem:[#allocation5 + $0xe0] sm:$0xf0] }
  0x4a   :  { %v8851_v48 = vld [vmem:[#allocation5 + $0xdc] sm:$0xf0]  ;;  %v8911_v34 = vld [vmem:[#allocation5 + $0x2c4] sm:$0xf] }
  0x4b   :  { %v6359_v49 = vld [vmem:[#allocation5 + $0x2c0] sm:$0xf]  ;;  %v6104_v56 = vor.u32 %v8851_v48, %v6103_v47  ;;  %2550 = vmatpush.bf16.msra.mxu3 %v6904_v50  ;;  %v6492_v47 = vor.u32 %v8943_v37, %v6489_v38  ;;  %v8871_v48 = vld [vmem:[#allocation5 + $0x184] sm:$0xf] }
  0x4c   :  { %v8915_v51 = vld [vmem:[#allocation5 + $0x2dc] sm:$0xf0]  ;;  %v8935_v50 = vld [vmem:[#allocation5 + $0x384] sm:$0xf] }
  0x4d   :  { %v6615_v52 = vld [vmem:[#allocation5 + $0x4c0] sm:$0xf]  ;;  %v6360_v57 = vor.u32 %v8915_v51, %v6359_v49  ;;  %2509 = vmatpush.bf16.msra.mxu0 %v6104_v56  ;;  %v6201_v49 = vld [vmem:[#allocation5 + $0x1a0] sm:$0xf0] }
  0x4e   :  { %v8979_v53 = vld [vmem:[#allocation5 + $0x4dc] sm:$0xf0]  ;;  %v6457_v51 = vld [vmem:[#allocation5 + $0x3a0] sm:$0xf0] }
  0x4f   :  { %v6871_v54 = vld [vmem:[#allocation5 + $0x6c0] sm:$0xf]  ;;  %v6616_v58 = vor.u32 %v8979_v53, %v6615_v52  ;;  %2523 = vmatpush.bf16.msra.mxu1 %v6360_v57  ;;  %v171_v53 = vld [vmem:[#allocation2 + $0x30] sm:$0xff] }
  0x50   :  { %v9043_v55 = vld [vmem:[#allocation5 + $0x6dc] sm:$0xf0] }
  0x51   :  { %v6071_v59 = vld [vmem:[#allocation5 + $0x80] sm:$0xf]  ;;  %v6872_v62 = vor.u32 %v9043_v55, %v6871_v54  ;;  %2537 = vmatpush.bf16.msra.mxu2 %v6616_v58 }
  0x52   :  { %v8843_v60 = vld [vmem:[#allocation5 + $0x9c] sm:$0xf0] }
  0x53   :  { %v6327_v61 = vld [vmem:[#allocation5 + $0x280] sm:$0xf]  ;;  %v6072_v4 = vor.u32 %v8843_v60, %v6071_v59  ;;  %2551 = vmatpush.bf16.msra.mxu3 %v6872_v62  ;;  %v6204_v59 = vor.u32 %v8871_v48, %v6201_v49  ;;  %v8863_v62 = vld [vmem:[#allocation5 + $0x144] sm:$0xf] }
  0x54   :  { %v8907_v63 = vld [vmem:[#allocation5 + $0x29c] sm:$0xf0] }
  0x55   :  { %v6583_v0 = vld [vmem:[#allocation5 + $0x480] sm:$0xf]  ;;  %v6328_v5 = vor.u32 %v8907_v63, %v6327_v61  ;;  %2510 = vmatpush.bf16.msra.mxu0 %v6072_v4  ;;  %v6460_v63 = vor.u32 %v8935_v50, %v6457_v51  ;;  %v6425_v4 = vld [vmem:[#allocation5 + $0x360] sm:$0xf0] }
  0x56   :  { %v8971_v1 = vld [vmem:[#allocation5 + $0x49c] sm:$0xf0] }
  0x57   :  { %v6839_v2 = vld [vmem:[#allocation5 + $0x680] sm:$0xf]  ;;  %v6584_v6 = vor.u32 %v8971_v1, %v6583_v0  ;;  %2524 = vmatpush.bf16.msra.mxu1 %v6328_v5  ;;  %v6169_v0 = vld [vmem:[#allocation5 + $0x160] sm:$0xf0]  ;;  %v166_v1 = vld [vmem:[#allocation2 + $0x8] sm:$0xff] }
  0x58   :  { %v9035_v3 = vld [vmem:[#allocation5 + $0x69c] sm:$0xf0] }
  0x59   :  { %v6039_v7 = vld [vmem:[#allocation5 + $0x40] sm:$0xf]  ;;  %v6840_v10 = vor.u32 %v9035_v3, %v6839_v2  ;;  %2538 = vmatpush.bf16.msra.mxu2 %v6584_v6  ;;  %v172_v2 = vld [vmem:[#allocation2 + $0x38] sm:$0xff]  ;;  %v8927_v3 = vld [vmem:[#allocation5 + $0x344] sm:$0xf] }
  0x5a   :  { %v8835_v8 = vld [vmem:[#allocation5 + $0x5c] sm:$0xf0]  ;;  %v9910_v6 = vpack.c.bf16 %v172_v2, %v166_v1 }
  0x5b   :  { %v6295_v9 = vld [vmem:[#allocation5 + $0x240] sm:$0xf]  ;;  %v6040_v16 = vor.u32 %v8835_v8, %v6039_v7  ;;  %2552 = vmatpush.bf16.msra.mxu3 %v6840_v10 }
  0x5c   :  { %v8899_v11 = vld [vmem:[#allocation5 + $0x25c] sm:$0xf0] }
  0x5d   :  { %v6551_v12 = vld [vmem:[#allocation5 + $0x440] sm:$0xf]  ;;  %v6296_v19 = vor.u32 %v8899_v11, %v6295_v9  ;;  %2511 = vmatpush.bf16.msra.mxu0 %v6040_v16  ;;  %v6428_v16 = vor.u32 %v8927_v3, %v6425_v4  ;;  %v8823_v4 = vld [vmem:[#allocation5 + $0x4] sm:$0xf] }
  0x5e   :  { %v8963_v13 = vld [vmem:[#allocation5 + $0x45c] sm:$0xf0] }
  0x5f   :  { %v6807_v14 = vld [vmem:[#allocation5 + $0x640] sm:$0xf]  ;;  %v6552_v20 = vor.u32 %v8963_v13, %v6551_v12  ;;  %2525 = vmatpush.bf16.msra.mxu1 %v6296_v19  ;;  %v6172_v12 = vor.u32 %v8863_v62, %v6169_v0  ;;  %v8855_v13 = vld [vmem:[#allocation5 + $0x104] sm:$0xf]  ;;  %v174_v19 = vld [vmem:[#allocation2 + $0x48] sm:$0xff] }
  0x60   :  { %v9027_v15 = vld [vmem:[#allocation5 + $0x65c] sm:$0xf0] }
  0x61   :  { %v6007_v17 = vld [vmem:[#allocation5] sm:$0xf]  ;;  %v6808_v24 = vor.u32 %v9027_v15, %v6807_v14  ;;  %2539 = vmatpush.bf16.msra.mxu2 %v6552_v20  ;;  %v6137_v14 = vld [vmem:[#allocation5 + $0x120] sm:$0xf0]  ;;  %v167_v15 = vld [vmem:[#allocation2 + $0x10] sm:$0xff] }
  0x62   :  { %v8827_v18 = vld [vmem:[#allocation5 + $0x1c] sm:$0xf0]  ;;  %v8919_v20 = vld [vmem:[#allocation5 + $0x304] sm:$0xf] }
  0x63   :  { %v6263_v21 = vld [vmem:[#allocation5 + $0x200] sm:$0xf]  ;;  %v6008_v31 = vor.u32 %v8827_v18, %v6007_v17  ;;  %2553 = vmatpush.bf16.msra.mxu3 %v6808_v24  ;;  %v168_v18 = vld [vmem:[#allocation2 + $0x18] sm:$0xff] }
  0x64   :  { %v8891_v22 = vld [vmem:[#allocation5 + $0x21c] sm:$0xf0] }
  0x65   :  { %v6519_v23 = vld [vmem:[#allocation5 + $0x400] sm:$0xf]  ;;  %v6264_v35 = vor.u32 %v8891_v22, %v6263_v21  ;;  %2512 = vmatpush.bf16.msra.mxu0 %v6008_v31  ;;  %v6393_v21 = vld [vmem:[#allocation5 + $0x320] sm:$0xf0] }
  0x66   :  { %v8955_v25 = vld [vmem:[#allocation5 + $0x41c] sm:$0xf0] }
  0x67   :  { %v6775_v26 = vld [vmem:[#allocation5 + $0x600] sm:$0xf]  ;;  %v6520_v36 = vor.u32 %v8955_v25, %v6519_v23  ;;  %2526 = vmatpush.bf16.msra.mxu1 %v6264_v35  ;;  %v9915_v23 = vpack.c.bf16 %v174_v19, %v168_v18  ;;  %v6361_v35 = vld [vmem:[#allocation5 + $0x2e0] sm:$0xf0] }
  0x68   :  { %v9019_v27 = vld [vmem:[#allocation5 + $0x61c] sm:$0xf0] }
  0x69   :  { %v7255_v28 = vld [vmem:[#allocation5 + $0x9c0] sm:$0xf]  ;;  %v6776_v39 = vor.u32 %v9019_v27, %v6775_v26  ;;  %2540 = vmatpush.bf16.msra.mxu2 %v6520_v36  ;;  %v6140_v26 = vor.u32 %v8855_v13, %v6137_v14  ;;  %v7001_v13 = vld [vmem:[#allocation5 + $0x7e0] sm:$0xf0] }
  0x6a   :  { %v9139_v29 = vld [vmem:[#allocation5 + $0x9dc] sm:$0xf0]  ;;  %2527 = vmatmul.bf16.vlgmr.msra.gmra.mxu1 %v9910_v6 }
  0x6b   :  { %v7511_v30 = vld [vmem:[#allocation5 + $0xbc0] sm:$0xf]  ;;  %v7256_v40 = vor.u32 %v9139_v29, %v7255_v28  ;;  %2554 = vmatpush.bf16.msra.mxu3 %v6776_v39 }
  0x6c   :  { %v9203_v32 = vld [vmem:[#allocation5 + $0xbdc] sm:$0xf0] }
  0x6d   :  { %v7223_v41 = vld [vmem:[#allocation5 + $0x980] sm:$0xf]  ;;  %v7512_v42 = vor.u32 %v9203_v32, %v7511_v30  ;;  %2561 = vmatpush.bf16.msrb.mxu0 %v7256_v40  ;;  %2589 = vmatpush.bf16.msrb.mxu2 %v6236_v43  ;;  %v6396_v30 = vor.u32 %v8919_v20, %v6393_v21  ;;  %v8847_v32 = vld [vmem:[#allocation5 + $0xc4] sm:$0xf] }
  0x6e   :  { %v9131_v44 = vld [vmem:[#allocation5 + $0x99c] sm:$0xf0]  ;;  %2555 = vmatmul.bf16.vlgmr.msra.gmra.mxu3 %v9915_v23  ;;  %v6108_v38 = vor.u32 %v8847_v32, %v6105_v33  ;;  %v7513_v20 = vld [vmem:[#allocation5 + $0xbe0] sm:$0xf0] }
  0x6f   :  { %v7479_v45 = vld [vmem:[#allocation5 + $0xb80] sm:$0xf]  ;;  %v7224_v54 = vor.u32 %v9131_v44, %v7223_v41  ;;  %2575 = vmatpush.bf16.msrb.mxu1 %v7512_v42  ;;  %2603 = vmatpush.bf16.msrb.mxu3 %v6492_v47  ;;  %v6364_v42 = vor.u32 %v8911_v34, %v6361_v35  ;;  %v8839_v44 = vld [vmem:[#allocation5 + $0x84] sm:$0xf] }
  0x70   :  { %v9195_v46 = vld [vmem:[#allocation5 + $0xb9c] sm:$0xf0]  ;;  %v6329_v47 = vld [vmem:[#allocation5 + $0x2a0] sm:$0xf0] }
  0x71   :  { %v165_v52 = vld [vmem:[#allocation2] sm:$0xff]  ;;  %v7480_v58 = vor.u32 %v9195_v46, %v7479_v45  ;;  %2562 = vmatpush.bf16.msrb.mxu0 %v7224_v54  ;;  %2590 = vmatpush.bf16.msrb.mxu2 %v6204_v59 }
  0x72   :  { %v7191_v55 = vld [vmem:[#allocation5 + $0x940] sm:$0xf]  ;;  %v9907_v57 = vpack.c.bf16 %v171_v53, %v165_v52  ;;  %v6073_v45 = vld [vmem:[#allocation5 + $0xa0] sm:$0xf0] }
  0x73   :  { %v9123_v56 = vld [vmem:[#allocation5 + $0x95c] sm:$0xf0]  ;;  %2576 = vmatpush.bf16.msrb.mxu1 %v7480_v58  ;;  %2604 = vmatpush.bf16.msrb.mxu3 %v6460_v63  ;;  %v8903_v46 = vld [vmem:[#allocation5 + $0x284] sm:$0xf]  ;;  %v6076_v50 = vor.u32 %v8839_v44, %v6073_v45 }
  0x74   :  { %v7447_v60 = vld [vmem:[#allocation5 + $0xb40] sm:$0xf]  ;;  %2513 = vmatmul.bf16.vlgmr.msra.gmra.mxu0 %v9907_v57  ;;  %v7192_v7 = vor.u32 %v9123_v56, %v7191_v55  ;;  %v6332_v54 = vor.u32 %v8903_v46, %v6329_v47  ;;  %v8831_v56 = vld [vmem:[#allocation5 + $0x44] sm:$0xf] }
  0x75   :  { %v9187_v61 = vld [vmem:[#allocation5 + $0xb5c] sm:$0xf0]  ;;  %2591 = vmatpush.bf16.msrb.mxu2 %v6172_v12  ;;  %v6041_v58 = vld [vmem:[#allocation5 + $0x60] sm:$0xf0] }
  0x76   :  { %v7159_v5 = vld [vmem:[#allocation5 + $0x900] sm:$0xf]  ;;  %v7448_v11 = vor.u32 %v9187_v61, %v7447_v60  ;;  %2563 = vmatpush.bf16.msrb.mxu0 %v7192_v7  ;;  %v8895_v59 = vld [vmem:[#allocation5 + $0x244] sm:$0xf]  ;;  %v6044_v2 = vor.u32 %v8831_v56, %v6041_v58 }
  0x77   :  { %v9115_v8 = vld [vmem:[#allocation5 + $0x91c] sm:$0xf0]  ;;  %2605 = vmatpush.bf16.msrb.mxu3 %v6428_v16  ;;  %v6297_v60 = vld [vmem:[#allocation5 + $0x260] sm:$0xf0] }
  0x78   :  { %v7415_v9 = vld [vmem:[#allocation5 + $0xb00] sm:$0xf]  ;;  %v7160_v24 = vor.u32 %v9115_v8, %v7159_v5  ;;  %2577 = vmatpush.bf16.msrb.mxu1 %v7448_v11  ;;  %v6009_v5 = vld [vmem:[#allocation5 + $0x20] sm:$0xf0]  ;;  %v6300_v7 = vor.u32 %v8895_v59, %v6297_v60 }
  0x79   :  { %v9179_v10 = vld [vmem:[#allocation5 + $0xb1c] sm:$0xf0]  ;;  %2592 = vmatpush.bf16.msrb.mxu2 %v6140_v26  ;;  %v8887_v8 = vld [vmem:[#allocation5 + $0x204] sm:$0xf]  ;;  %v6012_v19 = vor.u32 %v8823_v4, %v6009_v5 }
  0x7a   :  { %v173_v17 = vld [vmem:[#allocation2 + $0x40] sm:$0xff]  ;;  %v7416_v25 = vor.u32 %v9179_v10, %v7415_v9  ;;  %2564 = vmatpush.bf16.msrb.mxu0 %v7160_v24  ;;  %v175_v24 = vld [vmem:[#allocation2 + $0x50] sm:$0xff] }
  0x7b   :  { %v9913_v22 = vpack.c.bf16 %v173_v17, %v167_v15  ;;  %v7127_v27 = vld [vmem:[#allocation5 + $0x8c0] sm:$0xf]  ;;  %2606 = vmatpush.bf16.msrb.mxu3 %v6396_v30  ;;  %v6265_v9 = vld [vmem:[#allocation5 + $0x220] sm:$0xf0] }
  0x7c   :  { %v9107_v28 = vld [vmem:[#allocation5 + $0x8dc] sm:$0xf0]  ;;  %2578 = vmatpush.bf16.msrb.mxu1 %v7416_v25  ;;  %v9007_v10 = vld [vmem:[#allocation5 + $0x5c4] sm:$0xf]  ;;  %v6268_v25 = vor.u32 %v8887_v8, %v6265_v9 }
  0x7d   :  { %v7383_v29 = vld [vmem:[#allocation5 + $0xac0] sm:$0xf]  ;;  %2541 = vmatmul.bf16.vlgmr.msra.gmra.mxu2 %v9913_v22  ;;  %v7128_v36 = vor.u32 %v9107_v28, %v7127_v27  ;;  %v6745_v11 = vld [vmem:[#allocation5 + $0x5e0] sm:$0xf0]  ;;  %v170_v27 = vld [vmem:[#allocation2 + $0x28] sm:$0xff] }
  0x7e   :  { %v9171_v31 = vld [vmem:[#allocation5 + $0xadc] sm:$0xf0]  ;;  %2593 = vmatpush.bf16.msrb.mxu2 %v6108_v38  ;;  %v9071_v12 = vld [vmem:[#allocation5 + $0x7c4] sm:$0xf]  ;;  %v6748_v26 = vor.u32 %v9007_v10, %v6745_v11  ;;  %v176_v28 = vld [vmem:[#allocation2 + $0x58] sm:$0xff] }
  0x7f   :  { %v7384_v37 = vor.u32 %v9171_v31, %v7383_v29  ;;  %v7095_v39 = vld [vmem:[#allocation5 + $0x880] sm:$0xf]  ;;  %2565 = vmatpush.bf16.msrb.mxu0 %v7128_v36  ;;  %2607 = vmatpush.bf16.msrb.mxu3 %v6364_v42  ;;  %v9135_v15 = vld [vmem:[#allocation5 + $0x9c4] sm:$0xf]  ;;  %v7004_v29 = vor.u32 %v9071_v12, %v7001_v13 }
  0x80   :  { %v9099_v40 = vld [vmem:[#allocation5 + $0x89c] sm:$0xf0]  ;;  %v7257_v16 = vld [vmem:[#allocation5 + $0x9e0] sm:$0xf0] }
  0x81   :  { %v7351_v41 = vld [vmem:[#allocation5 + $0xa80] sm:$0xf]  ;;  %v7096_v48 = vor.u32 %v9099_v40, %v7095_v39  ;;  %2579 = vmatpush.bf16.msrb.mxu1 %v7384_v37  ;;  %v9199_v17 = vld [vmem:[#allocation5 + $0xbc4] sm:$0xf]  ;;  %v7260_v30 = vor.u32 %v9135_v15, %v7257_v16  ;;  %v9921_v39 = vpack.c.bf16 %v176_v28, %v170_v27 }
  0x82   :  { %v9163_v43 = vld [vmem:[#allocation5 + $0xa9c] sm:$0xf0]  ;;  %2594 = vmatpush.bf16.msrb.mxu2 %v6076_v50  ;;  %v8999_v31 = vld [vmem:[#allocation5 + $0x584] sm:$0xf]  ;;  %v7516_v34 = vor.u32 %v9199_v17, %v7513_v20 }
  0x83   :  { %v7352_v49 = vor.u32 %v9163_v43, %v7351_v41  ;;  %v7063_v51 = vld [vmem:[#allocation5 + $0x840] sm:$0xf]  ;;  %2566 = vmatpush.bf16.msrb.mxu0 %v7096_v48  ;;  %2608 = vmatpush.bf16.msrb.mxu3 %v6332_v54  ;;  %v6713_v32 = vld [vmem:[#allocation5 + $0x5a0] sm:$0xf0] }
  0x84   :  { %v9091_v52 = vld [vmem:[#allocation5 + $0x85c] sm:$0xf0]  ;;  %v9063_v33 = vld [vmem:[#allocation5 + $0x784] sm:$0xf]  ;;  %v6716_v42 = vor.u32 %v8999_v31, %v6713_v32 }
  0x85   :  { %v7319_v53 = vld [vmem:[#allocation5 + $0xa40] sm:$0xf]  ;;  %v7064_v61 = vor.u32 %v9091_v52, %v7063_v51  ;;  %2580 = vmatpush.bf16.msrb.mxu1 %v7352_v49  ;;  %v6969_v36 = vld [vmem:[#allocation5 + $0x7a0] sm:$0xf0] }
  0x86   :  { %v9155_v55 = vld [vmem:[#allocation5 + $0xa5c] sm:$0xf0]  ;;  %2595 = vmatpush.bf16.msrb.mxu2 %v6044_v2  ;;  %v9127_v37 = vld [vmem:[#allocation5 + $0x984] sm:$0xf]  ;;  %v6972_v43 = vor.u32 %v9063_v33, %v6969_v36 }
  0x87   :  { %v7031_v62 = vld [vmem:[#allocation5 + $0x800] sm:$0xf]  ;;  %v7320_v1 = vor.u32 %v9155_v55, %v7319_v53  ;;  %2567 = vmatpush.bf16.msrb.mxu0 %v7064_v61  ;;  %2609 = vmatpush.bf16.msrb.mxu3 %v6300_v7  ;;  %v7225_v38 = vld [vmem:[#allocation5 + $0x9a0] sm:$0xf0] }
  0x88   :  { %v9083_v63 = vld [vmem:[#allocation5 + $0x81c] sm:$0xf0]  ;;  %v9191_v40 = vld [vmem:[#allocation5 + $0xb84] sm:$0xf]  ;;  %v7228_v44 = vor.u32 %v9127_v37, %v7225_v38 }
  0x89   :  { %v7287_v0 = vld [vmem:[#allocation5 + $0xa00] sm:$0xf]  ;;  %v7032_v14 = vor.u32 %v9083_v63, %v7031_v62  ;;  %2581 = vmatpush.bf16.msrb.mxu1 %v7320_v1  ;;  %v7481_v41 = vld [vmem:[#allocation5 + $0xba0] sm:$0xf0] }
  0x8a   :  { %v9147_v3 = vld [vmem:[#allocation5 + $0xa1c] sm:$0xf0]  ;;  %2596 = vmatpush.bf16.msrb.mxu2 %v6012_v19  ;;  %v8991_v45 = vld [vmem:[#allocation5 + $0x544] sm:$0xf]  ;;  %v7484_v48 = vor.u32 %v9191_v40, %v7481_v41 }
  0x8b   :  { %v7288_v18 = vor.u32 %v9147_v3, %v7287_v0  ;;  %v169_v21 = vld [vmem:[#allocation2 + $0x20] sm:$0xff]  ;;  %2568 = vmatpush.bf16.msrb.mxu0 %v7032_v14  ;;  %2610 = vmatpush.bf16.msrb.mxu3 %v6268_v25 }
  0x8c   :  { %v9919_v35 = vpack.c.bf16 %v175_v24, %v169_v21  ;;  %v6681_v46 = vld [vmem:[#allocation5 + $0x560] sm:$0xf0] }
  0x8d   :  { %2582 = vmatpush.bf16.msrb.mxu1 %v7288_v18  ;;  %v9055_v47 = vld [vmem:[#allocation5 + $0x744] sm:$0xf]  ;;  %2597 = vmatmul.bf16.vlgmr.msrb.gmra.mxu2 %v9907_v57  ;;  %v6684_v54 = vor.u32 %v8991_v45, %v6681_v46 }
  0x8e   :  { %2645 = vmatpush.bf16.msra.mxu2 %v7260_v30  ;;  %2569 = vmatmul.bf16.vlgmr.msrb.gmra.mxu0 %v9919_v35  ;;  %v6937_v49 = vld [vmem:[#allocation5 + $0x760] sm:$0xf0] }
  0x8f   :  { %2617 = vmatpush.bf16.msra.mxu0 %v6748_v26  ;;  %2659 = vmatpush.bf16.msra.mxu3 %v7516_v34  ;;  %v9119_v50 = vld [vmem:[#allocation5 + $0x944] sm:$0xf]  ;;  %v6940_v55 = vor.u32 %v9055_v47, %v6937_v49 }
  0x90   :  { %v7193_v51 = vld [vmem:[#allocation5 + $0x960] sm:$0xf0]  ;;  %2583 = vmatmul.bf16.vlgmr.msrb.gmra.mxu1 %v9921_v39  ;;  %2611 = vmatmul.bf16.vlgmr.msrb.gmra.mxu3 %v9910_v6 }
  0x91   :  { %2631 = vmatpush.bf16.msra.mxu1 %v7004_v29  ;;  %v9183_v52 = vld [vmem:[#allocation5 + $0xb44] sm:$0xf]  ;;  %v7196_v56 = vor.u32 %v9119_v50, %v7193_v51 }
  0x92   :  { %v7449_v53 = vld [vmem:[#allocation5 + $0xb60] sm:$0xf0]  ;;  %2646 = vmatpush.bf16.msra.mxu2 %v7228_v44 }
  0x93   :  { %2618 = vmatpush.bf16.msra.mxu0 %v6716_v42  ;;  %v8983_v58 = vld [vmem:[#allocation5 + $0x504] sm:$0xf]  ;;  %2660 = vmatpush.bf16.msra.mxu3 %v7484_v48  ;;  %v7452_v61 = vor.u32 %v9183_v52, %v7449_v53 }
  0x94   :  { %v6649_v59 = vld [vmem:[#allocation5 + $0x520] sm:$0xf0] }
  0x95   :  { %2632 = vmatpush.bf16.msra.mxu1 %v6972_v43  ;;  %v9047_v60 = vld [vmem:[#allocation5 + $0x704] sm:$0xf]  ;;  %v6652_v3 = vor.u32 %v8983_v58, %v6649_v59  ;;  %v8884_v58 = vld [vmem:[#allocation5 + $0x1e4] sm:$0xf0] }
  0x96   :  { %v6905_v62 = vld [vmem:[#allocation5 + $0x720] sm:$0xf0]  ;;  %2647 = vmatpush.bf16.msra.mxu2 %v7196_v56  ;;  %v6239_v56 = vld [vmem:[#allocation5 + $0x1c8] sm:$0xf] }
  0x97   :  { %v9111_v63 = vld [vmem:[#allocation5 + $0x904] sm:$0xf]  ;;  %2619 = vmatpush.bf16.msra.mxu0 %v6684_v54  ;;  %v6908_v4 = vor.u32 %v9047_v60, %v6905_v62  ;;  %2661 = vmatpush.bf16.msra.mxu3 %v7452_v61  ;;  %v6495_v59 = vld [vmem:[#allocation5 + $0x3c8] sm:$0xf] }
  0x98   :  { %v7161_v0 = vld [vmem:[#allocation5 + $0x920] sm:$0xf0]  ;;  %v8948_v61 = vld [vmem:[#allocation5 + $0x3e4] sm:$0xf0] }
  0x99   :  { %v9175_v1 = vld [vmem:[#allocation5 + $0xb04] sm:$0xf]  ;;  %2633 = vmatpush.bf16.msra.mxu1 %v6940_v55  ;;  %v7164_v5 = vor.u32 %v9111_v63, %v7161_v0  ;;  %v6751_v62 = vld [vmem:[#allocation5 + $0x5c8] sm:$0xf] }
  0x9a   :  { %v7417_v2 = vld [vmem:[#allocation5 + $0xb20] sm:$0xf0]  ;;  %v9012_v63 = vld [vmem:[#allocation5 + $0x5e4] sm:$0xf0] }
  0x9b   :  { %v8975_v7 = vld [vmem:[#allocation5 + $0x4c4] sm:$0xf]  ;;  %v7420_v10 = vor.u32 %v9175_v1, %v7417_v2  ;;  %2620 = vmatpush.bf16.msra.mxu0 %v6652_v3  ;;  %2648 = vmatpush.bf16.msra.mxu2 %v7164_v5  ;;  %v7007_v2 = vld [vmem:[#allocation5 + $0x7c8] sm:$0xf]  ;;  %v6240_v5 = vor.u32 %v8884_v58, %v6239_v56 }
  0x9c   :  { %v6617_v8 = vld [vmem:[#allocation5 + $0x4e0] sm:$0xf0]  ;;  %v9076_v3 = vld [vmem:[#allocation5 + $0x7e4] sm:$0xf0] }
  0x9d   :  { %v9039_v9 = vld [vmem:[#allocation5 + $0x6c4] sm:$0xf]  ;;  %v6620_v16 = vor.u32 %v8975_v7, %v6617_v8  ;;  %2634 = vmatpush.bf16.msra.mxu1 %v6908_v4  ;;  %2662 = vmatpush.bf16.msra.mxu3 %v7420_v10  ;;  %v6496_v7 = vor.u32 %v8948_v61, %v6495_v59  ;;  %v6752_v8 = vor.u32 %v9012_v63, %v6751_v62  ;;  %v8876_v10 = vld [vmem:[#allocation5 + $0x1a4] sm:$0xf0] }
  0x9e   :  { %v6873_v11 = vld [vmem:[#allocation5 + $0x6e0] sm:$0xf0]  ;;  %v6879_v56 = vld [vmem:[#allocation5 + $0x6c8] sm:$0xf] }
  0x9f   :  { %v9103_v12 = vld [vmem:[#allocation5 + $0x8c4] sm:$0xf]  ;;  %v6876_v17 = vor.u32 %v9039_v9, %v6873_v11  ;;  %2621 = vmatpush.bf16.msra.mxu0 %v6620_v16  ;;  %v6207_v9 = vld [vmem:[#allocation5 + $0x188] sm:$0xf] }
  0xa0   :  { %v7129_v13 = vld [vmem:[#allocation5 + $0x8e0] sm:$0xf0]  ;;  %v6463_v11 = vld [vmem:[#allocation5 + $0x388] sm:$0xf] }
  0xa1   :  { %v9167_v14 = vld [vmem:[#allocation5 + $0xac4] sm:$0xf]  ;;  %v7132_v18 = vor.u32 %v9103_v12, %v7129_v13  ;;  %2635 = vmatpush.bf16.msra.mxu1 %v6876_v17  ;;  %v7008_v12 = vor.u32 %v9076_v3, %v7007_v2  ;;  %v8940_v13 = vld [vmem:[#allocation5 + $0x3a4] sm:$0xf0] }
  0xa2   :  { %v7385_v15 = vld [vmem:[#allocation5 + $0xae0] sm:$0xf0]  ;;  %v6975_v16 = vld [vmem:[#allocation5 + $0x788] sm:$0xf] }
  0xa3   :  { %v8967_v19 = vld [vmem:[#allocation5 + $0x484] sm:$0xf]  ;;  %v7388_v24 = vor.u32 %v9167_v14, %v7385_v15  ;;  %2649 = vmatpush.bf16.msra.mxu2 %v7132_v18  ;;  %v6719_v14 = vld [vmem:[#allocation5 + $0x588] sm:$0xf]  ;;  %v6208_v18 = vor.u32 %v8876_v10, %v6207_v9 }
  0xa4   :  { %v6585_v20 = vld [vmem:[#allocation5 + $0x4a0] sm:$0xf0]  ;;  %v9004_v15 = vld [vmem:[#allocation5 + $0x5a4] sm:$0xf0] }
  0xa5   :  { %v9031_v21 = vld [vmem:[#allocation5 + $0x684] sm:$0xf]  ;;  %v6588_v30 = vor.u32 %v8967_v19, %v6585_v20  ;;  %2663 = vmatpush.bf16.msra.mxu3 %v7388_v24  ;;  %v9068_v17 = vld [vmem:[#allocation5 + $0x7a4] sm:$0xf0]  ;;  %v6464_v19 = vor.u32 %v8940_v13, %v6463_v11  ;;  %v6720_v20 = vor.u32 %v9004_v15, %v6719_v14 }
  0xa6   :  { %v6841_v25 = vld [vmem:[#allocation5 + $0x6a0] sm:$0xf0]  ;;  %v8868_v24 = vld [vmem:[#allocation5 + $0x164] sm:$0xf0] }
  0xa7   :  { %v9095_v26 = vld [vmem:[#allocation5 + $0x884] sm:$0xf]  ;;  %v6844_v31 = vor.u32 %v9031_v21, %v6841_v25  ;;  %2622 = vmatpush.bf16.msra.mxu0 %v6588_v30  ;;  %v6175_v21 = vld [vmem:[#allocation5 + $0x148] sm:$0xf] }
  0xa8   :  { %v7097_v27 = vld [vmem:[#allocation5 + $0x8a0] sm:$0xf0]  ;;  %v6431_v25 = vld [vmem:[#allocation5 + $0x348] sm:$0xf] }
  0xa9   :  { %v9159_v28 = vld [vmem:[#allocation5 + $0xa84] sm:$0xf]  ;;  %v7100_v32 = vor.u32 %v9095_v26, %v7097_v27  ;;  %2636 = vmatpush.bf16.msra.mxu1 %v6844_v31  ;;  %v6976_v26 = vor.u32 %v9068_v17, %v6975_v16  ;;  %v8932_v27 = vld [vmem:[#allocation5 + $0x364] sm:$0xf0] }
  0xaa   :  { %v7353_v29 = vld [vmem:[#allocation5 + $0xaa0] sm:$0xf0]  ;;  %v6943_v30 = vld [vmem:[#allocation5 + $0x748] sm:$0xf] }
  0xab   :  { %v8959_v33 = vld [vmem:[#allocation5 + $0x444] sm:$0xf]  ;;  %v7356_v37 = vor.u32 %v9159_v28, %v7353_v29  ;;  %2650 = vmatpush.bf16.msra.mxu2 %v7100_v32  ;;  %v6687_v28 = vld [vmem:[#allocation5 + $0x548] sm:$0xf]  ;;  %v6176_v32 = vor.u32 %v8868_v24, %v6175_v21 }
  0xac   :  { %v6553_v34 = vld [vmem:[#allocation5 + $0x460] sm:$0xf0]  ;;  %v8996_v29 = vld [vmem:[#allocation5 + $0x564] sm:$0xf0] }
  0xad   :  { %v9023_v36 = vld [vmem:[#allocation5 + $0x644] sm:$0xf]  ;;  %v6556_v44 = vor.u32 %v8959_v33, %v6553_v34  ;;  %2664 = vmatpush.bf16.msra.mxu3 %v7356_v37  ;;  %v9060_v31 = vld [vmem:[#allocation5 + $0x764] sm:$0xf0]  ;;  %v6432_v33 = vor.u32 %v8932_v27, %v6431_v25  ;;  %v6688_v34 = vor.u32 %v8996_v29, %v6687_v28 }
  0xae   :  { %v6809_v38 = vld [vmem:[#allocation5 + $0x660] sm:$0xf0]  ;;  %v8860_v37 = vld [vmem:[#allocation5 + $0x124] sm:$0xf0] }
  0xaf   :  { %v9087_v40 = vld [vmem:[#allocation5 + $0x844] sm:$0xf]  ;;  %v6812_v48 = vor.u32 %v9023_v36, %v6809_v38  ;;  %2623 = vmatpush.bf16.msra.mxu0 %v6556_v44  ;;  %v6143_v36 = vld [vmem:[#allocation5 + $0x108] sm:$0xf] }
  0xb0   :  { %v7065_v41 = vld [vmem:[#allocation5 + $0x860] sm:$0xf0]  ;;  %v6399_v38 = vld [vmem:[#allocation5 + $0x308] sm:$0xf] }
  0xb1   :  { %v9151_v42 = vld [vmem:[#allocation5 + $0xa44] sm:$0xf]  ;;  %v7068_v49 = vor.u32 %v9087_v40, %v7065_v41  ;;  %2637 = vmatpush.bf16.msra.mxu1 %v6812_v48  ;;  %v6944_v40 = vor.u32 %v9060_v31, %v6943_v30  ;;  %v8924_v41 = vld [vmem:[#allocation5 + $0x324] sm:$0xf0] }
  0xb2   :  { %v7321_v43 = vld [vmem:[#allocation5 + $0xa60] sm:$0xf0]  ;;  %v6911_v44 = vld [vmem:[#allocation5 + $0x708] sm:$0xf] }
  0xb3   :  { %v8951_v45 = vld [vmem:[#allocation5 + $0x404] sm:$0xf]  ;;  %v7324_v53 = vor.u32 %v9151_v42, %v7321_v43  ;;  %2651 = vmatpush.bf16.msra.mxu2 %v7068_v49  ;;  %v6655_v42 = vld [vmem:[#allocation5 + $0x508] sm:$0xf] }
  0xb4   :  { %v6521_v46 = vld [vmem:[#allocation5 + $0x420] sm:$0xf0]  ;;  %v8988_v43 = vld [vmem:[#allocation5 + $0x524] sm:$0xf0] }
  0xb5   :  { %v9015_v47 = vld [vmem:[#allocation5 + $0x604] sm:$0xf]  ;;  %v6524_v60 = vor.u32 %v8951_v45, %v6521_v46  ;;  %2665 = vmatpush.bf16.msra.mxu3 %v7324_v53  ;;  %v9052_v45 = vld [vmem:[#allocation5 + $0x724] sm:$0xf0]  ;;  %v6144_v46 = vor.u32 %v8860_v37, %v6143_v36  ;;  %v6656_v48 = vor.u32 %v8988_v43, %v6655_v42  ;;  %v6241_v42 = vld [vmem:[#allocation5 + $0x1e8] sm:$0xf0] }
  0xb6   :  { %v6777_v50 = vld [vmem:[#allocation5 + $0x620] sm:$0xf0]  ;;  %v6111_v49 = vld [vmem:[#allocation5 + $0xc8] sm:$0xf] }
  0xb7   :  { %v9079_v51 = vld [vmem:[#allocation5 + $0x804] sm:$0xf]  ;;  %v6780_v0 = vor.u32 %v9015_v47, %v6777_v50  ;;  %2624 = vmatpush.bf16.msra.mxu0 %v6524_v60  ;;  %v6400_v47 = vor.u32 %v8924_v41, %v6399_v38  ;;  %v8852_v50 = vld [vmem:[#allocation5 + $0xe4] sm:$0xf0]  ;;  %v8880_v41 = vld [vmem:[#allocation5 + $0x1cc] sm:$0xf] }
  0xb8   :  { %v7033_v52 = vld [vmem:[#allocation5 + $0x820] sm:$0xf0]  ;;  %v8916_v53 = vld [vmem:[#allocation5 + $0x2e4] sm:$0xf0]  ;;  %v6112_v59 = vor.u32 %v8852_v50, %v6111_v49  ;;  %v6244_v50 = vor.u32 %v8880_v41, %v6241_v42 }
  0xb9   :  { %v9143_v54 = vld [vmem:[#allocation5 + $0xa04] sm:$0xf]  ;;  %v7036_v1 = vor.u32 %v9079_v51, %v7033_v52  ;;  %2638 = vmatpush.bf16.msra.mxu1 %v6780_v0  ;;  %v6367_v51 = vld [vmem:[#allocation5 + $0x2c8] sm:$0xf]  ;;  %v6912_v52 = vor.u32 %v9052_v45, %v6911_v44  ;;  %v8944_v45 = vld [vmem:[#allocation5 + $0x3cc] sm:$0xf] }
  0xba   :  { %v7289_v55 = vld [vmem:[#allocation5 + $0xa20] sm:$0xf0]  ;;  %2625 = vmatmul.bf16.vlgmr.msra.gmra.mxu0 %v9913_v22  ;;  %v9044_v58 = vld [vmem:[#allocation5 + $0x6e4] sm:$0xf0]  ;;  %v6368_v60 = vor.u32 %v8916_v53, %v6367_v51 }
  0xbb   :  { %v7292_v4 = vor.u32 %v9143_v54, %v7289_v55  ;;  %2652 = vmatpush.bf16.msra.mxu2 %v7036_v1  ;;  %2673 = vmatpush.bf16.msrb.mxu0 %v6240_v5  ;;  %v6623_v54 = vld [vmem:[#allocation5 + $0x4c8] sm:$0xf]  ;;  %v6880_v1 = vor.u32 %v9044_v58, %v6879_v56  ;;  %v8872_v56 = vld [vmem:[#allocation5 + $0x18c] sm:$0xf] }
  0xbc   :  { %2639 = vmatmul.bf16.vlgmr.msra.gmra.mxu1 %v9915_v23  ;;  %v8980_v55 = vld [vmem:[#allocation5 + $0x4e4] sm:$0xf0]  ;;  %v6209_v58 = vld [vmem:[#allocation5 + $0x1a8] sm:$0xf0] }
  0xbd   :  { %2666 = vmatpush.bf16.msra.mxu3 %v7292_v4  ;;  %2687 = vmatpush.bf16.msrb.mxu1 %v6496_v7  ;;  %v6624_v61 = vor.u32 %v8980_v55, %v6623_v54  ;;  %v6079_v62 = vld [vmem:[#allocation5 + $0x88] sm:$0xf] }
  0xbe   :  { %2653 = vmatmul.bf16.vlgmr.msra.gmra.mxu2 %v9919_v35  ;;  %v8844_v63 = vld [vmem:[#allocation5 + $0xa4] sm:$0xf0] }
  0xbf   :  { %2701 = vmatpush.bf16.msrb.mxu2 %v6752_v8  ;;  %2674 = vmatpush.bf16.msrb.mxu0 %v6208_v18  ;;  %v6335_v0 = vld [vmem:[#allocation5 + $0x288] sm:$0xf]  ;;  %v6080_v8 = vor.u32 %v8844_v63, %v6079_v62  ;;  %v6212_v63 = vor.u32 %v8872_v56, %v6209_v58 }
  0xc0   :  { %2667 = vmatmul.bf16.vlgmr.msra.gmra.mxu3 %v9921_v39  ;;  %v8908_v2 = vld [vmem:[#allocation5 + $0x2a4] sm:$0xf0] }
  0xc1   :  { %2715 = vmatpush.bf16.msrb.mxu3 %v7008_v12  ;;  %2688 = vmatpush.bf16.msrb.mxu1 %v6464_v19  ;;  %v6591_v3 = vld [vmem:[#allocation5 + $0x488] sm:$0xf]  ;;  %v6336_v9 = vor.u32 %v8908_v2, %v6335_v0 }
  0xc2   :  { %v8972_v4 = vld [vmem:[#allocation5 + $0x4a4] sm:$0xf0] }
  0xc3   :  { %2702 = vmatpush.bf16.msrb.mxu2 %v6720_v20  ;;  %2675 = vmatpush.bf16.msrb.mxu0 %v6176_v32  ;;  %v6847_v5 = vld [vmem:[#allocation5 + $0x688] sm:$0xf]  ;;  %v6592_v10 = vor.u32 %v8972_v4, %v6591_v3 }
  0xc4   :  { %v9036_v7 = vld [vmem:[#allocation5 + $0x6a4] sm:$0xf0] }
  0xc5   :  { %2716 = vmatpush.bf16.msrb.mxu3 %v6976_v26  ;;  %2689 = vmatpush.bf16.msrb.mxu1 %v6432_v33  ;;  %v6047_v11 = vld [vmem:[#allocation5 + $0x48] sm:$0xf]  ;;  %v6848_v14 = vor.u32 %v9036_v7, %v6847_v5  ;;  %v8864_v5 = vld [vmem:[#allocation5 + $0x14c] sm:$0xf] }
  0xc6   :  { %v8836_v12 = vld [vmem:[#allocation5 + $0x64] sm:$0xf0]  ;;  %v6177_v7 = vld [vmem:[#allocation5 + $0x168] sm:$0xf0] }
  0xc7   :  { %2703 = vmatpush.bf16.msrb.mxu2 %v6688_v34  ;;  %2676 = vmatpush.bf16.msrb.mxu0 %v6144_v46  ;;  %v6303_v13 = vld [vmem:[#allocation5 + $0x248] sm:$0xf]  ;;  %v6048_v20 = vor.u32 %v8836_v12, %v6047_v11  ;;  %v6497_v46 = vld [vmem:[#allocation5 + $0x3e8] sm:$0xf0]  ;;  %v6180_v12 = vor.u32 %v8864_v5, %v6177_v7 }
  0xc8   :  { %v8900_v15 = vld [vmem:[#allocation5 + $0x264] sm:$0xf0]  ;;  %v6500_v54 = vor.u32 %v8944_v45, %v6497_v46  ;;  %v8840_v46 = vld [vmem:[#allocation5 + $0x8c] sm:$0xf] }
  0xc9   :  { %2717 = vmatpush.bf16.msrb.mxu3 %v6944_v40  ;;  %2690 = vmatpush.bf16.msrb.mxu1 %v6400_v47  ;;  %v6559_v16 = vld [vmem:[#allocation5 + $0x448] sm:$0xf]  ;;  %v6304_v25 = vor.u32 %v8900_v15, %v6303_v13  ;;  %v8824_v7 = vld [vmem:[#allocation5 + $0xc] sm:$0xf] }
  0xca   :  { %v8964_v17 = vld [vmem:[#allocation5 + $0x464] sm:$0xf0] }
  0xcb   :  { %2704 = vmatpush.bf16.msrb.mxu2 %v6656_v48  ;;  %2677 = vmatpush.bf16.msrb.mxu0 %v6112_v59  ;;  %v6815_v18 = vld [vmem:[#allocation5 + $0x648] sm:$0xf]  ;;  %v6560_v26 = vor.u32 %v8964_v17, %v6559_v16  ;;  %v8936_v59 = vld [vmem:[#allocation5 + $0x38c] sm:$0xf] }
  0xcc   :  { %v9028_v19 = vld [vmem:[#allocation5 + $0x664] sm:$0xf0] }
  0xcd   :  { %2718 = vmatpush.bf16.msrb.mxu3 %v6912_v52  ;;  %2691 = vmatpush.bf16.msrb.mxu1 %v6368_v60  ;;  %v6015_v21 = vld [vmem:[#allocation5 + $0x8] sm:$0xf]  ;;  %v6816_v30 = vor.u32 %v9028_v19, %v6815_v18  ;;  %v6465_v60 = vld [vmem:[#allocation5 + $0x3a8] sm:$0xf0] }
  0xce   :  { %v8828_v24 = vld [vmem:[#allocation5 + $0x24] sm:$0xf0]  ;;  %v6468_v3 = vor.u32 %v8936_v59, %v6465_v60  ;;  %v8856_v18 = vld [vmem:[#allocation5 + $0x10c] sm:$0xf] }
  0xcf   :  { %2705 = vmatpush.bf16.msrb.mxu2 %v6624_v61  ;;  %2678 = vmatpush.bf16.msrb.mxu0 %v6080_v8  ;;  %v6271_v27 = vld [vmem:[#allocation5 + $0x208] sm:$0xf]  ;;  %v6016_v38 = vor.u32 %v8828_v24, %v6015_v21  ;;  %v8928_v8 = vld [vmem:[#allocation5 + $0x34c] sm:$0xf] }
  0xd0   :  { %v8892_v28 = vld [vmem:[#allocation5 + $0x224] sm:$0xf0]  ;;  %v6145_v19 = vld [vmem:[#allocation5 + $0x128] sm:$0xf0] }
  0xd1   :  { %2719 = vmatpush.bf16.msrb.mxu3 %v6880_v1  ;;  %2692 = vmatpush.bf16.msrb.mxu1 %v6336_v9  ;;  %v6527_v29 = vld [vmem:[#allocation5 + $0x408] sm:$0xf]  ;;  %v6272_v43 = vor.u32 %v8892_v28, %v6271_v27  ;;  %v6433_v9 = vld [vmem:[#allocation5 + $0x368] sm:$0xf0] }
  0xd2   :  { %v8956_v31 = vld [vmem:[#allocation5 + $0x424] sm:$0xf0]  ;;  %v6436_v16 = vor.u32 %v8928_v8, %v6433_v9  ;;  %v6401_v21 = vld [vmem:[#allocation5 + $0x328] sm:$0xf0] }
  0xd3   :  { %2706 = vmatpush.bf16.msrb.mxu2 %v6592_v10  ;;  %v6783_v32 = vld [vmem:[#allocation5 + $0x608] sm:$0xf]  ;;  %2679 = vmatpush.bf16.msrb.mxu0 %v6048_v20  ;;  %v6528_v44 = vor.u32 %v8956_v31, %v6527_v29  ;;  %v8920_v20 = vld [vmem:[#allocation5 + $0x30c] sm:$0xf] }
  0xd4   :  { %v9020_v33 = vld [vmem:[#allocation5 + $0x624] sm:$0xf0]  ;;  %v8832_v59 = vld [vmem:[#allocation5 + $0x4c] sm:$0xf] }
  0xd5   :  { %2720 = vmatpush.bf16.msrb.mxu3 %v6848_v14  ;;  %v7263_v34 = vld [vmem:[#allocation5 + $0x9c8] sm:$0xf]  ;;  %2693 = vmatpush.bf16.msrb.mxu1 %v6304_v25  ;;  %v6784_v47 = vor.u32 %v9020_v33, %v6783_v32  ;;  %v8848_v32 = vld [vmem:[#allocation5 + $0xcc] sm:$0xf] }
  0xd6   :  { %v9140_v36 = vld [vmem:[#allocation5 + $0x9e4] sm:$0xf0]  ;;  %v6113_v33 = vld [vmem:[#allocation5 + $0xe8] sm:$0xf0] }
  0xd7   :  { %v7519_v37 = vld [vmem:[#allocation5 + $0xbc8] sm:$0xf]  ;;  %2707 = vmatpush.bf16.msrb.mxu2 %v6560_v26  ;;  %v7264_v48 = vor.u32 %v9140_v36, %v7263_v34  ;;  %2680 = vmatpush.bf16.msrb.mxu0 %v6016_v38  ;;  %v6148_v26 = vor.u32 %v8856_v18, %v6145_v19  ;;  %v8912_v34 = vld [vmem:[#allocation5 + $0x2cc] sm:$0xf] }
  0xd8   :  { %v9204_v40 = vld [vmem:[#allocation5 + $0xbe4] sm:$0xf0]  ;;  %v6369_v36 = vld [vmem:[#allocation5 + $0x2e8] sm:$0xf0] }
  0xd9   :  { %2721 = vmatpush.bf16.msrb.mxu3 %v6816_v30  ;;  %v7520_v49 = vor.u32 %v9204_v40, %v7519_v37  ;;  %v7231_v51 = vld [vmem:[#allocation5 + $0x988] sm:$0xf]  ;;  %2694 = vmatpush.bf16.msrb.mxu1 %v6272_v43  ;;  %v6404_v30 = vor.u32 %v8920_v20, %v6401_v21  ;;  %v6116_v40 = vor.u32 %v8848_v32, %v6113_v33  ;;  %v6049_v60 = vld [vmem:[#allocation5 + $0x68] sm:$0xf0] }
  0xda   :  { %v9132_v52 = vld [vmem:[#allocation5 + $0x9a4] sm:$0xf0]  ;;  %2681 = vmatmul.bf16.vlgmr.msrb.gmra.mxu0 %v9907_v57  ;;  %v6017_v9 = vld [vmem:[#allocation5 + $0x28] sm:$0xf0] }
  0xdb   :  { %v7487_v53 = vld [vmem:[#allocation5 + $0xb88] sm:$0xf]  ;;  %2708 = vmatpush.bf16.msrb.mxu2 %v6528_v44  ;;  %2729 = vmatpush.bf16.msra.mxu0 %v7264_v48  ;;  %v7232_v61 = vor.u32 %v9132_v52, %v7231_v51  ;;  %v6372_v44 = vor.u32 %v8912_v34, %v6369_v36  ;;  %v8904_v48 = vld [vmem:[#allocation5 + $0x28c] sm:$0xf]  ;;  %v6020_v20 = vor.u32 %v8824_v7, %v6017_v9 }
  0xdc   :  { %v9196_v55 = vld [vmem:[#allocation5 + $0xba4] sm:$0xf0]  ;;  %2695 = vmatmul.bf16.vlgmr.msrb.gmra.mxu1 %v9910_v6  ;;  %v7265_v18 = vld [vmem:[#allocation5 + $0x9e8] sm:$0xf0] }
  0xdd   :  { %2722 = vmatpush.bf16.msrb.mxu3 %v6784_v47  ;;  %2743 = vmatpush.bf16.msra.mxu1 %v7520_v49  ;;  %v7488_v62 = vor.u32 %v9196_v55, %v7487_v53  ;;  %v7199_v0 = vld [vmem:[#allocation5 + $0x948] sm:$0xf]  ;;  %v6081_v47 = vld [vmem:[#allocation5 + $0xa8] sm:$0xf0] }
  0xde   :  { %v9124_v1 = vld [vmem:[#allocation5 + $0x964] sm:$0xf0]  ;;  %2709 = vmatmul.bf16.vlgmr.msrb.gmra.mxu2 %v9913_v22  ;;  %v6337_v49 = vld [vmem:[#allocation5 + $0x2a8] sm:$0xf0]  ;;  %v6084_v52 = vor.u32 %v8840_v46, %v6081_v47  ;;  %v9935_v46 = vld [vmem:[#allocation7] sm:$0xff] }
  0xdf   :  { %2757 = vmatpush.bf16.msra.mxu2 %v6244_v50  ;;  %v7455_v2 = vld [vmem:[#allocation5 + $0xb48] sm:$0xf]  ;;  %2730 = vmatpush.bf16.msra.mxu0 %v7232_v61  ;;  %v7200_v10 = vor.u32 %v9124_v1, %v7199_v0  ;;  %v6340_v56 = vor.u32 %v8904_v48, %v6337_v49  ;;  %v8896_v61 = vld [vmem:[#allocation5 + $0x24c] sm:$0xf] }
  0xe0   :  { %v9188_v4 = vld [vmem:[#allocation5 + $0xb64] sm:$0xf0]  ;;  %2723 = vmatmul.bf16.vlgmr.msrb.gmra.mxu3 %v9915_v23  ;;  %v9200_v21 = vld [vmem:[#allocation5 + $0xbcc] sm:$0xf] }
  0xe1   :  { %2771 = vmatpush.bf16.msra.mxu3 %v6500_v54  ;;  %2744 = vmatpush.bf16.msra.mxu1 %v7488_v62  ;;  %v7456_v11 = vor.u32 %v9188_v4, %v7455_v2  ;;  %v7167_v13 = vld [vmem:[#allocation5 + $0x908] sm:$0xf]  ;;  %v6305_v62 = vld [vmem:[#allocation5 + $0x268] sm:$0xf0] }
  0xe2   :  { %v9116_v14 = vld [vmem:[#allocation5 + $0x924] sm:$0xf0]  ;;  %v6308_v8 = vor.u32 %v8896_v61, %v6305_v62  ;;  %v6977_v33 = vld [vmem:[#allocation5 + $0x7a8] sm:$0xf0] }
  0xe3   :  { %2758 = vmatpush.bf16.msra.mxu2 %v6212_v63  ;;  %v7423_v15 = vld [vmem:[#allocation5 + $0xb08] sm:$0xf]  ;;  %2731 = vmatpush.bf16.msra.mxu0 %v7200_v10  ;;  %v7168_v24 = vor.u32 %v9116_v14, %v7167_v13  ;;  %v8888_v10 = vld [vmem:[#allocation5 + $0x20c] sm:$0xf] }
  0xe4   :  { %v9180_v17 = vld [vmem:[#allocation5 + $0xb24] sm:$0xf0]  ;;  %v6753_v13 = vld [vmem:[#allocation5 + $0x5e8] sm:$0xf0] }
  0xe5   :  { %2772 = vmatpush.bf16.msra.mxu3 %v6468_v3  ;;  %2745 = vmatpush.bf16.msra.mxu1 %v7456_v11  ;;  %v7424_v25 = vor.u32 %v9180_v17, %v7423_v15  ;;  %v7135_v27 = vld [vmem:[#allocation5 + $0x8c8] sm:$0xf]  ;;  %v6052_v3 = vor.u32 %v8832_v59, %v6049_v60  ;;  %v6273_v11 = vld [vmem:[#allocation5 + $0x228] sm:$0xf0] }
  0xe6   :  { %v9108_v28 = vld [vmem:[#allocation5 + $0x8e4] sm:$0xf0]  ;;  %v9072_v14 = vld [vmem:[#allocation5 + $0x7cc] sm:$0xf] }
  0xe7   :  { %2759 = vmatpush.bf16.msra.mxu2 %v6180_v12  ;;  %v7391_v29 = vld [vmem:[#allocation5 + $0xac8] sm:$0xf]  ;;  %2732 = vmatpush.bf16.msra.mxu0 %v7168_v24  ;;  %v7136_v37 = vor.u32 %v9108_v28, %v7135_v27  ;;  %v9008_v12 = vld [vmem:[#allocation5 + $0x5cc] sm:$0xf] }
  0xe8   :  { %v9172_v31 = vld [vmem:[#allocation5 + $0xae4] sm:$0xf0]  ;;  %v9136_v17 = vld [vmem:[#allocation5 + $0x9cc] sm:$0xf] }
  0xe9   :  { %2773 = vmatpush.bf16.msra.mxu3 %v6436_v16  ;;  %2746 = vmatpush.bf16.msra.mxu1 %v7424_v25  ;;  %v7392_v38 = vor.u32 %v9172_v31, %v7391_v29  ;;  %v7103_v41 = vld [vmem:[#allocation5 + $0x888] sm:$0xf]  ;;  %v7009_v16 = vld [vmem:[#allocation5 + $0x7e8] sm:$0xf0]  ;;  %v6276_v25 = vor.u32 %v8888_v10, %v6273_v11  ;;  %v7268_v28 = vor.u32 %v9136_v17, %v7265_v18  ;;  %v2528_v18 = vpop.f32.mrf.mxu1 }
  0xea   :  { %v9100_v42 = vld [vmem:[#allocation5 + $0x8a4] sm:$0xf0]  ;;  %v7521_v24 = vld [vmem:[#allocation5 + $0xbe8] sm:$0xf0]  ;;  %v7012_v27 = vor.u32 %v9072_v14, %v7009_v16 }
  0xeb   :  { %2760 = vmatpush.bf16.msra.mxu2 %v6148_v26  ;;  %v7359_v43 = vld [vmem:[#allocation5 + $0xa88] sm:$0xf]  ;;  %2733 = vmatpush.bf16.msra.mxu0 %v7136_v37  ;;  %v7104_v50 = vor.u32 %v9100_v42, %v7103_v41  ;;  %v6756_v26 = vor.u32 %v9008_v12, %v6753_v13  ;;  %v9000_v29 = vld [vmem:[#allocation5 + $0x58c] sm:$0xf]  ;;  %v7524_v32 = vor.u32 %v9200_v21, %v7521_v24 }
  0xec   :  { %v9164_v45 = vld [vmem:[#allocation5 + $0xaa4] sm:$0xf0]  ;;  %v9064_v31 = vld [vmem:[#allocation5 + $0x78c] sm:$0xf] }
  0xed   :  { %2774 = vmatpush.bf16.msra.mxu3 %v6404_v30  ;;  %2747 = vmatpush.bf16.msra.mxu1 %v7392_v38  ;;  %v7360_v51 = vor.u32 %v9164_v45, %v7359_v43  ;;  %v7071_v53 = vld [vmem:[#allocation5 + $0x848] sm:$0xf]  ;;  %v6721_v30 = vld [vmem:[#allocation5 + $0x5a8] sm:$0xf0]  ;;  %v6980_v42 = vor.u32 %v9064_v31, %v6977_v33 }
  0xee   :  { %v9092_v54 = vld [vmem:[#allocation5 + $0x864] sm:$0xf0]  ;;  %v9128_v34 = vld [vmem:[#allocation5 + $0x98c] sm:$0xf] }
  0xef   :  { %2761 = vmatpush.bf16.msra.mxu2 %v6116_v40  ;;  %v7327_v55 = vld [vmem:[#allocation5 + $0xa48] sm:$0xf]  ;;  %2734 = vmatpush.bf16.msra.mxu0 %v7104_v50  ;;  %v7072_v63 = vor.u32 %v9092_v54, %v7071_v53  ;;  %v7233_v36 = vld [vmem:[#allocation5 + $0x9a8] sm:$0xf0]  ;;  %v6724_v40 = vor.u32 %v9000_v29, %v6721_v30  ;;  %v10379_v54 = vperm.slane %v9935_v46, 0 }
  0xf0   :  { %v9156_v58 = vld [vmem:[#allocation5 + $0xa64] sm:$0xf0]  ;;  %v9192_v37 = vld [vmem:[#allocation5 + $0xb8c] sm:$0xf]  ;;  %v7236_v43 = vor.u32 %v9128_v34, %v7233_v36 }
  0xf1   :  { %2775 = vmatpush.bf16.msra.mxu3 %v6372_v44  ;;  %v7039_v0 = vld [vmem:[#allocation5 + $0x808] sm:$0xf]  ;;  %2748 = vmatpush.bf16.msra.mxu1 %v7360_v51  ;;  %v7328_v2 = vor.u32 %v9156_v58, %v7327_v55  ;;  %v7489_v38 = vld [vmem:[#allocation5 + $0xba8] sm:$0xf0] }
  0xf2   :  { %v9084_v1 = vld [vmem:[#allocation5 + $0x824] sm:$0xf0]  ;;  %v8992_v41 = vld [vmem:[#allocation5 + $0x54c] sm:$0xf]  ;;  %v7492_v47 = vor.u32 %v9192_v37, %v7489_v38 }
  0xf3   :  { %2762 = vmatpush.bf16.msra.mxu2 %v6084_v52  ;;  %v7295_v4 = vld [vmem:[#allocation5 + $0xa08] sm:$0xf]  ;;  %2735 = vmatpush.bf16.msra.mxu0 %v7072_v63  ;;  %v7040_v15 = vor.u32 %v9084_v1, %v7039_v0  ;;  %v6689_v44 = vld [vmem:[#allocation5 + $0x568] sm:$0xf0] }
  0xf4   :  { %v9148_v5 = vld [vmem:[#allocation5 + $0xa24] sm:$0xf0]  ;;  %v9056_v45 = vld [vmem:[#allocation5 + $0x74c] sm:$0xf]  ;;  %v6692_v53 = vor.u32 %v8992_v41, %v6689_v44 }
  0xf5   :  { %2776 = vmatpush.bf16.msra.mxu3 %v6340_v56  ;;  %2749 = vmatpush.bf16.msra.mxu1 %v7328_v2  ;;  %v7296_v19 = vor.u32 %v9148_v5, %v7295_v4  ;;  %v6945_v48 = vld [vmem:[#allocation5 + $0x768] sm:$0xf0] }
  0xf6   :  { %v9120_v49 = vld [vmem:[#allocation5 + $0x94c] sm:$0xf]  ;;  %v6948_v55 = vor.u32 %v9056_v45, %v6945_v48 }
  0xf7   :  { %2763 = vmatpush.bf16.msra.mxu2 %v6052_v3  ;;  %2736 = vmatpush.bf16.msra.mxu0 %v7040_v15  ;;  %v7201_v50 = vld [vmem:[#allocation5 + $0x968] sm:$0xf0]  ;;  %v2514_v3 = vpop.f32.mrf.mxu0 }
  0xf8   :  { %v9184_v51 = vld [vmem:[#allocation5 + $0xb4c] sm:$0xf]  ;;  %v7204_v56 = vor.u32 %v9120_v49, %v7201_v50  ;;  %v2515_v5 = vadd.f32 %v2514_v3, %v10379_v54  ;;  %v6503_v3 = vld [vmem:[#allocation5 + $0x3d0] sm:$0xf] }
  0xf9   :  { %2777 = vmatpush.bf16.msra.mxu3 %v6308_v8  ;;  %2750 = vmatpush.bf16.msra.mxu1 %v7296_v19  ;;  %v7457_v52 = vld [vmem:[#allocation5 + $0xb68] sm:$0xf0] }
  0xfa   :  { %2737 = vmatmul.bf16.vlgmr.msra.gmra.mxu0 %v9919_v35  ;;  %v8984_v58 = vld [vmem:[#allocation5 + $0x50c] sm:$0xf]  ;;  %v7460_v61 = vor.u32 %v9184_v51, %v7457_v52 }
  0xfb   :  { %2764 = vmatpush.bf16.msra.mxu2 %v6020_v20  ;;  %2785 = vmatpush.bf16.msrb.mxu0 %v6756_v26  ;;  %v6657_v59 = vld [vmem:[#allocation5 + $0x528] sm:$0xf0]  ;;  %v2529_v20 = vadd.f32 %v2528_v18, %v2515_v5 }
  0xfc   :  { %2751 = vmatmul.bf16.vlgmr.msra.gmra.mxu1 %v9921_v39  ;;  %v9048_v60 = vld [vmem:[#allocation5 + $0x70c] sm:$0xf]  ;;  %v6660_v4 = vor.u32 %v8984_v58, %v6657_v59 }
  0xfd   :  { %2778 = vmatpush.bf16.msra.mxu3 %v6276_v25  ;;  %2799 = vmatpush.bf16.msrb.mxu1 %v7012_v27  ;;  %v6913_v62 = vld [vmem:[#allocation5 + $0x728] sm:$0xf0] }
  0xfe   :  { %2765 = vmatmul.bf16.vlgmr.msra.gmra.mxu2 %v9907_v57  ;;  %v9112_v63 = vld [vmem:[#allocation5 + $0x90c] sm:$0xf]  ;;  %v6916_v7 = vor.u32 %v9048_v60, %v6913_v62 }
  0xff   :  { %2813 = vmatpush.bf16.msrb.mxu2 %v7268_v28  ;;  %2786 = vmatpush.bf16.msrb.mxu0 %v6724_v40  ;;  %v7169_v0 = vld [vmem:[#allocation5 + $0x928] sm:$0xf0] }
 0x100   :  { %2779 = vmatmul.bf16.vlgmr.msra.gmra.mxu3 %v9910_v6  ;;  %v9176_v1 = vld [vmem:[#allocation5 + $0xb0c] sm:$0xf]  ;;  %v7172_v8 = vor.u32 %v9112_v63, %v7169_v0  ;;  %v2542_v59 = vpop.f32.mrf.mxu2 }
 0x101   :  { %2827 = vmatpush.bf16.msrb.mxu3 %v7524_v32  ;;  %2800 = vmatpush.bf16.msrb.mxu1 %v6980_v42  ;;  %v7425_v2 = vld [vmem:[#allocation5 + $0xb28] sm:$0xf0]  ;;  %v2543_v0 = vadd.f32 %v2542_v59, %v2529_v20  ;;  %v6215_v20 = vld [vmem:[#allocation5 + $0x190] sm:$0xf] }
 0x102   :  { %v8976_v9 = vld [vmem:[#allocation5 + $0x4cc] sm:$0xf]  ;;  %v7428_v12 = vor.u32 %v9176_v1, %v7425_v2  ;;  %v6247_v1 = vld [vmem:[#allocation5 + $0x1d0] sm:$0xf] }
 0x103   :  { %2814 = vmatpush.bf16.msrb.mxu2 %v7236_v43  ;;  %2787 = vmatpush.bf16.msrb.mxu0 %v6692_v53  ;;  %v6625_v10 = vld [vmem:[#allocation5 + $0x4e8] sm:$0xf0]  ;;  %v8885_v2 = vld [vmem:[#allocation5 + $0x1ec] sm:$0xf0] }
 0x104   :  { %v9040_v11 = vld [vmem:[#allocation5 + $0x6cc] sm:$0xf]  ;;  %v6628_v19 = vor.u32 %v8976_v9, %v6625_v10  ;;  %v9013_v9 = vld [vmem:[#allocation5 + $0x5ec] sm:$0xf0] }
 0x105   :  { %2828 = vmatpush.bf16.msrb.mxu3 %v7492_v47  ;;  %2801 = vmatpush.bf16.msrb.mxu1 %v6948_v55  ;;  %v6881_v13 = vld [vmem:[#allocation5 + $0x6e8] sm:$0xf0] }
 0x106   :  { %v9104_v14 = vld [vmem:[#allocation5 + $0x8cc] sm:$0xf]  ;;  %v6884_v21 = vor.u32 %v9040_v11, %v6881_v13  ;;  %v7015_v13 = vld [vmem:[#allocation5 + $0x7d0] sm:$0xf] }
 0x107   :  { %2815 = vmatpush.bf16.msrb.mxu2 %v7204_v56  ;;  %v7137_v15 = vld [vmem:[#allocation5 + $0x8e8] sm:$0xf0]  ;;  %2788 = vmatpush.bf16.msrb.mxu0 %v6660_v4  ;;  %v2556_v4 = vpop.f32.mrf.mxu3 }
 0x108   :  { %v9168_v16 = vld [vmem:[#allocation5 + $0xacc] sm:$0xf]  ;;  %v7140_v24 = vor.u32 %v9104_v14, %v7137_v15  ;;  %v9944_v10 = vadd.f32 %v2556_v4, %v2543_v0  ;;  %v9077_v14 = vld [vmem:[#allocation5 + $0x7ec] sm:$0xf0] }
 0x109   :  { %2829 = vmatpush.bf16.msrb.mxu3 %v7460_v61  ;;  %v7393_v17 = vld [vmem:[#allocation5 + $0xae8] sm:$0xf0]  ;;  %2802 = vmatpush.bf16.msrb.mxu1 %v6916_v7  ;;  %v8949_v7 = vld [vmem:[#allocation5 + $0x3ec] sm:$0xf0] }
 0x10a   :  { %v8968_v25 = vld [vmem:[#allocation5 + $0x48c] sm:$0xf]  ;;  %v7396_v28 = vor.u32 %v9168_v16, %v7393_v17  ;;  %v6248_v16 = vor.u32 %v8885_v2, %v6247_v1  ;;  %v6504_v17 = vor.u32 %v8949_v7, %v6503_v3  ;;  %v6119_v3 = vld [vmem:[#allocation5 + $0xd0] sm:$0xf] }
 0x10b   :  { %2816 = vmatpush.bf16.msrb.mxu2 %v7172_v8  ;;  %v6593_v26 = vld [vmem:[#allocation5 + $0x4a8] sm:$0xf0]  ;;  %2789 = vmatpush.bf16.msrb.mxu0 %v6628_v19  ;;  %v6759_v8 = vld [vmem:[#allocation5 + $0x5d0] sm:$0xf]  ;;  %v9946_v19 = vpop.f32.mrf.mxu0 }
 0x10c   :  { %v9032_v27 = vld [vmem:[#allocation5 + $0x68c] sm:$0xf]  ;;  %v6596_v34 = vor.u32 %v8968_v25, %v6593_v26  ;;  %v6760_v18 = vor.u32 %v9013_v9, %v6759_v8  ;;  %v7016_v25 = vor.u32 %v9077_v14, %v7015_v13  ;;  %v8941_v26 = vld [vmem:[#allocation5 + $0x3ac] sm:$0xf0] }
 0x10d   :  { %2830 = vmatpush.bf16.msrb.mxu3 %v7428_v12  ;;  %v6849_v29 = vld [vmem:[#allocation5 + $0x6a8] sm:$0xf0]  ;;  %2803 = vmatpush.bf16.msrb.mxu1 %v6884_v21  ;;  %v8877_v21 = vld [vmem:[#allocation5 + $0x1ac] sm:$0xf0] }
 0x10e   :  { %v9096_v30 = vld [vmem:[#allocation5 + $0x88c] sm:$0xf]  ;;  %v6852_v36 = vor.u32 %v9032_v27, %v6849_v29  ;;  %v6727_v27 = vld [vmem:[#allocation5 + $0x590] sm:$0xf] }
 0x10f   :  { %v7105_v31 = vld [vmem:[#allocation5 + $0x8a8] sm:$0xf0]  ;;  %2817 = vmatpush.bf16.msrb.mxu2 %v7140_v24  ;;  %2790 = vmatpush.bf16.msrb.mxu0 %v6596_v34  ;;  %v6471_v24 = vld [vmem:[#allocation5 + $0x390] sm:$0xf] }
 0x110   :  { %v9160_v32 = vld [vmem:[#allocation5 + $0xa8c] sm:$0xf]  ;;  %v7108_v37 = vor.u32 %v9096_v30, %v7105_v31  ;;  %v6983_v29 = vld [vmem:[#allocation5 + $0x790] sm:$0xf]  ;;  %v9948_v31 = vpop.f32.mrf.mxu1 }
 0x111   :  { %v7361_v33 = vld [vmem:[#allocation5 + $0xaa8] sm:$0xf0]  ;;  %2831 = vmatpush.bf16.msrb.mxu3 %v7396_v28  ;;  %2804 = vmatpush.bf16.msrb.mxu1 %v6852_v36  ;;  %v9005_v28 = vld [vmem:[#allocation5 + $0x5ac] sm:$0xf0] }
 0x112   :  { %v8960_v38 = vld [vmem:[#allocation5 + $0x44c] sm:$0xf]  ;;  %v7364_v42 = vor.u32 %v9160_v32, %v7361_v33  ;;  %v9069_v30 = vld [vmem:[#allocation5 + $0x7ac] sm:$0xf0]  ;;  %v6216_v32 = vor.u32 %v8877_v21, %v6215_v20  ;;  %v6472_v33 = vor.u32 %v8941_v26, %v6471_v24  ;;  %v6728_v34 = vor.u32 %v9005_v28, %v6727_v27 }
 0x113   :  { %v6561_v40 = vld [vmem:[#allocation5 + $0x468] sm:$0xf0]  ;;  %2818 = vmatpush.bf16.msrb.mxu2 %v7108_v37  ;;  %v6183_v36 = vld [vmem:[#allocation5 + $0x150] sm:$0xf]  ;;  %v2570_v59 = vpop.f32.mrf.mxu0 }
 0x114   :  { %v9024_v41 = vld [vmem:[#allocation5 + $0x64c] sm:$0xf]  ;;  %v6564_v49 = vor.u32 %v8960_v38, %v6561_v40  ;;  %v8869_v37 = vld [vmem:[#allocation5 + $0x16c] sm:$0xf0]  ;;  %v6984_v40 = vor.u32 %v9069_v30, %v6983_v29 }
 0x115   :  { %v6817_v43 = vld [vmem:[#allocation5 + $0x668] sm:$0xf0]  ;;  %2832 = vmatpush.bf16.msrb.mxu3 %v7364_v42  ;;  %v6439_v38 = vld [vmem:[#allocation5 + $0x350] sm:$0xf] }
 0x116   :  { %v9088_v44 = vld [vmem:[#allocation5 + $0x84c] sm:$0xf]  ;;  %v6820_v52 = vor.u32 %v9024_v41, %v6817_v43  ;;  %2791 = vmatpush.bf16.msrb.mxu0 %v6564_v49  ;;  %v8933_v41 = vld [vmem:[#allocation5 + $0x36c] sm:$0xf0] }
 0x117   :  { %v7073_v45 = vld [vmem:[#allocation5 + $0x868] sm:$0xf0]  ;;  %v6695_v42 = vld [vmem:[#allocation5 + $0x550] sm:$0xf] }
 0x118   :  { %v9152_v47 = vld [vmem:[#allocation5 + $0xa4c] sm:$0xf]  ;;  %v7076_v53 = vor.u32 %v9088_v44, %v7073_v45  ;;  %2805 = vmatpush.bf16.msrb.mxu1 %v6820_v52  ;;  %v8997_v43 = vld [vmem:[#allocation5 + $0x56c] sm:$0xf0]  ;;  %v2584_v2 = vpop.f32.mrf.mxu1 }
 0x119   :  { %v7329_v48 = vld [vmem:[#allocation5 + $0xa68] sm:$0xf0]  ;;  %v6951_v44 = vld [vmem:[#allocation5 + $0x750] sm:$0xf]  ;;  %v6696_v49 = vor.u32 %v8997_v43, %v6695_v42 }
 0x11a   :  { %v8952_v50 = vld [vmem:[#allocation5 + $0x40c] sm:$0xf]  ;;  %v7332_v60 = vor.u32 %v9152_v47, %v7329_v48  ;;  %2819 = vmatpush.bf16.msrb.mxu2 %v7076_v53  ;;  %v9061_v45 = vld [vmem:[#allocation5 + $0x76c] sm:$0xf0]  ;;  %v6184_v47 = vor.u32 %v8869_v37, %v6183_v36  ;;  %v6440_v48 = vor.u32 %v8933_v41, %v6439_v38 }
 0x11b   :  { %v6529_v51 = vld [vmem:[#allocation5 + $0x428] sm:$0xf0]  ;;  %v6407_v52 = vld [vmem:[#allocation5 + $0x310] sm:$0xf]  ;;  %v6952_v53 = vor.u32 %v9061_v45, %v6951_v44 }
 0x11c   :  { %v9016_v55 = vld [vmem:[#allocation5 + $0x60c] sm:$0xf]  ;;  %v6532_v5 = vor.u32 %v8952_v50, %v6529_v51  ;;  %2833 = vmatpush.bf16.msrb.mxu3 %v7332_v60  ;;  %v6151_v50 = vld [vmem:[#allocation5 + $0x110] sm:$0xf] }
 0x11d   :  { %v6785_v56 = vld [vmem:[#allocation5 + $0x628] sm:$0xf0]  ;;  %v8861_v51 = vld [vmem:[#allocation5 + $0x12c] sm:$0xf0] }
 0x11e   :  { %v9080_v58 = vld [vmem:[#allocation5 + $0x80c] sm:$0xf]  ;;  %v6788_v11 = vor.u32 %v9016_v55, %v6785_v56  ;;  %2792 = vmatpush.bf16.msrb.mxu0 %v6532_v5  ;;  %v8925_v55 = vld [vmem:[#allocation5 + $0x32c] sm:$0xf0] }
 0x11f   :  { %v7041_v61 = vld [vmem:[#allocation5 + $0x828] sm:$0xf0]  ;;  %v6663_v56 = vld [vmem:[#allocation5 + $0x510] sm:$0xf]  ;;  %v6408_v0 = vor.u32 %v8925_v55, %v6407_v52 }
 0x120   :  { %v9144_v62 = vld [vmem:[#allocation5 + $0xa0c] sm:$0xf]  ;;  %v7044_v12 = vor.u32 %v9080_v58, %v7041_v61  ;;  %2806 = vmatpush.bf16.msrb.mxu1 %v6788_v11  ;;  %v8989_v58 = vld [vmem:[#allocation5 + $0x52c] sm:$0xf0] }
 0x121   :  { %v7297_v63 = vld [vmem:[#allocation5 + $0xa28] sm:$0xf0]  ;;  %2793 = vmatmul.bf16.vlgmr.msrb.gmra.mxu0 %v9913_v22  ;;  %v6919_v60 = vld [vmem:[#allocation5 + $0x710] sm:$0xf]  ;;  %v6664_v1 = vor.u32 %v8989_v58, %v6663_v56 }
 0x122   :  { %v7300_v15 = vor.u32 %v9144_v62, %v7297_v63  ;;  %2820 = vmatpush.bf16.msrb.mxu2 %v7044_v12  ;;  %2841 = vmatpush.bf16.msra.mxu0 %v6248_v16  ;;  %v9053_v61 = vld [vmem:[#allocation5 + $0x72c] sm:$0xf0]  ;;  %v2571_v62 = vadd.f32 %v2570_v59, %v9944_v10  ;;  %v6152_v63 = vor.u32 %v8861_v51, %v6151_v50 }
 0x123   :  { %2807 = vmatmul.bf16.vlgmr.msrb.gmra.mxu1 %v9915_v23  ;;  %v8853_v4 = vld [vmem:[#allocation5 + $0xec] sm:$0xf0]  ;;  %v6920_v7 = vor.u32 %v9053_v61, %v6919_v60 }
 0x124   :  { %2834 = vmatpush.bf16.msrb.mxu3 %v7300_v15  ;;  %2855 = vmatpush.bf16.msra.mxu1 %v6504_v17  ;;  %v6375_v5 = vld [vmem:[#allocation5 + $0x2d0] sm:$0xf]  ;;  %v9955_v8 = vadd.f32 %v2584_v2, %v2571_v62  ;;  %v6120_v10 = vor.u32 %v8853_v4, %v6119_v3  ;;  %v8945_v4 = vld [vmem:[#allocation5 + $0x3d4] sm:$0xf] }
 0x125   :  { %2821 = vmatmul.bf16.vlgmr.msrb.gmra.mxu2 %v9919_v35  ;;  %v8917_v9 = vld [vmem:[#allocation5 + $0x2ec] sm:$0xf0] }
 0x126   :  { %2869 = vmatpush.bf16.msra.mxu2 %v6760_v18  ;;  %2842 = vmatpush.bf16.msra.mxu0 %v6216_v32  ;;  %v6631_v11 = vld [vmem:[#allocation5 + $0x4d0] sm:$0xf]  ;;  %v6376_v15 = vor.u32 %v8917_v9, %v6375_v5  ;;  %v6505_v5 = vld [vmem:[#allocation5 + $0x3f0] sm:$0xf0] }
 0x127   :  { %2835 = vmatmul.bf16.vlgmr.msrb.gmra.mxu3 %v9921_v39  ;;  %v8981_v12 = vld [vmem:[#allocation5 + $0x4ec] sm:$0xf0] }
 0x128   :  { %2883 = vmatpush.bf16.msra.mxu3 %v7016_v25  ;;  %2856 = vmatpush.bf16.msra.mxu1 %v6472_v33  ;;  %v6887_v13 = vld [vmem:[#allocation5 + $0x6d0] sm:$0xf]  ;;  %v6632_v16 = vor.u32 %v8981_v12, %v6631_v11 }
 0x129   :  { %v9045_v14 = vld [vmem:[#allocation5 + $0x6ec] sm:$0xf0] }
 0x12a   :  { %2870 = vmatpush.bf16.msra.mxu2 %v6728_v34  ;;  %2843 = vmatpush.bf16.msra.mxu0 %v6184_v47  ;;  %v6087_v17 = vld [vmem:[#allocation5 + $0x90] sm:$0xf]  ;;  %v6888_v21 = vor.u32 %v9045_v14, %v6887_v13 }
 0x12b   :  { %v8845_v18 = vld [vmem:[#allocation5 + $0xac] sm:$0xf0] }
 0x12c   :  { %2884 = vmatpush.bf16.msra.mxu3 %v6984_v40  ;;  %2857 = vmatpush.bf16.msra.mxu1 %v6440_v48  ;;  %v6343_v20 = vld [vmem:[#allocation5 + $0x290] sm:$0xf]  ;;  %v6088_v29 = vor.u32 %v8845_v18, %v6087_v17  ;;  %v8873_v17 = vld [vmem:[#allocation5 + $0x194] sm:$0xf] }
 0x12d   :  { %v8909_v24 = vld [vmem:[#allocation5 + $0x2ac] sm:$0xf0]  ;;  %v6217_v18 = vld [vmem:[#allocation5 + $0x1b0] sm:$0xf0] }
 0x12e   :  { %2871 = vmatpush.bf16.msra.mxu2 %v6696_v49  ;;  %2844 = vmatpush.bf16.msra.mxu0 %v6152_v63  ;;  %v6599_v25 = vld [vmem:[#allocation5 + $0x490] sm:$0xf]  ;;  %v6344_v30 = vor.u32 %v8909_v24, %v6343_v20  ;;  %v8937_v20 = vld [vmem:[#allocation5 + $0x394] sm:$0xf] }
 0x12f   :  { %v8973_v26 = vld [vmem:[#allocation5 + $0x4ac] sm:$0xf0] }
 0x130   :  { %2885 = vmatpush.bf16.msra.mxu3 %v6952_v53  ;;  %2858 = vmatpush.bf16.msra.mxu1 %v6408_v0  ;;  %v6855_v27 = vld [vmem:[#allocation5 + $0x690] sm:$0xf]  ;;  %v6600_v32 = vor.u32 %v8973_v26, %v6599_v25  ;;  %v8881_v0 = vld [vmem:[#allocation5 + $0x1d4] sm:$0xf]  ;;  %v6220_v26 = vor.u32 %v8873_v17, %v6217_v18 }
 0x131   :  { %v9037_v28 = vld [vmem:[#allocation5 + $0x6ac] sm:$0xf0] }
 0x132   :  { %2872 = vmatpush.bf16.msra.mxu2 %v6664_v1  ;;  %2845 = vmatpush.bf16.msra.mxu0 %v6120_v10  ;;  %v6055_v33 = vld [vmem:[#allocation5 + $0x50] sm:$0xf]  ;;  %v6856_v37 = vor.u32 %v9037_v28, %v6855_v27  ;;  %v6249_v1 = vld [vmem:[#allocation5 + $0x1f0] sm:$0xf0] }
 0x133   :  { %v8837_v34 = vld [vmem:[#allocation5 + $0x6c] sm:$0xf0]  ;;  %v6252_v12 = vor.u32 %v8881_v0, %v6249_v1  ;;  %v8913_v0 = vld [vmem:[#allocation5 + $0x2d4] sm:$0xf] }
 0x134   :  { %2886 = vmatpush.bf16.msra.mxu3 %v6920_v7  ;;  %2859 = vmatpush.bf16.msra.mxu1 %v6376_v15  ;;  %v6311_v36 = vld [vmem:[#allocation5 + $0x250] sm:$0xf]  ;;  %v6056_v44 = vor.u32 %v8837_v34, %v6055_v33  ;;  %v6508_v15 = vor.u32 %v8945_v4, %v6505_v5  ;;  %v8865_v33 = vld [vmem:[#allocation5 + $0x154] sm:$0xf] }
 0x135   :  { %v8901_v38 = vld [vmem:[#allocation5 + $0x26c] sm:$0xf0]  ;;  %v6185_v34 = vld [vmem:[#allocation5 + $0x170] sm:$0xf0] }
 0x136   :  { %2873 = vmatpush.bf16.msra.mxu2 %v6632_v16  ;;  %v6567_v40 = vld [vmem:[#allocation5 + $0x450] sm:$0xf]  ;;  %2846 = vmatpush.bf16.msra.mxu0 %v6088_v29  ;;  %v6312_v48 = vor.u32 %v8901_v38, %v6311_v36  ;;  %v8929_v36 = vld [vmem:[#allocation5 + $0x354] sm:$0xf] }
 0x137   :  { %v8965_v41 = vld [vmem:[#allocation5 + $0x46c] sm:$0xf0]  ;;  %v6377_v1 = vld [vmem:[#allocation5 + $0x2f0] sm:$0xf0] }
 0x138   :  { %2887 = vmatpush.bf16.msra.mxu3 %v6888_v21  ;;  %v6823_v42 = vld [vmem:[#allocation5 + $0x650] sm:$0xf]  ;;  %2860 = vmatpush.bf16.msra.mxu1 %v6344_v30  ;;  %v6568_v49 = vor.u32 %v8965_v41, %v6567_v40  ;;  %v6473_v21 = vld [vmem:[#allocation5 + $0x3b0] sm:$0xf0]  ;;  %v6188_v41 = vor.u32 %v8865_v33, %v6185_v34 }
 0x139   :  { %v9029_v43 = vld [vmem:[#allocation5 + $0x66c] sm:$0xf0]  ;;  %v6476_v30 = vor.u32 %v8937_v20, %v6473_v21 }
 0x13a   :  { %v6023_v45 = vld [vmem:[#allocation5 + $0x10] sm:$0xf]  ;;  %2874 = vmatpush.bf16.msra.mxu2 %v6600_v32  ;;  %v6824_v53 = vor.u32 %v9029_v43, %v6823_v42  ;;  %2847 = vmatpush.bf16.msra.mxu0 %v6056_v44 }
 0x13b   :  { %v8829_v47 = vld [vmem:[#allocation5 + $0x2c] sm:$0xf0] }
 0x13c   :  { %v6279_v50 = vld [vmem:[#allocation5 + $0x210] sm:$0xf]  ;;  %2888 = vmatpush.bf16.msra.mxu3 %v6856_v37  ;;  %v6024_v62 = vor.u32 %v8829_v47, %v6023_v45  ;;  %2861 = vmatpush.bf16.msra.mxu1 %v6312_v48  ;;  %v6441_v37 = vld [vmem:[#allocation5 + $0x370] sm:$0xf0] }
 0x13d   :  { %v8893_v51 = vld [vmem:[#allocation5 + $0x22c] sm:$0xf0]  ;;  %v6444_v45 = vor.u32 %v8929_v36, %v6441_v37  ;;  %v8857_v48 = vld [vmem:[#allocation5 + $0x114] sm:$0xf] }
 0x13e   :  { %v6535_v52 = vld [vmem:[#allocation5 + $0x410] sm:$0xf]  ;;  %2875 = vmatpush.bf16.msra.mxu2 %v6568_v49  ;;  %v6280_v2 = vor.u32 %v8893_v51, %v6279_v50  ;;  %2848 = vmatpush.bf16.msra.mxu0 %v6024_v62  ;;  %v6153_v49 = vld [vmem:[#allocation5 + $0x130] sm:$0xf0] }
 0x13f   :  { %v8957_v55 = vld [vmem:[#allocation5 + $0x42c] sm:$0xf0]  ;;  %v8921_v50 = vld [vmem:[#allocation5 + $0x314] sm:$0xf] }
 0x140   :  { %v6791_v56 = vld [vmem:[#allocation5 + $0x610] sm:$0xf]  ;;  %v6536_v3 = vor.u32 %v8957_v55, %v6535_v52  ;;  %2889 = vmatpush.bf16.msra.mxu3 %v6824_v53  ;;  %2862 = vmatpush.bf16.msra.mxu1 %v6280_v2  ;;  %v6409_v51 = vld [vmem:[#allocation5 + $0x330] sm:$0xf0]  ;;  %v6156_v55 = vor.u32 %v8857_v48, %v6153_v49 }
 0x141   :  { %v9021_v58 = vld [vmem:[#allocation5 + $0x62c] sm:$0xf0]  ;;  %2849 = vmatmul.bf16.vlgmr.msra.gmra.mxu0 %v9907_v57  ;;  %v8849_v62 = vld [vmem:[#allocation5 + $0xd4] sm:$0xf] }
 0x142   :  { %v7271_v59 = vld [vmem:[#allocation5 + $0x9d0] sm:$0xf]  ;;  %v6792_v7 = vor.u32 %v9021_v58, %v6791_v56  ;;  %2876 = vmatpush.bf16.msra.mxu2 %v6536_v3  ;;  %v6761_v48 = vld [vmem:[#allocation5 + $0x5f0] sm:$0xf0] }
 0x143   :  { %v9141_v60 = vld [vmem:[#allocation5 + $0x9ec] sm:$0xf0]  ;;  %2863 = vmatmul.bf16.vlgmr.msra.gmra.mxu1 %v9910_v6  ;;  %v9073_v49 = vld [vmem:[#allocation5 + $0x7d4] sm:$0xf] }
 0x144   :  { %v7527_v61 = vld [vmem:[#allocation5 + $0xbd0] sm:$0xf]  ;;  %v7272_v9 = vor.u32 %v9141_v60, %v7271_v59  ;;  %2890 = vmatpush.bf16.msra.mxu3 %v6792_v7  ;;  %v6412_v60 = vor.u32 %v8921_v50, %v6409_v51  ;;  %v7017_v51 = vld [vmem:[#allocation5 + $0x7f0] sm:$0xf0] }
 0x145   :  { %v9205_v63 = vld [vmem:[#allocation5 + $0xbec] sm:$0xf0]  ;;  %2877 = vmatmul.bf16.vlgmr.msra.gmra.mxu2 %v9913_v22 }
 0x146   :  { %v7528_v11 = vor.u32 %v9205_v63, %v7527_v61  ;;  %v7239_v13 = vld [vmem:[#allocation5 + $0x990] sm:$0xf]  ;;  %2897 = vmatpush.bf16.msrb.mxu0 %v7272_v9  ;;  %2925 = vmatpush.bf16.msrb.mxu2 %v6252_v12  ;;  %v6121_v63 = vld [vmem:[#allocation5 + $0xf0] sm:$0xf0] }
 0x147   :  { %v9133_v14 = vld [vmem:[#allocation5 + $0x9ac] sm:$0xf0]  ;;  %2891 = vmatmul.bf16.vlgmr.msra.gmra.mxu3 %v9915_v23  ;;  %v6124_v4 = vor.u32 %v8849_v62, %v6121_v63  ;;  %v7020_v62 = vor.u32 %v9073_v49, %v7017_v51  ;;  %v9041_v49 = vld [vmem:[#allocation5 + $0x6d4] sm:$0xf] }
 0x148   :  { %v7495_v10 = vld [vmem:[#allocation5 + $0xb90] sm:$0xf]  ;;  %v7240_v24 = vor.u32 %v9133_v14, %v7239_v13  ;;  %2911 = vmatpush.bf16.msrb.mxu1 %v7528_v11  ;;  %2939 = vmatpush.bf16.msrb.mxu3 %v6508_v15  ;;  %v6380_v11 = vor.u32 %v8913_v0, %v6377_v1  ;;  %v8841_v13 = vld [vmem:[#allocation5 + $0x94] sm:$0xf] }
 0x149   :  { %v9197_v16 = vld [vmem:[#allocation5 + $0xbac] sm:$0xf0]  ;;  %v6089_v14 = vld [vmem:[#allocation5 + $0xb0] sm:$0xf0] }
 0x14a   :  { %v7496_v25 = vor.u32 %v9197_v16, %v7495_v10  ;;  %v7207_v27 = vld [vmem:[#allocation5 + $0x950] sm:$0xf]  ;;  %2898 = vmatpush.bf16.msrb.mxu0 %v7240_v24  ;;  %2926 = vmatpush.bf16.msrb.mxu2 %v6220_v26  ;;  %v8905_v10 = vld [vmem:[#allocation5 + $0x294] sm:$0xf]  ;;  %v6092_v18 = vor.u32 %v8841_v13, %v6089_v14 }
 0x14b   :  { %v9125_v28 = vld [vmem:[#allocation5 + $0x96c] sm:$0xf0]  ;;  %v6345_v15 = vld [vmem:[#allocation5 + $0x2b0] sm:$0xf0] }
 0x14c   :  { %v7463_v29 = vld [vmem:[#allocation5 + $0xb50] sm:$0xf]  ;;  %v7208_v38 = vor.u32 %v9125_v28, %v7207_v27  ;;  %2912 = vmatpush.bf16.msrb.mxu1 %v7496_v25  ;;  %2940 = vmatpush.bf16.msrb.mxu3 %v6476_v30  ;;  %v6348_v25 = vor.u32 %v8905_v10, %v6345_v15  ;;  %v8833_v27 = vld [vmem:[#allocation5 + $0x54] sm:$0xf] }
 0x14d   :  { %v9189_v32 = vld [vmem:[#allocation5 + $0xb6c] sm:$0xf0]  ;;  %v6057_v28 = vld [vmem:[#allocation5 + $0x70] sm:$0xf0] }
 0x14e   :  { %v7464_v40 = vor.u32 %v9189_v32, %v7463_v29  ;;  %v7175_v42 = vld [vmem:[#allocation5 + $0x910] sm:$0xf]  ;;  %2899 = vmatpush.bf16.msrb.mxu0 %v7208_v38  ;;  %2927 = vmatpush.bf16.msrb.mxu2 %v6188_v41  ;;  %v8897_v29 = vld [vmem:[#allocation5 + $0x254] sm:$0xf]  ;;  %v6060_v37 = vor.u32 %v8833_v27, %v6057_v28  ;;  %v9966_v27 = vpop.f32.mrf.mxu3 }
 0x14f   :  { %v9117_v43 = vld [vmem:[#allocation5 + $0x92c] sm:$0xf0]  ;;  %v6313_v30 = vld [vmem:[#allocation5 + $0x270] sm:$0xf0] }
 0x150   :  { %v7431_v44 = vld [vmem:[#allocation5 + $0xb10] sm:$0xf]  ;;  %v7176_v52 = vor.u32 %v9117_v43, %v7175_v42  ;;  %2913 = vmatpush.bf16.msrb.mxu1 %v7464_v40  ;;  %2941 = vmatpush.bf16.msrb.mxu3 %v6444_v45  ;;  %v8825_v41 = vld [vmem:[#allocation5 + $0x14] sm:$0xf]  ;;  %v6316_v42 = vor.u32 %v8897_v29, %v6313_v30 }
 0x151   :  { %v9181_v47 = vld [vmem:[#allocation5 + $0xb2c] sm:$0xf0]  ;;  %v6025_v43 = vld [vmem:[#allocation5 + $0x30] sm:$0xf0] }
 0x152   :  { %v7432_v53 = vor.u32 %v9181_v47, %v7431_v44  ;;  %v7143_v56 = vld [vmem:[#allocation5 + $0x8d0] sm:$0xf]  ;;  %2900 = vmatpush.bf16.msrb.mxu0 %v7176_v52  ;;  %2928 = vmatpush.bf16.msrb.mxu2 %v6156_v55  ;;  %v8889_v44 = vld [vmem:[#allocation5 + $0x214] sm:$0xf] }
 0x153   :  { %v9109_v58 = vld [vmem:[#allocation5 + $0x8ec] sm:$0xf0]  ;;  %v6281_v45 = vld [vmem:[#allocation5 + $0x230] sm:$0xf0] }
 0x154   :  { %v7399_v59 = vld [vmem:[#allocation5 + $0xad0] sm:$0xf]  ;;  %v7144_v2 = vor.u32 %v9109_v58, %v7143_v56  ;;  %2914 = vmatpush.bf16.msrb.mxu1 %v7432_v53  ;;  %2942 = vmatpush.bf16.msrb.mxu3 %v6412_v60  ;;  %v9009_v47 = vld [vmem:[#allocation5 + $0x5d4] sm:$0xf]  ;;  %v6028_v56 = vor.u32 %v8825_v41, %v6025_v43  ;;  %v6284_v60 = vor.u32 %v8889_v44, %v6281_v45 }
 0x155   :  { %v9173_v61 = vld [vmem:[#allocation5 + $0xaec] sm:$0xf0]  ;;  %v9137_v52 = vld [vmem:[#allocation5 + $0x9d4] sm:$0xf] }
 0x156   :  { %v7400_v3 = vor.u32 %v9173_v61, %v7399_v59  ;;  %v7111_v5 = vld [vmem:[#allocation5 + $0x890] sm:$0xf]  ;;  %2901 = vmatpush.bf16.msrb.mxu0 %v7144_v2  ;;  %2929 = vmatpush.bf16.msrb.mxu2 %v6124_v4  ;;  %v7273_v53 = vld [vmem:[#allocation5 + $0x9f0] sm:$0xf0]  ;;  %v6764_v61 = vor.u32 %v9009_v47, %v6761_v48 }
 0x157   :  { %v9101_v7 = vld [vmem:[#allocation5 + $0x8ac] sm:$0xf0]  ;;  %v9201_v58 = vld [vmem:[#allocation5 + $0xbd4] sm:$0xf]  ;;  %v7276_v63 = vor.u32 %v9137_v52, %v7273_v53 }
 0x158   :  { %v7367_v9 = vld [vmem:[#allocation5 + $0xa90] sm:$0xf]  ;;  %v7112_v16 = vor.u32 %v9101_v7, %v7111_v5  ;;  %2915 = vmatpush.bf16.msrb.mxu1 %v7400_v3  ;;  %2943 = vmatpush.bf16.msrb.mxu3 %v6380_v11  ;;  %v7529_v59 = vld [vmem:[#allocation5 + $0xbf0] sm:$0xf0] }
 0x159   :  { %v9165_v12 = vld [vmem:[#allocation5 + $0xaac] sm:$0xf0]  ;;  %v9001_v0 = vld [vmem:[#allocation5 + $0x594] sm:$0xf]  ;;  %v7532_v3 = vor.u32 %v9201_v58, %v7529_v59  ;;  %v9971_v59 = vpop.f32.mrf.mxu3 }
 0x15a   :  { %v7368_v17 = vor.u32 %v9165_v12, %v7367_v9  ;;  %v7079_v20 = vld [vmem:[#allocation5 + $0x850] sm:$0xf]  ;;  %2902 = vmatpush.bf16.msrb.mxu0 %v7112_v16  ;;  %2930 = vmatpush.bf16.msrb.mxu2 %v6092_v18  ;;  %v6729_v1 = vld [vmem:[#allocation5 + $0x5b0] sm:$0xf0] }
 0x15b   :  { %v9093_v21 = vld [vmem:[#allocation5 + $0x86c] sm:$0xf0]  ;;  %v9065_v2 = vld [vmem:[#allocation5 + $0x794] sm:$0xf]  ;;  %v6732_v12 = vor.u32 %v9001_v0, %v6729_v1 }
 0x15c   :  { %v7335_v24 = vld [vmem:[#allocation5 + $0xa50] sm:$0xf]  ;;  %v7080_v32 = vor.u32 %v9093_v21, %v7079_v20  ;;  %2916 = vmatpush.bf16.msrb.mxu1 %v7368_v17  ;;  %2944 = vmatpush.bf16.msrb.mxu3 %v6348_v25  ;;  %v6985_v4 = vld [vmem:[#allocation5 + $0x7b0] sm:$0xf0]  ;;  %v9961_v17 = vpop.f32.mrf.mxu2 }
 0x15d   :  { %v9157_v26 = vld [vmem:[#allocation5 + $0xa6c] sm:$0xf0]  ;;  %v9129_v5 = vld [vmem:[#allocation5 + $0x994] sm:$0xf]  ;;  %v6988_v13 = vor.u32 %v9065_v2, %v6985_v4 }
 0x15e   :  { %v7047_v33 = vld [vmem:[#allocation5 + $0x810] sm:$0xf]  ;;  %v7336_v36 = vor.u32 %v9157_v26, %v7335_v24  ;;  %2903 = vmatpush.bf16.msrb.mxu0 %v7080_v32  ;;  %2931 = vmatpush.bf16.msrb.mxu2 %v6060_v37  ;;  %v7241_v7 = vld [vmem:[#allocation5 + $0x9b0] sm:$0xf0] }
 0x15f   :  { %v9085_v34 = vld [vmem:[#allocation5 + $0x82c] sm:$0xf0]  ;;  %v9193_v9 = vld [vmem:[#allocation5 + $0xb94] sm:$0xf]  ;;  %v7244_v14 = vor.u32 %v9129_v5, %v7241_v7  ;;  %v9973_v7 = vpop.f32.mrf.mxu0 }
 0x160   :  { %v7303_v38 = vld [vmem:[#allocation5 + $0xa10] sm:$0xf]  ;;  %v7048_v50 = vor.u32 %v9085_v34, %v7047_v33  ;;  %2917 = vmatpush.bf16.msrb.mxu1 %v7336_v36  ;;  %2945 = vmatpush.bf16.msrb.mxu3 %v6316_v42  ;;  %v7497_v11 = vld [vmem:[#allocation5 + $0xbb0] sm:$0xf0] }
 0x161   :  { %v9149_v40 = vld [vmem:[#allocation5 + $0xa2c] sm:$0xf0]  ;;  %v8993_v10 = vld [vmem:[#allocation5 + $0x554] sm:$0xf]  ;;  %v7500_v18 = vor.u32 %v9193_v9, %v7497_v11 }
 0x162   :  { %v7304_v55 = vor.u32 %v9149_v40, %v7303_v38  ;;  %2904 = vmatpush.bf16.msrb.mxu0 %v7048_v50  ;;  %2932 = vmatpush.bf16.msrb.mxu2 %v6028_v56  ;;  %v6697_v15 = vld [vmem:[#allocation5 + $0x570] sm:$0xf0] }
 0x163   :  { %v9057_v16 = vld [vmem:[#allocation5 + $0x754] sm:$0xf]  ;;  %v6700_v28 = vor.u32 %v8993_v10, %v6697_v15 }
 0x164   :  { %2918 = vmatpush.bf16.msrb.mxu1 %v7304_v55  ;;  %2946 = vmatpush.bf16.msrb.mxu3 %v6284_v60  ;;  %v6953_v20 = vld [vmem:[#allocation5 + $0x770] sm:$0xf0]  ;;  %v9969_v50 = vpop.f32.mrf.mxu2 }
 0x165   :  { %2905 = vmatmul.bf16.vlgmr.msrb.gmra.mxu0 %v9919_v35  ;;  %v9121_v21 = vld [vmem:[#allocation5 + $0x954] sm:$0xf]  ;;  %2933 = vmatmul.bf16.vlgmr.msrb.gmra.mxu2 %v9907_v57  ;;  %v6956_v29 = vor.u32 %v9057_v16, %v6953_v20 }
 0x166   :  { %2953 = vmatpush.bf16.msra.mxu0 %v6764_v61  ;;  %2981 = vmatpush.bf16.msra.mxu2 %v7276_v63  ;;  %v7209_v24 = vld [vmem:[#allocation5 + $0x970] sm:$0xf0] }
 0x167   :  { %2919 = vmatmul.bf16.vlgmr.msrb.gmra.mxu1 %v9921_v39  ;;  %v9185_v25 = vld [vmem:[#allocation5 + $0xb54] sm:$0xf]  ;;  %2947 = vmatmul.bf16.vlgmr.msrb.gmra.mxu3 %v9910_v6  ;;  %v7212_v30 = vor.u32 %v9121_v21, %v7209_v24 }
 0x168   :  { %2967 = vmatpush.bf16.msra.mxu1 %v7020_v62  ;;  %2995 = vmatpush.bf16.msra.mxu3 %v7532_v3  ;;  %v7465_v26 = vld [vmem:[#allocation5 + $0xb70] sm:$0xf0] }
 0x169   :  { %v8985_v32 = vld [vmem:[#allocation5 + $0x514] sm:$0xf]  ;;  %v7468_v36 = vor.u32 %v9185_v25, %v7465_v26 }
 0x16a   :  { %2954 = vmatpush.bf16.msra.mxu0 %v6732_v12  ;;  %2982 = vmatpush.bf16.msra.mxu2 %v7244_v14  ;;  %v6665_v33 = vld [vmem:[#allocation5 + $0x530] sm:$0xf0] }
 0x16b   :  { %v9049_v34 = vld [vmem:[#allocation5 + $0x714] sm:$0xf]  ;;  %v6668_v43 = vor.u32 %v8985_v32, %v6665_v33 }
 0x16c   :  { %2968 = vmatpush.bf16.msra.mxu1 %v6988_v13  ;;  %2996 = vmatpush.bf16.msra.mxu3 %v7500_v18  ;;  %v6921_v37 = vld [vmem:[#allocation5 + $0x730] sm:$0xf0]  ;;  %v9975_v13 = vpop.f32.mrf.mxu1 }
 0x16d   :  { %v9113_v38 = vld [vmem:[#allocation5 + $0x914] sm:$0xf]  ;;  %v6924_v44 = vor.u32 %v9049_v34, %v6921_v37  ;;  %10382 = vst [vmem:[#allocation24_spill] sm:$0xff] %v9975_v13  ;;  %v9138_v13 = vld [vmem:[#allocation5 + $0x9dc] sm:$0xf] }
 0x16e   :  { %v7177_v40 = vld [vmem:[#allocation5 + $0x930] sm:$0xf0]  ;;  %2955 = vmatpush.bf16.msra.mxu0 %v6700_v28  ;;  %2983 = vmatpush.bf16.msra.mxu2 %v7212_v30 }
 0x16f   :  { %v9177_v41 = vld [vmem:[#allocation5 + $0xb14] sm:$0xf]  ;;  %v7180_v45 = vor.u32 %v9113_v38, %v7177_v40 }
 0x170   :  { %v7433_v42 = vld [vmem:[#allocation5 + $0xb30] sm:$0xf0]  ;;  %2969 = vmatpush.bf16.msra.mxu1 %v6956_v29  ;;  %2997 = vmatpush.bf16.msra.mxu3 %v7468_v36  ;;  %v9977_v29 = vpop.f32.mrf.mxu2 }
 0x171   :  { %v8977_v47 = vld [vmem:[#allocation5 + $0x4d4] sm:$0xf]  ;;  %v7436_v51 = vor.u32 %v9177_v41, %v7433_v42  ;;  %v9979_v41 = vpop.f32.mrf.mxu3 }
 0x172   :  { %v6633_v48 = vld [vmem:[#allocation5 + $0x4f0] sm:$0xf0]  ;;  %2956 = vmatpush.bf16.msra.mxu0 %v6668_v43  ;;  %2984 = vmatpush.bf16.msra.mxu2 %v7180_v45 }
 0x173   :  { %v6889_v52 = vld [vmem:[#allocation5 + $0x6f0] sm:$0xf0]  ;;  %v6636_v60 = vor.u32 %v8977_v47, %v6633_v48  ;;  %v9981_v47 = vpop.f32.mrf.mxu0  ;;  %v6255_v48 = vld [vmem:[#allocation5 + $0x1d8] sm:$0xf] }
 0x174   :  { %v9105_v53 = vld [vmem:[#allocation5 + $0x8d4] sm:$0xf]  ;;  %2970 = vmatpush.bf16.msra.mxu1 %v6924_v44  ;;  %v6892_v61 = vor.u32 %v9041_v49, %v6889_v52  ;;  %2998 = vmatpush.bf16.msra.mxu3 %v7436_v51  ;;  %v8886_v49 = vld [vmem:[#allocation5 + $0x1f4] sm:$0xf0] }
 0x175   :  { %v7145_v55 = vld [vmem:[#allocation5 + $0x8f0] sm:$0xf0]  ;;  %v6511_v51 = vld [vmem:[#allocation5 + $0x3d8] sm:$0xf] }
 0x176   :  { %v9169_v56 = vld [vmem:[#allocation5 + $0xad4] sm:$0xf]  ;;  %v7148_v62 = vor.u32 %v9105_v53, %v7145_v55  ;;  %2957 = vmatpush.bf16.msra.mxu0 %v6636_v60  ;;  %v8950_v53 = vld [vmem:[#allocation5 + $0x3f4] sm:$0xf0] }
 0x177   :  { %v7401_v58 = vld [vmem:[#allocation5 + $0xaf0] sm:$0xf0]  ;;  %v6767_v55 = vld [vmem:[#allocation5 + $0x5d8] sm:$0xf] }
 0x178   :  { %v8969_v63 = vld [vmem:[#allocation5 + $0x494] sm:$0xf]  ;;  %v7404_v2 = vor.u32 %v9169_v56, %v7401_v58  ;;  %2971 = vmatpush.bf16.msra.mxu1 %v6892_v61  ;;  %2985 = vmatpush.bf16.msra.mxu2 %v7148_v62  ;;  %v9014_v56 = vld [vmem:[#allocation5 + $0x5f4] sm:$0xf0]  ;;  %v9983_v58 = vpop.f32.mrf.mxu1 }
 0x179   :  { %v6601_v0 = vld [vmem:[#allocation5 + $0x4b0] sm:$0xf0]  ;;  %v7023_v62 = vld [vmem:[#allocation5 + $0x7d8] sm:$0xf] }
 0x17a   :  { %v9033_v1 = vld [vmem:[#allocation5 + $0x694] sm:$0xf]  ;;  %v6604_v12 = vor.u32 %v8969_v63, %v6601_v0  ;;  %2999 = vmatpush.bf16.msra.mxu3 %v7404_v2  ;;  %v9078_v63 = vld [vmem:[#allocation5 + $0x7f4] sm:$0xf0]  ;;  %v6512_v2 = vor.u32 %v8950_v53, %v6511_v51 }
 0x17b   :  { %v6857_v3 = vld [vmem:[#allocation5 + $0x6b0] sm:$0xf0]  ;;  %v6415_v51 = vld [vmem:[#allocation5 + $0x318] sm:$0xf] }
 0x17c   :  { %v9097_v4 = vld [vmem:[#allocation5 + $0x894] sm:$0xf]  ;;  %v6860_v14 = vor.u32 %v9033_v1, %v6857_v3  ;;  %2958 = vmatpush.bf16.msra.mxu0 %v6604_v12  ;;  %v6256_v1 = vor.u32 %v8886_v49, %v6255_v48  ;;  %v6768_v3 = vor.u32 %v9014_v56, %v6767_v55  ;;  %v8942_v12 = vld [vmem:[#allocation5 + $0x3b4] sm:$0xf0] }
 0x17d   :  { %v7113_v5 = vld [vmem:[#allocation5 + $0x8b0] sm:$0xf0]  ;;  %v6159_v48 = vld [vmem:[#allocation5 + $0x118] sm:$0xf] }
 0x17e   :  { %v9161_v9 = vld [vmem:[#allocation5 + $0xa94] sm:$0xf]  ;;  %v7116_v10 = vor.u32 %v9097_v4, %v7113_v5  ;;  %2972 = vmatpush.bf16.msra.mxu1 %v6860_v14  ;;  %v6223_v4 = vld [vmem:[#allocation5 + $0x198] sm:$0xf] }
 0x17f   :  { %v7369_v11 = vld [vmem:[#allocation5 + $0xab0] sm:$0xf0]  ;;  %v8878_v5 = vld [vmem:[#allocation5 + $0x1b4] sm:$0xf0] }
 0x180   :  { %v8961_v15 = vld [vmem:[#allocation5 + $0x454] sm:$0xf]  ;;  %v7372_v20 = vor.u32 %v9161_v9, %v7369_v11  ;;  %2986 = vmatpush.bf16.msra.mxu2 %v7116_v10  ;;  %v6479_v9 = vld [vmem:[#allocation5 + $0x398] sm:$0xf]  ;;  %v7024_v11 = vor.u32 %v9078_v63, %v7023_v62 }
 0x181   :  { %v6569_v16 = vld [vmem:[#allocation5 + $0x470] sm:$0xf0]  ;;  %v6735_v14 = vld [vmem:[#allocation5 + $0x598] sm:$0xf] }
 0x182   :  { %v9025_v18 = vld [vmem:[#allocation5 + $0x654] sm:$0xf]  ;;  %v6572_v30 = vor.u32 %v8961_v15, %v6569_v16  ;;  %3000 = vmatpush.bf16.msra.mxu3 %v7372_v20  ;;  %v9006_v10 = vld [vmem:[#allocation5 + $0x5b4] sm:$0xf0]  ;;  %v6224_v20 = vor.u32 %v8878_v5, %v6223_v4 }
 0x183   :  { %v6825_v21 = vld [vmem:[#allocation5 + $0x670] sm:$0xf0]  ;;  %v6991_v15 = vld [vmem:[#allocation5 + $0x798] sm:$0xf] }
 0x184   :  { %v9089_v24 = vld [vmem:[#allocation5 + $0x854] sm:$0xf]  ;;  %v6828_v34 = vor.u32 %v9025_v18, %v6825_v21  ;;  %2959 = vmatpush.bf16.msra.mxu0 %v6572_v30  ;;  %v9070_v16 = vld [vmem:[#allocation5 + $0x7b4] sm:$0xf0]  ;;  %v9985_v18 = vpop.f32.mrf.mxu2  ;;  %v6480_v21 = vor.u32 %v8942_v12, %v6479_v9  ;;  %v9987_v30 = vpop.f32.mrf.mxu3 }
 0x185   :  { %v7081_v25 = vld [vmem:[#allocation5 + $0x870] sm:$0xf0]  ;;  %10383 = vst [vmem:[#allocation25_spill] sm:$0xff] %v9987_v30  ;;  %v8862_v49 = vld [vmem:[#allocation5 + $0x134] sm:$0xf0] }
 0x186   :  { %v9153_v26 = vld [vmem:[#allocation5 + $0xa54] sm:$0xf]  ;;  %v7084_v36 = vor.u32 %v9089_v24, %v7081_v25  ;;  %2973 = vmatpush.bf16.msra.mxu1 %v6828_v34  ;;  %v6736_v24 = vor.u32 %v9006_v10, %v6735_v14  ;;  %v6191_v25 = vld [vmem:[#allocation5 + $0x158] sm:$0xf]  ;;  %v6160_v62 = vor.u32 %v8862_v49, %v6159_v48  ;;  %v6769_v30 = vld [vmem:[#allocation5 + $0x5f8] sm:$0xf0] }
 0x187   :  { %v7337_v28 = vld [vmem:[#allocation5 + $0xa70] sm:$0xf0]  ;;  %v6703_v34 = vld [vmem:[#allocation5 + $0x558] sm:$0xf] }
 0x188   :  { %v8953_v32 = vld [vmem:[#allocation5 + $0x414] sm:$0xf]  ;;  %v7340_v42 = vor.u32 %v9153_v26, %v7337_v28  ;;  %2987 = vmatpush.bf16.msra.mxu2 %v7084_v36  ;;  %v8870_v26 = vld [vmem:[#allocation5 + $0x174] sm:$0xf0] }
 0x189   :  { %v6537_v33 = vld [vmem:[#allocation5 + $0x430] sm:$0xf0]  ;;  %v6447_v28 = vld [vmem:[#allocation5 + $0x358] sm:$0xf] }
 0x18a   :  { %v9017_v37 = vld [vmem:[#allocation5 + $0x614] sm:$0xf]  ;;  %v6540_v52 = vor.u32 %v8953_v32, %v6537_v33  ;;  %3001 = vmatpush.bf16.msra.mxu3 %v7340_v42  ;;  %v6992_v32 = vor.u32 %v9070_v16, %v6991_v15  ;;  %v8934_v33 = vld [vmem:[#allocation5 + $0x374] sm:$0xf0]  ;;  %v6192_v42 = vor.u32 %v8870_v26, %v6191_v25 }
 0x18b   :  { %v6793_v38 = vld [vmem:[#allocation5 + $0x630] sm:$0xf0]  ;;  %v8998_v36 = vld [vmem:[#allocation5 + $0x574] sm:$0xf0] }
 0x18c   :  { %v9081_v40 = vld [vmem:[#allocation5 + $0x814] sm:$0xf]  ;;  %v6796_v60 = vor.u32 %v9017_v37, %v6793_v38  ;;  %2960 = vmatpush.bf16.msra.mxu0 %v6540_v52  ;;  %v9990_v37 = vpop.f32.mrf.mxu0  ;;  %v6959_v38 = vld [vmem:[#allocation5 + $0x758] sm:$0xf]  ;;  %v9997_v4 = vpop.f32.mrf.mxu2 }
 0x18d   :  { %v7049_v43 = vld [vmem:[#allocation5 + $0x830] sm:$0xf0]  ;;  %v8926_v53 = vld [vmem:[#allocation5 + $0x334] sm:$0xf0]  ;;  %v10001_v16 = vpop.f32.mrf.mxu3 }
 0x18e   :  { %v9145_v44 = vld [vmem:[#allocation5 + $0xa14] sm:$0xf]  ;;  %v7052_v61 = vor.u32 %v9081_v40, %v7049_v43  ;;  %2974 = vmatpush.bf16.msra.mxu1 %v6796_v60  ;;  %v9062_v40 = vld [vmem:[#allocation5 + $0x774] sm:$0xf0]  ;;  %v9995_v43 = vpop.f32.mrf.mxu1  ;;  %v6416_v63 = vor.u32 %v8926_v53, %v6415_v51  ;;  %10384 = vst [vmem:[#allocation26_spill] sm:$0xff] %v10001_v16 }
 0x18f   :  { %v7305_v45 = vld [vmem:[#allocation5 + $0xa30] sm:$0xf0]  ;;  %2961 = vmatmul.bf16.vlgmr.msra.gmra.mxu0 %v9913_v22  ;;  %v6960_v52 = vor.u32 %v9062_v40, %v6959_v38  ;;  %v6671_v55 = vld [vmem:[#allocation5 + $0x518] sm:$0xf]  ;;  %v6289_v16 = vld [vmem:[#allocation5 + $0x238] sm:$0xf0] }
 0x190   :  { %v7308_v0 = vor.u32 %v9145_v44, %v7305_v45  ;;  %2988 = vmatpush.bf16.msra.mxu2 %v7052_v61  ;;  %3009 = vmatpush.bf16.msrb.mxu0 %v6256_v1  ;;  %v6448_v44 = vor.u32 %v8934_v33, %v6447_v28  ;;  %v6704_v45 = vor.u32 %v8998_v36, %v6703_v34  ;;  %v8990_v56 = vld [vmem:[#allocation5 + $0x534] sm:$0xf0] }
 0x191   :  { %2975 = vmatmul.bf16.vlgmr.msra.gmra.mxu1 %v9915_v23  ;;  %v6927_v60 = vld [vmem:[#allocation5 + $0x718] sm:$0xf] }
 0x192   :  { %3002 = vmatpush.bf16.msra.mxu3 %v7308_v0  ;;  %3023 = vmatpush.bf16.msrb.mxu1 %v6512_v2  ;;  %v9054_v61 = vld [vmem:[#allocation5 + $0x734] sm:$0xf0]  ;;  %v6672_v0 = vor.u32 %v8990_v56, %v6671_v55 }
 0x193   :  { %2989 = vmatmul.bf16.vlgmr.msra.gmra.mxu2 %v9919_v35  ;;  %v6127_v1 = vld [vmem:[#allocation5 + $0xd8] sm:$0xf]  ;;  %v6928_v5 = vor.u32 %v9054_v61, %v6927_v60 }
 0x194   :  { %3037 = vmatpush.bf16.msrb.mxu2 %v6768_v3  ;;  %3010 = vmatpush.bf16.msrb.mxu0 %v6224_v20  ;;  %v8854_v2 = vld [vmem:[#allocation5 + $0xf4] sm:$0xf0]  ;;  %v9999_v14 = vpop.f32.mrf.mxu0  ;;  %v10005_v53 = vpop.f32.mrf.mxu2 }
 0x195   :  { %3003 = vmatmul.bf16.vlgmr.msra.gmra.mxu3 %v9921_v39  ;;  %v6383_v3 = vld [vmem:[#allocation5 + $0x2d8] sm:$0xf]  ;;  %v6128_v20 = vor.u32 %v8854_v2, %v6127_v1 }
 0x196   :  { %3051 = vmatpush.bf16.msrb.mxu3 %v7024_v11  ;;  %3024 = vmatpush.bf16.msrb.mxu1 %v6480_v21  ;;  %v8918_v9 = vld [vmem:[#allocation5 + $0x2f4] sm:$0xf0]  ;;  %v10003_v21 = vpop.f32.mrf.mxu1 }
 0x197   :  { %v6639_v11 = vld [vmem:[#allocation5 + $0x4d8] sm:$0xf] }
 0x198   :  { %3038 = vmatpush.bf16.msrb.mxu2 %v6736_v24  ;;  %3011 = vmatpush.bf16.msrb.mxu0 %v6192_v42  ;;  %v8982_v12 = vld [vmem:[#allocation5 + $0x4f4] sm:$0xf0]  ;;  %v6384_v24 = vor.u32 %v8918_v9, %v6383_v3 }
 0x199   :  { %v6895_v10 = vld [vmem:[#allocation5 + $0x6d8] sm:$0xf]  ;;  %v6640_v25 = vor.u32 %v8982_v12, %v6639_v11 }
 0x19a   :  { %3052 = vmatpush.bf16.msrb.mxu3 %v6992_v32  ;;  %3025 = vmatpush.bf16.msrb.mxu1 %v6448_v44  ;;  %v9046_v15 = vld [vmem:[#allocation5 + $0x6f4] sm:$0xf0] }
 0x19b   :  { %v6095_v26 = vld [vmem:[#allocation5 + $0x98] sm:$0xf]  ;;  %v6896_v33 = vor.u32 %v9046_v15, %v6895_v10 }
 0x19c   :  { %3039 = vmatpush.bf16.msrb.mxu2 %v6704_v45  ;;  %3012 = vmatpush.bf16.msrb.mxu0 %v6160_v62  ;;  %v8846_v28 = vld [vmem:[#allocation5 + $0xb4] sm:$0xf0] }
 0x19d   :  { %v6351_v32 = vld [vmem:[#allocation5 + $0x298] sm:$0xf]  ;;  %v6096_v44 = vor.u32 %v8846_v28, %v6095_v26 }
 0x19e   :  { %3053 = vmatpush.bf16.msrb.mxu3 %v6960_v52  ;;  %3026 = vmatpush.bf16.msrb.mxu1 %v6416_v63  ;;  %v8910_v34 = vld [vmem:[#allocation5 + $0x2b4] sm:$0xf0]  ;;  %v10011_v28 = vpop.f32.mrf.mxu1 }
 0x19f   :  { %v6607_v36 = vld [vmem:[#allocation5 + $0x498] sm:$0xf]  ;;  %v6352_v45 = vor.u32 %v8910_v34, %v6351_v32 }
 0x1a0   :  { %3040 = vmatpush.bf16.msrb.mxu2 %v6672_v0  ;;  %v8974_v38 = vld [vmem:[#allocation5 + $0x4b4] sm:$0xf0]  ;;  %3013 = vmatpush.bf16.msrb.mxu0 %v6128_v20  ;;  %v10007_v0 = vpop.f32.mrf.mxu3 }
 0x1a1   :  { %v6863_v40 = vld [vmem:[#allocation5 + $0x698] sm:$0xf]  ;;  %v6608_v48 = vor.u32 %v8974_v38, %v6607_v36  ;;  %10385 = vst [vmem:[#allocation27_spill] sm:$0xff] %v10007_v0  ;;  %v6737_v0 = vld [vmem:[#allocation5 + $0x5b8] sm:$0xf0] }
 0x1a2   :  { %3054 = vmatpush.bf16.msrb.mxu3 %v6928_v5  ;;  %v9038_v42 = vld [vmem:[#allocation5 + $0x6b4] sm:$0xf0]  ;;  %3027 = vmatpush.bf16.msrb.mxu1 %v6384_v24  ;;  %v10009_v5 = vpop.f32.mrf.mxu0 }
 0x1a3   :  { %v6063_v49 = vld [vmem:[#allocation5 + $0x58] sm:$0xf]  ;;  %v6864_v55 = vor.u32 %v9038_v42, %v6863_v40  ;;  %v8882_v40 = vld [vmem:[#allocation5 + $0x1dc] sm:$0xf] }
 0x1a4   :  { %3041 = vmatpush.bf16.msrb.mxu2 %v6640_v25  ;;  %v8838_v51 = vld [vmem:[#allocation5 + $0x74] sm:$0xf0]  ;;  %3014 = vmatpush.bf16.msrb.mxu0 %v6096_v44  ;;  %v6257_v42 = vld [vmem:[#allocation5 + $0x1f8] sm:$0xf0] }
 0x1a5   :  { %v6319_v52 = vld [vmem:[#allocation5 + $0x258] sm:$0xf]  ;;  %v6064_v1 = vor.u32 %v8838_v51, %v6063_v49  ;;  %v6513_v49 = vld [vmem:[#allocation5 + $0x3f8] sm:$0xf0] }
 0x1a6   :  { %3055 = vmatpush.bf16.msrb.mxu3 %v6896_v33  ;;  %v8902_v56 = vld [vmem:[#allocation5 + $0x274] sm:$0xf0]  ;;  %3028 = vmatpush.bf16.msrb.mxu1 %v6352_v45 }
 0x1a7   :  { %v6575_v60 = vld [vmem:[#allocation5 + $0x458] sm:$0xf]  ;;  %v6320_v9 = vor.u32 %v8902_v56, %v6319_v52  ;;  %v6260_v56 = vor.u32 %v8882_v40, %v6257_v42  ;;  %v6193_v40 = vld [vmem:[#allocation5 + $0x178] sm:$0xf0]  ;;  %v10020_v42 = vpop.f32.mrf.mxu1 }
 0x1a8   :  { %v8966_v61 = vld [vmem:[#allocation5 + $0x474] sm:$0xf0]  ;;  %3042 = vmatpush.bf16.msrb.mxu2 %v6608_v48  ;;  %3015 = vmatpush.bf16.msrb.mxu0 %v6064_v1  ;;  %v8946_v48 = vld [vmem:[#allocation5 + $0x3dc] sm:$0xf]  ;;  %10388 = vst [vmem:[#allocation30_spill] sm:$0xff] %v10020_v42 }
 0x1a9   :  { %v6831_v62 = vld [vmem:[#allocation5 + $0x658] sm:$0xf]  ;;  %v6576_v11 = vor.u32 %v8966_v61, %v6575_v60  ;;  %v6516_v1 = vor.u32 %v8946_v48, %v6513_v49 }
 0x1aa   :  { %v9030_v63 = vld [vmem:[#allocation5 + $0x674] sm:$0xf0]  ;;  %3056 = vmatpush.bf16.msrb.mxu3 %v6864_v55  ;;  %3029 = vmatpush.bf16.msrb.mxu1 %v6320_v9  ;;  %v6225_v9 = vld [vmem:[#allocation5 + $0x1b8] sm:$0xf0] }
 0x1ab   :  { %v6031_v2 = vld [vmem:[#allocation5 + $0x18] sm:$0xf]  ;;  %v6832_v20 = vor.u32 %v9030_v63, %v6831_v62  ;;  %v10013_v63 = vpop.f32.mrf.mxu2 }
 0x1ac   :  { %v8830_v3 = vld [vmem:[#allocation5 + $0x34] sm:$0xf0]  ;;  %3043 = vmatpush.bf16.msrb.mxu2 %v6576_v11  ;;  %v8938_v11 = vld [vmem:[#allocation5 + $0x39c] sm:$0xf] }
 0x1ad   :  { %v6287_v12 = vld [vmem:[#allocation5 + $0x218] sm:$0xf]  ;;  %v6032_v36 = vor.u32 %v8830_v3, %v6031_v2  ;;  %v8874_v3 = vld [vmem:[#allocation5 + $0x19c] sm:$0xf] }
 0x1ae   :  { %v8894_v10 = vld [vmem:[#allocation5 + $0x234] sm:$0xf0]  ;;  %3057 = vmatpush.bf16.msrb.mxu3 %v6832_v20  ;;  %v10017_v20 = vpop.f32.mrf.mxu0 }
 0x1af   :  { %v6543_v15 = vld [vmem:[#allocation5 + $0x418] sm:$0xf]  ;;  %v6288_v44 = vor.u32 %v8894_v10, %v6287_v12  ;;  %3016 = vmatpush.bf16.msrb.mxu0 %v6032_v36  ;;  %v6481_v12 = vld [vmem:[#allocation5 + $0x3b8] sm:$0xf0]  ;;  %v10015_v10 = vpop.f32.mrf.mxu3  ;;  %10387 = vst [vmem:[#allocation29_spill] sm:$0xff] %v10017_v20 }
 0x1b0   :  { %v8958_v24 = vld [vmem:[#allocation5 + $0x434] sm:$0xf0]  ;;  %10386 = vst [vmem:[#allocation28_spill] sm:$0xff] %v10015_v10  ;;  %v9010_v20 = vld [vmem:[#allocation5 + $0x5dc] sm:$0xf] }
 0x1b1   :  { %v6799_v25 = vld [vmem:[#allocation5 + $0x618] sm:$0xf]  ;;  %v6544_v45 = vor.u32 %v8958_v24, %v6543_v15  ;;  %3030 = vmatpush.bf16.msrb.mxu1 %v6288_v44  ;;  %v8930_v44 = vld [vmem:[#allocation5 + $0x35c] sm:$0xf] }
 0x1b2   :  { %v9022_v26 = vld [vmem:[#allocation5 + $0x634] sm:$0xf0]  ;;  %3017 = vmatmul.bf16.vlgmr.msrb.gmra.mxu0 %v9907_v57  ;;  %v9002_v10 = vld [vmem:[#allocation5 + $0x59c] sm:$0xf] }
 0x1b3   :  { %v7279_v32 = vld [vmem:[#allocation5 + $0x9d8] sm:$0xf]  ;;  %v6800_v51 = vor.u32 %v9022_v26, %v6799_v25  ;;  %3044 = vmatpush.bf16.msrb.mxu2 %v6544_v45  ;;  %v6228_v25 = vor.u32 %v8874_v3, %v6225_v9  ;;  %v6449_v45 = vld [vmem:[#allocation5 + $0x378] sm:$0xf0] }
 0x1b4   :  { %v9142_v33 = vld [vmem:[#allocation5 + $0x9f4] sm:$0xf0]  ;;  %3031 = vmatmul.bf16.vlgmr.msrb.gmra.mxu1 %v9910_v6  ;;  %v8922_v3 = vld [vmem:[#allocation5 + $0x31c] sm:$0xf] }
 0x1b5   :  { %v7535_v34 = vld [vmem:[#allocation5 + $0xbd8] sm:$0xf]  ;;  %v7280_v52 = vor.u32 %v9142_v33, %v7279_v32  ;;  %3058 = vmatpush.bf16.msrb.mxu3 %v6800_v51  ;;  %v6417_v9 = vld [vmem:[#allocation5 + $0x338] sm:$0xf0] }
 0x1b6   :  { %v9206_v38 = vld [vmem:[#allocation5 + $0xbf4] sm:$0xf0]  ;;  %3045 = vmatmul.bf16.vlgmr.msrb.gmra.mxu2 %v9913_v22 }
 0x1b7   :  { %v7536_v55 = vor.u32 %v9206_v38, %v7535_v34  ;;  %v7247_v60 = vld [vmem:[#allocation5 + $0x998] sm:$0xf]  ;;  %3065 = vmatpush.bf16.msra.mxu0 %v7280_v52  ;;  %3093 = vmatpush.bf16.msra.mxu2 %v6260_v56  ;;  %v6484_v34 = vor.u32 %v8938_v11, %v6481_v12  ;;  %v8866_v38 = vld [vmem:[#allocation5 + $0x15c] sm:$0xf]  ;;  %v10027_v11 = vpop.f32.mrf.mxu3 }
 0x1b8   :  { %v9134_v61 = vld [vmem:[#allocation5 + $0x9b4] sm:$0xf0]  ;;  %3059 = vmatmul.bf16.vlgmr.msrb.gmra.mxu3 %v9915_v23  ;;  %v6196_v51 = vor.u32 %v8866_v38, %v6193_v40  ;;  %v6129_v38 = vld [vmem:[#allocation5 + $0xf8] sm:$0xf0]  ;;  %v10029_v40 = vpop.f32.mrf.mxu0 }
 0x1b9   :  { %v7503_v62 = vld [vmem:[#allocation5 + $0xb98] sm:$0xf]  ;;  %v7248_v15 = vor.u32 %v9134_v61, %v7247_v60  ;;  %3079 = vmatpush.bf16.msra.mxu1 %v7536_v55  ;;  %3107 = vmatpush.bf16.msra.mxu3 %v6516_v1  ;;  %v10025_v60 = vpop.f32.mrf.mxu2  ;;  %v6452_v61 = vor.u32 %v8930_v44, %v6449_v45  ;;  %v8858_v1 = vld [vmem:[#allocation5 + $0x11c] sm:$0xf]  ;;  %10389 = vst [vmem:[#allocation31_spill] sm:$0xff] %v10029_v40 }
 0x1ba   :  { %v9198_v2 = vld [vmem:[#allocation5 + $0xbb4] sm:$0xf0]  ;;  %v8914_v44 = vld [vmem:[#allocation5 + $0x2dc] sm:$0xf] }
 0x1bb   :  { %v7504_v24 = vor.u32 %v9198_v2, %v7503_v62  ;;  %v7215_v26 = vld [vmem:[#allocation5 + $0x958] sm:$0xf]  ;;  %3066 = vmatpush.bf16.msra.mxu0 %v7248_v15  ;;  %3094 = vmatpush.bf16.msra.mxu2 %v6228_v25  ;;  %v6161_v2 = vld [vmem:[#allocation5 + $0x138] sm:$0xf0] }
 0x1bc   :  { %v9126_v32 = vld [vmem:[#allocation5 + $0x974] sm:$0xf0]  ;;  %v6385_v45 = vld [vmem:[#allocation5 + $0x2f8] sm:$0xf0] }
 0x1bd   :  { %v7471_v33 = vld [vmem:[#allocation5 + $0xb58] sm:$0xf]  ;;  %v7216_v48 = vor.u32 %v9126_v32, %v7215_v26  ;;  %3080 = vmatpush.bf16.msra.mxu1 %v7504_v24  ;;  %3108 = vmatpush.bf16.msra.mxu3 %v6484_v34  ;;  %v6164_v24 = vor.u32 %v8858_v1, %v6161_v2  ;;  %v8842_v1 = vld [vmem:[#allocation5 + $0x9c] sm:$0xf] }
 0x1be   :  { %v9190_v36 = vld [vmem:[#allocation5 + $0xb74] sm:$0xf0]  ;;  %v6097_v2 = vld [vmem:[#allocation5 + $0xb8] sm:$0xf0] }
 0x1bf   :  { %v7472_v49 = vor.u32 %v9190_v36, %v7471_v33  ;;  %v7183_v52 = vld [vmem:[#allocation5 + $0x918] sm:$0xf]  ;;  %3067 = vmatpush.bf16.msra.mxu0 %v7216_v48  ;;  %3095 = vmatpush.bf16.msra.mxu2 %v6196_v51  ;;  %v6420_v33 = vor.u32 %v8922_v3, %v6417_v9  ;;  %v8850_v36 = vld [vmem:[#allocation5 + $0xdc] sm:$0xf]  ;;  %v10031_v48 = vpop.f32.mrf.mxu1 }
 0x1c0   :  { %v9118_v55 = vld [vmem:[#allocation5 + $0x934] sm:$0xf0]  ;;  %10390 = vst [vmem:[#allocation32_spill] sm:$0xff] %v10031_v48  ;;  %v6132_v51 = vor.u32 %v8850_v36, %v6129_v38  ;;  %v8906_v3 = vld [vmem:[#allocation5 + $0x29c] sm:$0xf] }
 0x1c1   :  { %v7439_v56 = vld [vmem:[#allocation5 + $0xb18] sm:$0xf]  ;;  %v7184_v12 = vor.u32 %v9118_v55, %v7183_v52  ;;  %3081 = vmatpush.bf16.msra.mxu1 %v7472_v49  ;;  %3109 = vmatpush.bf16.msra.mxu3 %v6452_v61  ;;  %v6388_v61 = vor.u32 %v8914_v44, %v6385_v45  ;;  %v6353_v9 = vld [vmem:[#allocation5 + $0x2b8] sm:$0xf0]  ;;  %v10033_v42 = vpop.f32.mrf.mxu2  ;;  %v10037_v45 = vpop.f32.mrf.mxu0 }
 0x1c2   :  { %v9182_v62 = vld [vmem:[#allocation5 + $0xb34] sm:$0xf0]  ;;  %v8834_v38 = vld [vmem:[#allocation5 + $0x5c] sm:$0xf] }
 0x1c3   :  { %v7440_v15 = vor.u32 %v9182_v62, %v7439_v56  ;;  %v7151_v25 = vld [vmem:[#allocation5 + $0x8d8] sm:$0xf]  ;;  %3068 = vmatpush.bf16.msra.mxu0 %v7184_v12  ;;  %3096 = vmatpush.bf16.msra.mxu2 %v6164_v24  ;;  %v6100_v24 = vor.u32 %v8842_v1, %v6097_v2  ;;  %v6065_v44 = vld [vmem:[#allocation5 + $0x78] sm:$0xf0] }
 0x1c4   :  { %v9110_v26 = vld [vmem:[#allocation5 + $0x8f4] sm:$0xf0]  ;;  %v8898_v48 = vld [vmem:[#allocation5 + $0x25c] sm:$0xf] }
 0x1c5   :  { %v7407_v32 = vld [vmem:[#allocation5 + $0xad8] sm:$0xf]  ;;  %v7152_v54 = vor.u32 %v9110_v26, %v7151_v25  ;;  %3082 = vmatpush.bf16.msra.mxu1 %v7440_v15  ;;  %3110 = vmatpush.bf16.msra.mxu3 %v6420_v33  ;;  %v6356_v33 = vor.u32 %v8906_v3, %v6353_v9  ;;  %v6321_v40 = vld [vmem:[#allocation5 + $0x278] sm:$0xf0] }
 0x1c6   :  { %v9174_v34 = vld [vmem:[#allocation5 + $0xaf4] sm:$0xf0]  ;;  %v8826_v1 = vld [vmem:[#allocation5 + $0x1c] sm:$0xf]  ;;  %v6324_v2 = vor.u32 %v8898_v48, %v6321_v40  ;;  %v6772_v48 = vor.u32 %v9010_v20, %v6769_v30  ;;  %v6740_v30 = vor.u32 %v9002_v10, %v6737_v0 }
 0x1c7   :  { %v7408_v49 = vor.u32 %v9174_v34, %v7407_v32  ;;  %v7119_v52 = vld [vmem:[#allocation5 + $0x898] sm:$0xf]  ;;  %3069 = vmatpush.bf16.msra.mxu0 %v7152_v54  ;;  %3097 = vmatpush.bf16.msra.mxu2 %v6132_v51  ;;  %v10035_v34 = vpop.f32.mrf.mxu3  ;;  %v6033_v3 = vld [vmem:[#allocation5 + $0x38] sm:$0xf0] }
 0x1c8   :  { %v9102_v55 = vld [vmem:[#allocation5 + $0x8b4] sm:$0xf0]  ;;  %v8890_v9 = vld [vmem:[#allocation5 + $0x21c] sm:$0xf] }
 0x1c9   :  { %v7375_v56 = vld [vmem:[#allocation5 + $0xa98] sm:$0xf]  ;;  %v7120_v12 = vor.u32 %v9102_v55, %v7119_v52  ;;  %3083 = vmatpush.bf16.msra.mxu1 %v7408_v49  ;;  %3111 = vmatpush.bf16.msra.mxu3 %v6388_v61  ;;  %v10039_v52 = vpop.f32.mrf.mxu1  ;;  %v6292_v40 = vor.u32 %v8890_v9, %v6289_v16  ;;  %v9058_v9 = vld [vmem:[#allocation5 + $0x75c] sm:$0xf] }
 0x1ca   :  { %v9166_v62 = vld [vmem:[#allocation5 + $0xab4] sm:$0xf0]  ;;  %10391 = vst [vmem:[#allocation33_spill] sm:$0xff] %v10039_v52  ;;  %v7281_v52 = vld [vmem:[#allocation5 + $0x9f8] sm:$0xf0] }
 0x1cb   :  { %v7376_v15 = vor.u32 %v9166_v62, %v7375_v56  ;;  %v7087_v25 = vld [vmem:[#allocation5 + $0x858] sm:$0xf]  ;;  %3070 = vmatpush.bf16.msra.mxu0 %v7120_v12  ;;  %3098 = vmatpush.bf16.msra.mxu2 %v6100_v24  ;;  %v6068_v56 = vor.u32 %v8834_v38, %v6065_v44  ;;  %v9074_v12 = vld [vmem:[#allocation5 + $0x7dc] sm:$0xf]  ;;  %v6036_v24 = vor.u32 %v8826_v1, %v6033_v3  ;;  %v10041_v38 = vpop.f32.mrf.mxu2 }
 0x1cc   :  { %v9094_v26 = vld [vmem:[#allocation5 + $0x874] sm:$0xf0]  ;;  %10392 = vst [vmem:[#allocation34_spill] sm:$0xff] %v10041_v38  ;;  %v7284_v44 = vor.u32 %v9138_v13, %v7281_v52  ;;  %v9194_v1 = vld [vmem:[#allocation5 + $0xb9c] sm:$0xf] }
 0x1cd   :  { %v7343_v32 = vld [vmem:[#allocation5 + $0xa58] sm:$0xf]  ;;  %v7088_v54 = vor.u32 %v9094_v26, %v7087_v25  ;;  %3084 = vmatpush.bf16.msra.mxu1 %v7376_v15  ;;  %3112 = vmatpush.bf16.msra.mxu3 %v6356_v33  ;;  %v7025_v26 = vld [vmem:[#allocation5 + $0x7f8] sm:$0xf0] }
 0x1ce   :  { %v9158_v36 = vld [vmem:[#allocation5 + $0xa74] sm:$0xf0]  ;;  %v7028_v33 = vor.u32 %v9074_v12, %v7025_v26  ;;  %v8994_v52 = vld [vmem:[#allocation5 + $0x55c] sm:$0xf] }
 0x1cf   :  { %v7055_v49 = vld [vmem:[#allocation5 + $0x818] sm:$0xf]  ;;  %v7344_v55 = vor.u32 %v9158_v36, %v7343_v32  ;;  %3071 = vmatpush.bf16.msra.mxu0 %v7088_v54  ;;  %3099 = vmatpush.bf16.msra.mxu2 %v6068_v56  ;;  %v9202_v32 = vld [vmem:[#allocation5 + $0xbdc] sm:$0xf] }
 0x1d0   :  { %v9086_v51 = vld [vmem:[#allocation5 + $0x834] sm:$0xf0]  ;;  %v7537_v36 = vld [vmem:[#allocation5 + $0xbf8] sm:$0xf0] }
 0x1d1   :  { %v7311_v62 = vld [vmem:[#allocation5 + $0xa18] sm:$0xf]  ;;  %v7056_v25 = vor.u32 %v9086_v51, %v7055_v49  ;;  %3085 = vmatpush.bf16.msra.mxu1 %v7344_v55  ;;  %3113 = vmatpush.bf16.msra.mxu3 %v6324_v2  ;;  %v9066_v54 = vld [vmem:[#allocation5 + $0x79c] sm:$0xf]  ;;  %v10043_v49 = vpop.f32.mrf.mxu3  ;;  %v7540_v51 = vor.u32 %v9202_v32, %v7537_v36  ;;  %v10047_v13 = vpop.f32.mrf.mxu1  ;;  %v10053_v32 = vld [vmem:[#allocation7] sm:$0xff] }
 0x1d2   :  { %v9150_v61 = vld [vmem:[#allocation5 + $0xa34] sm:$0xf0]  ;;  %10393 = vst [vmem:[#allocation35_spill] sm:$0xff] %v10043_v49  ;;  %v6993_v55 = vld [vmem:[#allocation5 + $0x7b8] sm:$0xf0]  ;;  %v10380_v36 = vperm.slane %v10053_v32, 4 }
 0x1d3   :  { %v7312_v15 = vor.u32 %v9150_v61, %v7311_v62  ;;  %3072 = vmatpush.bf16.msra.mxu0 %v7056_v25  ;;  %v9130_v56 = vld [vmem:[#allocation5 + $0x99c] sm:$0xf]  ;;  %v10045_v61 = vpop.f32.mrf.mxu0  ;;  %3100 = vmatpush.bf16.msra.mxu2 %v6036_v24  ;;  %v6996_v16 = vor.u32 %v9066_v54, %v6993_v55  ;;  %10394 = vst [vmem:[#allocation36_spill] sm:$0xff] %v10053_v32 }
 0x1d4   :  { %v7249_v62 = vld [vmem:[#allocation5 + $0x9b8] sm:$0xf0] }
 0x1d5   :  { %3086 = vmatpush.bf16.msra.mxu1 %v7312_v15  ;;  %v7505_v2 = vld [vmem:[#allocation5 + $0xbb8] sm:$0xf0]  ;;  %3114 = vmatpush.bf16.msra.mxu3 %v6292_v40  ;;  %v7252_v20 = vor.u32 %v9130_v56, %v7249_v62 }
 0x1d6   :  { %v6705_v3 = vld [vmem:[#allocation5 + $0x578] sm:$0xf0]  ;;  %3073 = vmatmul.bf16.vlgmr.msra.gmra.mxu0 %v9919_v35  ;;  %v7508_v12 = vor.u32 %v9194_v1, %v7505_v2  ;;  %3101 = vmatmul.bf16.vlgmr.msra.gmra.mxu2 %v9907_v57 }
 0x1d7   :  { %3121 = vmatpush.bf16.msrb.mxu0 %v6772_v48  ;;  %3149 = vmatpush.bf16.msrb.mxu2 %v7284_v44  ;;  %v6961_v25 = vld [vmem:[#allocation5 + $0x778] sm:$0xf0]  ;;  %v6708_v10 = vor.u32 %v8994_v52, %v6705_v3 }
 0x1d8   :  { %v9122_v26 = vld [vmem:[#allocation5 + $0x95c] sm:$0xf]  ;;  %3087 = vmatmul.bf16.vlgmr.msra.gmra.mxu1 %v9921_v39  ;;  %3115 = vmatmul.bf16.vlgmr.msra.gmra.mxu3 %v9910_v6  ;;  %v6964_v40 = vor.u32 %v9058_v9, %v6961_v25 }
 0x1d9   :  { %3135 = vmatpush.bf16.msrb.mxu1 %v7028_v33  ;;  %3163 = vmatpush.bf16.msrb.mxu3 %v7540_v51  ;;  %v7217_v15 = vld [vmem:[#allocation5 + $0x978] sm:$0xf0]  ;;  %v10056_v51 = vpop.f32.mrf.mxu2 }
 0x1da   :  { %v9186_v24 = vld [vmem:[#allocation5 + $0xb5c] sm:$0xf]  ;;  %v7220_v48 = vor.u32 %v9122_v26, %v7217_v15  ;;  %10395 = vst [vmem:[#allocation37_spill] sm:$0xff] %v10056_v51  ;;  %v2864_v26 = vpop.f32.mrf.mxu1  ;;  %v10397_v51 = vperm.slane %v9935_v46, 0 }
 0x1db   :  { %v7473_v0 = vld [vmem:[#allocation5 + $0xb78] sm:$0xf0]  ;;  %3122 = vmatpush.bf16.msrb.mxu0 %v6740_v30  ;;  %3150 = vmatpush.bf16.msrb.mxu2 %v7252_v20  ;;  %v2850_v2 = vpop.f32.mrf.mxu0  ;;  %v10058_v30 = vpop.f32.mrf.mxu3 }
 0x1dc   :  { %v8986_v33 = vld [vmem:[#allocation5 + $0x51c] sm:$0xf]  ;;  %v7476_v55 = vor.u32 %v9186_v24, %v7473_v0  ;;  %10396 = vst [vmem:[#allocation38_spill] sm:$0xff] %v10058_v30  ;;  %v2851_v20 = vadd.f32 %v2850_v2, %v10380_v36  ;;  %v570_v2 = vperm.slane %v10053_v32, 1 }
 0x1dd   :  { %3136 = vmatpush.bf16.msrb.mxu1 %v6996_v16  ;;  %v6673_v44 = vld [vmem:[#allocation5 + $0x538] sm:$0xf0]  ;;  %3164 = vmatpush.bf16.msrb.mxu3 %v7508_v12 }
 0x1de   :  { %v9050_v54 = vld [vmem:[#allocation5 + $0x71c] sm:$0xf]  ;;  %v6676_v16 = vor.u32 %v8986_v33, %v6673_v44  ;;  %v2865_v38 = vadd.f32 %v2864_v26, %v2851_v20 }
 0x1df   :  { %v6929_v57 = vld [vmem:[#allocation5 + $0x738] sm:$0xf0]  ;;  %3123 = vmatpush.bf16.msrb.mxu0 %v6708_v10  ;;  %3151 = vmatpush.bf16.msrb.mxu2 %v7220_v48 }
 0x1e0   :  { %v9114_v56 = vld [vmem:[#allocation5 + $0x91c] sm:$0xf]  ;;  %v6932_v52 = vor.u32 %v9050_v54, %v6929_v57 }
 0x1e1   :  { %v7185_v62 = vld [vmem:[#allocation5 + $0x938] sm:$0xf0]  ;;  %3137 = vmatpush.bf16.msrb.mxu1 %v6964_v40  ;;  %3165 = vmatpush.bf16.msrb.mxu3 %v7476_v55 }
 0x1e2   :  { %v9178_v1 = vld [vmem:[#allocation5 + $0xb1c] sm:$0xf]  ;;  %v7188_v3 = vor.u32 %v9114_v56, %v7185_v62 }
 0x1e3   :  { %v7441_v6 = vld [vmem:[#allocation5 + $0xb38] sm:$0xf0]  ;;  %3124 = vmatpush.bf16.msrb.mxu0 %v6676_v16 }
 0x1e4   :  { %v8978_v9 = vld [vmem:[#allocation5 + $0x4dc] sm:$0xf]  ;;  %v7444_v15 = vor.u32 %v9178_v1, %v7441_v6  ;;  %3152 = vmatpush.bf16.msrb.mxu2 %v7188_v3  ;;  %v2878_v6 = vpop.f32.mrf.mxu2 }
 0x1e5   :  { %v6641_v12 = vld [vmem:[#allocation5 + $0x4f8] sm:$0xf0]  ;;  %3138 = vmatpush.bf16.msrb.mxu1 %v6932_v52  ;;  %v2879_v36 = vadd.f32 %v2878_v6, %v2865_v38  ;;  %v2892_v52 = vpop.f32.mrf.mxu3  ;;  %v2517_v38 = vadd.f32 %v9946_v19, %v10397_v51 }
 0x1e6   :  { %v9042_v25 = vld [vmem:[#allocation5 + $0x6dc] sm:$0xf]  ;;  %v6644_v33 = vor.u32 %v8978_v9, %v6641_v12  ;;  %3166 = vmatpush.bf16.msrb.mxu3 %v7444_v15 }
 0x1e7   :  { %v6897_v24 = vld [vmem:[#allocation5 + $0x6f8] sm:$0xf0] }
 0x1e8   :  { %v9106_v0 = vld [vmem:[#allocation5 + $0x8dc] sm:$0xf]  ;;  %v6900_v40 = vor.u32 %v9042_v25, %v6897_v24  ;;  %3125 = vmatpush.bf16.msrb.mxu0 %v6644_v33  ;;  %v2599_v33 = vadd.f32 %v9969_v50, %v570_v2 }
 0x1e9   :  { %v7153_v49 = vld [vmem:[#allocation5 + $0x8f8] sm:$0xf0] }
 0x1ea   :  { %v9170_v30 = vld [vmem:[#allocation5 + $0xadc] sm:$0xf]  ;;  %v7156_v48 = vor.u32 %v9106_v0, %v7153_v49  ;;  %3139 = vmatpush.bf16.msrb.mxu1 %v6900_v40 }
 0x1eb   :  { %v7409_v10 = vld [vmem:[#allocation5 + $0xaf8] sm:$0xf0] }
 0x1ec   :  { %v8970_v44 = vld [vmem:[#allocation5 + $0x49c] sm:$0xf]  ;;  %v7412_v56 = vor.u32 %v9170_v30, %v7409_v10  ;;  %3153 = vmatpush.bf16.msrb.mxu2 %v7156_v48  ;;  %v10063_v30 = vadd.f32 %v2892_v52, %v2879_v36  ;;  %v572_v36 = vperm.slane %v10053_v32, 3  ;;  %v7783_v52 = vld [vmem:[#allocation8 + $0x1e0] sm:$0xf] }
 0x1ed   :  { %v6609_v54 = vld [vmem:[#allocation5 + $0x4b8] sm:$0xf0] }
 0x1ee   :  { %v9034_v57 = vld [vmem:[#allocation5 + $0x69c] sm:$0xf]  ;;  %v6612_v16 = vor.u32 %v8970_v44, %v6609_v54  ;;  %3167 = vmatpush.bf16.msrb.mxu3 %v7412_v56  ;;  %v2601_v44 = vadd.f32 %v9977_v29, %v570_v2  ;;  %v571_v54 = vperm.slane %v10053_v32, 2  ;;  %v7655_v2 = vld [vmem:[#allocation8 + $0xe0] sm:$0xf] }
 0x1ef   :  { %v6865_v62 = vld [vmem:[#allocation5 + $0x6b8] sm:$0xf0] }
 0x1f0   :  { %v9098_v55 = vld [vmem:[#allocation5 + $0x89c] sm:$0xf]  ;;  %v6868_v49 = vor.u32 %v9034_v57, %v6865_v62  ;;  %3126 = vmatpush.bf16.msrb.mxu0 %v6612_v16  ;;  %v2531_v16 = vadd.f32 %v9948_v31, %v2517_v38  ;;  %v2685_v32 = vadd.f32 %v10009_v5, %v571_v54  ;;  %v2767_v31 = vadd.f32 %v10025_v60, %v572_v36  ;;  %v7895_v5 = vld [vmem:[#allocation8 + $0x2c0] sm:$0xf] }
 0x1f1   :  { %v7121_v1 = vld [vmem:[#allocation5 + $0x8b8] sm:$0xf0]  ;;  %v2769_v38 = vadd.f32 %v10033_v42, %v572_v36  ;;  %v8023_v36 = vld [vmem:[#allocation8 + $0x3c0] sm:$0xf] }
 0x1f2   :  { %v9162_v20 = vld [vmem:[#allocation5 + $0xa9c] sm:$0xf]  ;;  %v7124_v3 = vor.u32 %v9098_v55, %v7121_v1  ;;  %3140 = vmatpush.bf16.msrb.mxu1 %v6868_v49  ;;  %v2615_v49 = vadd.f32 %v9979_v41, %v2601_v44 }
 0x1f3   :  { %v7377_v26 = vld [vmem:[#allocation5 + $0xab8] sm:$0xf0] }
 0x1f4   :  { %v8962_v9 = vld [vmem:[#allocation5 + $0x45c] sm:$0xf]  ;;  %v7380_v15 = vor.u32 %v9162_v20, %v7377_v26  ;;  %3154 = vmatpush.bf16.msrb.mxu2 %v7124_v3  ;;  %v9237_v26 = vld [vmem:[#allocation8 + $0xec] sm:$0xf0] }
 0x1f5   :  { %v6577_v12 = vld [vmem:[#allocation5 + $0x478] sm:$0xf0]  ;;  %v7656_v41 = vor.u32 %v9237_v26, %v7655_v2  ;;  %v9229_v2 = vld [vmem:[#allocation8 + $0xac] sm:$0xf0]  ;;  %v7751_v26 = vld [vmem:[#allocation8 + $0x1a0] sm:$0xf] }
 0x1f6   :  { %v9026_v25 = vld [vmem:[#allocation5 + $0x65c] sm:$0xf]  ;;  %v6580_v57 = vor.u32 %v8962_v9, %v6577_v12  ;;  %3168 = vmatpush.bf16.msrb.mxu3 %v7380_v15  ;;  %v2613_v9 = vadd.f32 %v9971_v59, %v2599_v33  ;;  %v9269_v12 = vld [vmem:[#allocation8 + $0x1ec] sm:$0xf0]  ;;  %v2683_v15 = vadd.f32 %v9999_v14, %v571_v54  ;;  %v7639_v14 = vld [vmem:[#allocation8 + $0xc0] sm:$0xf] }
 0x1f7   :  { %v6833_v24 = vld [vmem:[#allocation5 + $0x678] sm:$0xf0]  ;;  %v7784_v33 = vor.u32 %v9269_v12, %v7783_v52  ;;  %v9297_v54 = vld [vmem:[#allocation8 + $0x2cc] sm:$0xf0] }
 0x1f8   :  { %v9090_v0 = vld [vmem:[#allocation5 + $0x85c] sm:$0xf]  ;;  %v6836_v55 = vor.u32 %v9026_v25, %v6833_v24  ;;  %3127 = vmatpush.bf16.msrb.mxu0 %v6580_v57  ;;  %v7911_v25 = vld [vmem:[#allocation8 + $0x2e0] sm:$0xf]  ;;  %v9301_v24 = vld [vmem:[#allocation8 + $0x2ec] sm:$0xf0]  ;;  %v10079_v57 = vpop.f32.mrf.mxu0  ;;  %v2627_v60 = vadd.f32 %v9981_v47, %v2613_v9  ;;  %v2697_v42 = vadd.f32 %v10003_v21, %v2683_v15 }
 0x1f9   :  { %v7089_v10 = vld [vmem:[#allocation5 + $0x878] sm:$0xf0]  ;;  %v7912_v44 = vor.u32 %v9301_v24, %v7911_v25  ;;  %v7623_v21 = vld [vmem:[#allocation8 + $0xa0] sm:$0xf]  ;;  %v9325_v12 = vld [vmem:[#allocation8 + $0x3ac] sm:$0xf0] }
 0x1fa   :  { %v9154_v40 = vld [vmem:[#allocation5 + $0xa5c] sm:$0xf]  ;;  %v7092_v46 = vor.u32 %v9090_v0, %v7089_v10  ;;  %3141 = vmatpush.bf16.msrb.mxu1 %v6836_v55  ;;  %v2545_v55 = vadd.f32 %v9961_v17, %v2531_v16  ;;  %v2781_v17 = vadd.f32 %v10027_v11, %v2767_v31  ;;  %v7879_v11 = vld [vmem:[#allocation8 + $0x2a0] sm:$0xf]  ;;  %v9293_v16 = vld [vmem:[#allocation8 + $0x2ac] sm:$0xf0]  ;;  %v2641_v9 = vadd.f32 %v9983_v58, %v2627_v60 }
 0x1fb   :  { %v7345_v48 = vld [vmem:[#allocation5 + $0xa78] sm:$0xf0]  ;;  %v7624_v58 = vor.u32 %v9229_v2, %v7623_v21  ;;  %v7607_v24 = vld [vmem:[#allocation8 + $0x80] sm:$0xf]  ;;  %v9317_v2 = vld [vmem:[#allocation8 + $0x36c] sm:$0xf0] }
 0x1fc   :  { %v8954_v56 = vld [vmem:[#allocation5 + $0x41c] sm:$0xf]  ;;  %v7348_v50 = vor.u32 %v9154_v40, %v7345_v48  ;;  %3155 = vmatpush.bf16.msrb.mxu2 %v7092_v46  ;;  %v8039_v40 = vld [vmem:[#allocation8 + $0x3e0] sm:$0xf]  ;;  %v9333_v48 = vld [vmem:[#allocation8 + $0x3ec] sm:$0xf0]  ;;  %v2559_v52 = vadd.f32 %v9966_v27, %v2545_v55  ;;  %v2795_v25 = vadd.f32 %v10037_v45, %v2781_v17 }
 0x1fd   :  { %v6545_v62 = vld [vmem:[#allocation5 + $0x438] sm:$0xf0]  ;;  %v8040_v46 = vor.u32 %v9333_v48, %v8039_v40  ;;  %v3177_v27 = vmax.f32 %v9955_v8, 0.0  ;;  %v7735_v15 = vld [vmem:[#allocation8 + $0x180] sm:$0xf] }
 0x1fe   :  { %v9018_v1 = vld [vmem:[#allocation5 + $0x61c] sm:$0xf]  ;;  %v6548_v3 = vor.u32 %v8954_v56, %v6545_v62  ;;  %3169 = vmatpush.bf16.msrb.mxu3 %v7348_v50  ;;  %v9233_v56 = vld [vmem:[#allocation8 + $0xcc] sm:$0xf0]  ;;  %v7767_v62 = vld [vmem:[#allocation8 + $0x1c0] sm:$0xf]  ;;  %v10085_v50 = vpop.f32.mrf.mxu1  ;;  %v2573_v45 = vadd.f32 %v9973_v7, %v2559_v52 }
 0x1ff   :  { %v6801_v19 = vld [vmem:[#allocation5 + $0x638] sm:$0xf0]  ;;  %v7863_v40 = vld [vmem:[#allocation8 + $0x280] sm:$0xf] }
 0x200   :  { %v9082_v51 = vld [vmem:[#allocation5 + $0x81c] sm:$0xf]  ;;  %v6804_v0 = vor.u32 %v9018_v1, %v6801_v19  ;;  %3128 = vmatpush.bf16.msrb.mxu0 %v6548_v3  ;;  %v9265_v1 = vld [vmem:[#allocation8 + $0x1cc] sm:$0xf0]  ;;  %v2629_v19 = vadd.f32 %v9990_v37, %v2615_v49  ;;  %v7896_v37 = vor.u32 %v9297_v54, %v7895_v5  ;;  %v2711_v49 = vadd.f32 %v10005_v53, %v2697_v42  ;;  %v8007_v3 = vld [vmem:[#allocation8 + $0x3a0] sm:$0xf] }
 0x201   :  { %v7057_v6 = vld [vmem:[#allocation5 + $0x838] sm:$0xf0]  ;;  %v7768_v47 = vor.u32 %v9265_v1, %v7767_v62  ;;  %v7591_v1 = vld [vmem:[#allocation8 + $0x60] sm:$0xf]  ;;  %v9221_v5 = vld [vmem:[#allocation8 + $0x6c] sm:$0xf0] }
 0x202   :  { %v9146_v20 = vld [vmem:[#allocation5 + $0xa1c] sm:$0xf]  ;;  %v7060_v10 = vor.u32 %v9082_v51, %v7057_v6  ;;  %3142 = vmatpush.bf16.msrb.mxu1 %v6804_v0  ;;  %v9329_v51 = vld [vmem:[#allocation8 + $0x3cc] sm:$0xf0]  ;;  %v2699_v6 = vadd.f32 %v10011_v28, %v2685_v32  ;;  %v8008_v0 = vor.u32 %v9325_v12, %v8007_v3  ;;  %v7719_v54 = vld [vmem:[#allocation8 + $0x160] sm:$0xf] }
 0x203   :  { %v7313_v29 = vld [vmem:[#allocation5 + $0xa38] sm:$0xf0]  ;;  %3129 = vmatmul.bf16.vlgmr.msrb.gmra.mxu0 %v9913_v22  ;;  %v8024_v28 = vor.u32 %v9329_v51, %v8023_v36  ;;  %v9261_v32 = vld [vmem:[#allocation8 + $0x1ac] sm:$0xf0]  ;;  %v7847_v36 = vld [vmem:[#allocation8 + $0x260] sm:$0xf] }
 0x204   :  { %v7316_v59 = vor.u32 %v9146_v20, %v7313_v29  ;;  %3156 = vmatpush.bf16.msrb.mxu2 %v7060_v10  ;;  %3999 = vmatpush.bf16.msra.mxu0 %v7656_v41  ;;  %v7640_v20 = vor.u32 %v9233_v56, %v7639_v14  ;;  %v2783_v29 = vadd.f32 %v10035_v34, %v2769_v38  ;;  %v9257_v10 = vld [vmem:[#allocation8 + $0x18c] sm:$0xf0]  ;;  %v7991_v41 = vld [vmem:[#allocation8 + $0x380] sm:$0xf] }
 0x205   :  { %v2643_v34 = vadd.f32 %v9995_v43, %v2629_v19  ;;  %3143 = vmatmul.bf16.vlgmr.msrb.gmra.mxu1 %v9915_v23  ;;  %v2713_v22 = vadd.f32 %v10013_v63, %v2699_v6  ;;  %v7752_v53 = vor.u32 %v9261_v32, %v7751_v26  ;;  %v9225_v23 = vld [vmem:[#allocation8 + $0x8c] sm:$0xf0]  ;;  %v10400_v14 = vld [vmem:[#allocation33_spill] sm:$0xff]  ;;  %v7736_v7 = vor.u32 %v9257_v10, %v7735_v15  ;;  %v10402_v6 = vld [vmem:[#allocation24_spill] sm:$0xff] }
 0x206   :  { %3170 = vmatpush.bf16.msrb.mxu3 %v7316_v59  ;;  %4013 = vmatpush.bf16.msra.mxu1 %v7784_v33  ;;  %v2797_v43 = vadd.f32 %v10045_v61, %v2783_v29  ;;  %v9289_v63 = vld [vmem:[#allocation8 + $0x28c] sm:$0xf0]  ;;  %v2906_v59 = vpop.f32.mrf.mxu0  ;;  %v10399_v33 = vld [vmem:[#allocation28_spill] sm:$0xff]  ;;  %v2809_v56 = vadd.f32 %v10400_v14, %v2795_v25  ;;  %v7608_v55 = vor.u32 %v9225_v23, %v7607_v24  ;;  %v10403_v17 = vld [vmem:[#allocation25_spill] sm:$0xff] }
 0x207   :  { %3157 = vmatmul.bf16.vlgmr.msrb.gmra.mxu2 %v9919_v35  ;;  %v7880_v35 = vor.u32 %v9293_v16, %v7879_v11  ;;  %v2657_v48 = vadd.f32 %v9997_v4, %v2643_v34  ;;  %v10398_v31 = vld [vmem:[#allocation27_spill] sm:$0xff]  ;;  %v2907_v62 = vadd.f32 %v2906_v59, %v10063_v30  ;;  %v2920_v4 = vpop.f32.mrf.mxu1  ;;  %v10113_v30 = vadd.f32 %v10402_v6, %v2573_v45  ;;  %v7975_v21 = vld [vmem:[#allocation8 + $0x360] sm:$0xf]  ;;  %v10406_v26 = vld [vmem:[#allocation26_spill] sm:$0xff] }
 0x208   :  { %4027 = vmatpush.bf16.msra.mxu2 %v7912_v44  ;;  %4000 = vmatpush.bf16.msra.mxu0 %v7640_v20  ;;  %v2725_v61 = vadd.f32 %v10398_v31, %v2711_v49  ;;  %v9321_v38 = vld [vmem:[#allocation8 + $0x38c] sm:$0xf0]  ;;  %v2727_v44 = vadd.f32 %v10399_v33, %v2713_v22  ;;  %v10404_v20 = vld [vmem:[#allocation29_spill] sm:$0xff]  ;;  %v7976_v25 = vor.u32 %v9317_v2, %v7975_v21 }
 0x209   :  { %3171 = vmatmul.bf16.vlgmr.msrb.gmra.mxu3 %v9921_v39  ;;  %v2655_v39 = vadd.f32 %v9985_v18, %v2641_v9  ;;  %v7864_v18 = vor.u32 %v9289_v63, %v7863_v40  ;;  %v7992_v60 = vor.u32 %v9321_v38, %v7991_v41  ;;  %v10110_v19 = vadd.f32 %v2920_v4, %v2907_v62  ;;  %v9253_v42 = vld [vmem:[#allocation8 + $0x16c] sm:$0xf0]  ;;  %v7575_v3 = vld [vmem:[#allocation8 + $0x40] sm:$0xf] }
 0x20a   :  { %4041 = vmatpush.bf16.msra.mxu3 %v8040_v46  ;;  %4014 = vmatpush.bf16.msra.mxu1 %v7768_v47  ;;  %v2811_v46 = vadd.f32 %v10047_v13, %v2797_v43  ;;  %v9285_v51 = vld [vmem:[#allocation8 + $0x26c] sm:$0xf0]  ;;  %v2739_v29 = vadd.f32 %v10404_v20, %v2725_v61  ;;  %v10405_v47 = vld [vmem:[#allocation37_spill] sm:$0xff]  ;;  %v2671_v52 = vadd.f32 %v10406_v26, %v2657_v48 }
 0x20b   :  { %10401 = vst [vmem:[#allocation27_spill] sm:$0xff] %v10110_v19  ;;  %v10116_v13 = vadd.f32 %v10403_v17, %v2655_v39  ;;  %v10408_v11 = vld [vmem:[#allocation34_spill] sm:$0xff]  ;;  %v7592_v9 = vor.u32 %v9221_v5, %v7591_v1  ;;  %v7720_v34 = vor.u32 %v9253_v42, %v7719_v54  ;;  %v7848_v49 = vor.u32 %v9285_v51, %v7847_v36  ;;  %v7703_v22 = vld [vmem:[#allocation8 + $0x140] sm:$0xf]  ;;  %v10412_v31 = vld [vmem:[#allocation35_spill] sm:$0xff] }
 0x20c   :  { %4028 = vmatpush.bf16.msra.mxu2 %v7896_v37  ;;  %4001 = vmatpush.bf16.msra.mxu0 %v7624_v58  ;;  %v2825_v37 = vadd.f32 %v10405_v47, %v2811_v46  ;;  %v2823_v16 = vadd.f32 %v10408_v11, %v2809_v56  ;;  %v9217_v12 = vld [vmem:[#allocation8 + $0x4c] sm:$0xf0]  ;;  %v7831_v43 = vld [vmem:[#allocation8 + $0x240] sm:$0xf]  ;;  %v3186_v45 = vmax.f32 %v2671_v52, 0.0 }
 0x20d   :  { %v9249_v58 = vld [vmem:[#allocation8 + $0x14c] sm:$0xf0]  ;;  %v3178_v24 = vmax.f32 %v10116_v13, 0.0  ;;  %v7959_v40 = vld [vmem:[#allocation8 + $0x340] sm:$0xf]  ;;  %v7576_v59 = vor.u32 %v9217_v12, %v7575_v3 }
 0x20e   :  { %4042 = vmatpush.bf16.msra.mxu3 %v8024_v28  ;;  %4015 = vmatpush.bf16.msra.mxu1 %v7752_v53  ;;  %v10407_v28 = vld [vmem:[#allocation31_spill] sm:$0xff]  ;;  %v10409_v23 = vld [vmem:[#allocation30_spill] sm:$0xff]  ;;  %v10411_v39 = vld [vmem:[#allocation32_spill] sm:$0xff]  ;;  %v2837_v61 = vadd.f32 %v10412_v31, %v2823_v16  ;;  %v7704_v41 = vor.u32 %v9249_v58, %v7703_v22 }
 0x20f   :  { %v2741_v32 = vadd.f32 %v10407_v28, %v2727_v44  ;;  %v9281_v53 = vld [vmem:[#allocation8 + $0x24c] sm:$0xf0]  ;;  %v2753_v15 = vadd.f32 %v10409_v23, %v2739_v29  ;;  %v7559_v33 = vld [vmem:[#allocation8 + $0x20] sm:$0xf]  ;;  %v9235_v26 = vld [vmem:[#allocation8 + $0xe4] sm:$0xf] }
 0x210   :  { %4029 = vmatpush.bf16.msra.mxu2 %v7880_v35  ;;  %4002 = vmatpush.bf16.msra.mxu0 %v7608_v55  ;;  %v3185_v35 = vmax.f32 %v10113_v30, 0.0  ;;  %v9313_v63 = vld [vmem:[#allocation8 + $0x34c] sm:$0xf0]  ;;  %v7832_v38 = vor.u32 %v9281_v53, %v7831_v43  ;;  %v7687_v14 = vld [vmem:[#allocation8 + $0x120] sm:$0xf]  ;;  %v3180_v54 = vmax.f32 %v2837_v61, 0.0 }
 0x211   :  { %v2755_v48 = vadd.f32 %v10411_v39, %v2741_v32  ;;  %v9213_v44 = vld [vmem:[#allocation8 + $0x2c] sm:$0xf0]  ;;  %v7960_v56 = vor.u32 %v9313_v63, %v7959_v40  ;;  %v7815_v55 = vld [vmem:[#allocation8 + $0x220] sm:$0xf]  ;;  %v7657_v52 = vld [vmem:[#allocation8 + $0xf0] sm:$0xf0]  ;;  %v3193_v32 = vpack.c.bf16 %v3178_v24, %v3177_v27 }
 0x212   :  { %4043 = vmatpush.bf16.msra.mxu3 %v8008_v0  ;;  %4016 = vmatpush.bf16.msra.mxu1 %v7736_v7  ;;  %v10410_v0 = vld [vmem:[#allocation38_spill] sm:$0xff]  ;;  %v3179_v7 = vmax.f32 %v2753_v15, 0.0  ;;  %v7943_v4 = vld [vmem:[#allocation8 + $0x320] sm:$0xf]  ;;  %v3197_v20 = vpack.c.bf16 %v3186_v45, %v3185_v35  ;;  %v9267_v28 = vld [vmem:[#allocation8 + $0x1e4] sm:$0xf]  ;;  %v7660_v35 = vor.u32 %v9235_v26, %v7657_v52 }
 0x213   :  { %v2839_v10 = vadd.f32 %v10410_v0, %v2825_v37  ;;  %v9245_v62 = vld [vmem:[#allocation8 + $0x12c] sm:$0xf0]  ;;  %v3187_v5 = vmax.f32 %v2755_v48, 0.0  ;;  %v7543_v42 = vld [vmem:[#allocation8] sm:$0xf]  ;;  %v3344_v40 = vunpack.c.h.b16 %v3193_v32 }
 0x214   :  { %4030 = vmatpush.bf16.msra.mxu2 %v7864_v18  ;;  %4003 = vmatpush.bf16.msra.mxu0 %v7592_v9  ;;  %v9277_v46 = vld [vmem:[#allocation8 + $0x22c] sm:$0xf0]  ;;  %v7688_v51 = vor.u32 %v9245_v62, %v7687_v14  ;;  %v7671_v30 = vld [vmem:[#allocation8 + $0x100] sm:$0xf]  ;;  %v7785_v16 = vld [vmem:[#allocation8 + $0x1f0] sm:$0xf0]  ;;  %v3347_v58 = vunpack.c.l.b16 %v3197_v20  ;;  %v3348_v43 = vunpack.c.h.b16 %v3197_v20 }
 0x215   :  { %v3188_v18 = vmax.f32 %v2839_v10, 0.0  ;;  %v9309_v1 = vld [vmem:[#allocation8 + $0x32c] sm:$0xf0]  ;;  %v7816_v6 = vor.u32 %v9277_v46, %v7815_v55  ;;  %v7799_v13 = vld [vmem:[#allocation8 + $0x200] sm:$0xf]  ;;  %v7788_v8 = vor.u32 %v9267_v28, %v7785_v16  ;;  %v3343_v10 = vunpack.c.l.b16 %v3193_v32 }
 0x216   :  { %4044 = vmatpush.bf16.msra.mxu3 %v7992_v60  ;;  %4017 = vmatpush.bf16.msra.mxu1 %v7720_v34  ;;  %v7560_v60 = vor.u32 %v9213_v44, %v7559_v33  ;;  %v9209_v36 = vld [vmem:[#allocation8 + $0xc] sm:$0xf0]  ;;  %v7944_v29 = vor.u32 %v9309_v1, %v7943_v4  ;;  %v7927_v37 = vld [vmem:[#allocation8 + $0x300] sm:$0xf]  ;;  %v9299_v9 = vld [vmem:[#allocation8 + $0x2e4] sm:$0xf]  ;;  %v10133_v33 = vpack.c.b16 %v3348_v43, %v3344_v40 }
 0x217   :  { %v9241_v17 = vld [vmem:[#allocation8 + $0x10c] sm:$0xf0]  ;;  %v3198_v2 = vpack.c.bf16 %v3188_v18, %v3187_v5  ;;  %v7544_v11 = vor.u32 %v9209_v36, %v7543_v42  ;;  %v7913_v34 = vld [vmem:[#allocation8 + $0x2f0] sm:$0xf0]  ;;  %v9331_v22 = vld [vmem:[#allocation8 + $0x3e4] sm:$0xf] }
 0x218   :  { %4031 = vmatpush.bf16.msra.mxu2 %v7848_v49  ;;  %4004 = vmatpush.bf16.msra.mxu0 %v7576_v59  ;;  %v9273_v47 = vld [vmem:[#allocation8 + $0x20c] sm:$0xf0]  ;;  %v3194_v49 = vpack.c.bf16 %v3180_v54, %v3179_v7  ;;  %v7672_v3 = vor.u32 %v9241_v17, %v7671_v30  ;;  %v7916_v27 = vor.u32 %v9299_v9, %v7913_v34  ;;  %v9231_v24 = vld [vmem:[#allocation8 + $0xc4] sm:$0xf]  ;;  %v7641_v15 = vld [vmem:[#allocation8 + $0xd0] sm:$0xf0] }
 0x219   :  { %v9305_v21 = vld [vmem:[#allocation8 + $0x30c] sm:$0xf0]  ;;  %v7800_v12 = vor.u32 %v9273_v47, %v7799_v13  ;;  %v3349_v23 = vunpack.c.l.b16 %v3198_v2  ;;  %v9263_v0 = vld [vmem:[#allocation8 + $0x1c4] sm:$0xf]  ;;  %v3350_v63 = vunpack.c.h.b16 %v3198_v2  ;;  %v7769_v39 = vld [vmem:[#allocation8 + $0x1d0] sm:$0xf0]  ;;  %v7644_v14 = vor.u32 %v9231_v24, %v7641_v15 }
 0x21a   :  { %4045 = vmatpush.bf16.msra.mxu3 %v7976_v25  ;;  %4018 = vmatpush.bf16.msra.mxu1 %v7704_v41  ;;  %v8041_v25 = vld [vmem:[#allocation8 + $0x3f0] sm:$0xf0]  ;;  %v7928_v53 = vor.u32 %v9305_v21, %v7927_v37  ;;  %v9295_v48 = vld [vmem:[#allocation8 + $0x2c4] sm:$0xf]  ;;  %v3345_v61 = vunpack.c.l.b16 %v3194_v49  ;;  %v3346_v44 = vunpack.c.h.b16 %v3194_v49  ;;  %v7772_v62 = vor.u32 %v9263_v0, %v7769_v39 }
 0x21b   :  { %v8044_v45 = vor.u32 %v9331_v22, %v8041_v25  ;;  %v7897_v31 = vld [vmem:[#allocation8 + $0x2d0] sm:$0xf0]  ;;  %v9327_v59 = vld [vmem:[#allocation8 + $0x3c4] sm:$0xf] }
 0x21c   :  { %4032 = vmatpush.bf16.msra.mxu2 %v7832_v38  ;;  %4005 = vmatpush.bf16.msra.mxu0 %v7560_v60  ;;  %v8025_v41 = vld [vmem:[#allocation8 + $0x3d0] sm:$0xf0]  ;;  %v10131_v38 = vpack.c.b16 %v3347_v58, %v3343_v10  ;;  %v7900_v55 = vor.u32 %v9295_v48, %v7897_v31  ;;  %v9227_v46 = vld [vmem:[#allocation8 + $0xa4] sm:$0xf]  ;;  %v10137_v4 = vpack.c.b16 %v3350_v63, %v3346_v44 }
 0x21d   :  { %v7625_v7 = vld [vmem:[#allocation8 + $0xb0] sm:$0xf0]  ;;  %v9259_v18 = vld [vmem:[#allocation8 + $0x1a4] sm:$0xf]  ;;  %v8028_v1 = vor.u32 %v9327_v59, %v8025_v41 }
 0x21e   :  { %4046 = vmatpush.bf16.msra.mxu3 %v7960_v56  ;;  %4019 = vmatpush.bf16.msra.mxu1 %v7688_v51  ;;  %v10135_v56 = vpack.c.b16 %v3349_v23, %v3345_v61  ;;  %v7753_v5 = vld [vmem:[#allocation8 + $0x1b0] sm:$0xf0]  ;;  %v9291_v54 = vld [vmem:[#allocation8 + $0x2a4] sm:$0xf]  ;;  %v7628_v51 = vor.u32 %v9227_v46, %v7625_v7  ;;  %v10143_v46 = vpop.f32.mrf.mxu2 }
 0x21f   :  { %v7881_v60 = vld [vmem:[#allocation8 + $0x2b0] sm:$0xf0]  ;;  %v9323_v42 = vld [vmem:[#allocation8 + $0x3a4] sm:$0xf] }
 0x220   :  { %4033 = vmatpush.bf16.msra.mxu2 %v7816_v6  ;;  %4006 = vmatpush.bf16.msra.mxu0 %v7544_v11  ;;  %v8009_v36 = vld [vmem:[#allocation8 + $0x3b0] sm:$0xf0]  ;;  %v7756_v6 = vor.u32 %v9259_v18, %v7753_v5  ;;  %v7884_v30 = vor.u32 %v9291_v54, %v7881_v60  ;;  %v9223_v17 = vld [vmem:[#allocation8 + $0x84] sm:$0xf]  ;;  %v10145_v5 = vpop.f32.mrf.mxu3 }
 0x221   :  { %v7609_v13 = vld [vmem:[#allocation8 + $0x90] sm:$0xf0]  ;;  %v9255_v20 = vld [vmem:[#allocation8 + $0x184] sm:$0xf] }
 0x222   :  { %4047 = vmatpush.bf16.msra.mxu3 %v7944_v29  ;;  %4020 = vmatpush.bf16.msra.mxu1 %v7672_v3  ;;  %v8012_v29 = vor.u32 %v9323_v42, %v8009_v36  ;;  %v7737_v47 = vld [vmem:[#allocation8 + $0x190] sm:$0xf0]  ;;  %v9287_v37 = vld [vmem:[#allocation8 + $0x284] sm:$0xf]  ;;  %v7612_v52 = vor.u32 %v9223_v17, %v7609_v13 }
 0x223   :  { %4007 = vmatmul.bf16.vlgmr.msra.gmra.mxu0 %v10131_v38  ;;  %v7865_v21 = vld [vmem:[#allocation8 + $0x290] sm:$0xf0]  ;;  %v9319_v2 = vld [vmem:[#allocation8 + $0x384] sm:$0xf]  ;;  %v7740_v28 = vor.u32 %v9255_v20, %v7737_v47  ;;  %v7663_v20 = vld [vmem:[#allocation8 + $0xe8] sm:$0xf] }
 0x224   :  { %4034 = vmatpush.bf16.msra.mxu2 %v7800_v12  ;;  %4055 = vmatpush.bf16.msrb.mxu0 %v7660_v35  ;;  %v7993_v26 = vld [vmem:[#allocation8 + $0x390] sm:$0xf0]  ;;  %v7868_v32 = vor.u32 %v9287_v37, %v7865_v21  ;;  %v9219_v11 = vld [vmem:[#allocation8 + $0x64] sm:$0xf]  ;;  %v7791_v47 = vld [vmem:[#allocation8 + $0x1e8] sm:$0xf] }
 0x225   :  { %4021 = vmatmul.bf16.vlgmr.msra.gmra.mxu1 %v10133_v33  ;;  %v7593_v16 = vld [vmem:[#allocation8 + $0x70] sm:$0xf0]  ;;  %v9251_v9 = vld [vmem:[#allocation8 + $0x164] sm:$0xf]  ;;  %v7996_v34 = vor.u32 %v9319_v2, %v7993_v26  ;;  %v9270_v21 = vld [vmem:[#allocation8 + $0x1f4] sm:$0xf0] }
 0x226   :  { %4048 = vmatpush.bf16.msra.mxu3 %v7928_v53  ;;  %4069 = vmatpush.bf16.msrb.mxu1 %v7788_v8  ;;  %v7721_v49 = vld [vmem:[#allocation8 + $0x170] sm:$0xf0]  ;;  %v9283_v3 = vld [vmem:[#allocation8 + $0x264] sm:$0xf]  ;;  %v7596_v58 = vor.u32 %v9219_v11, %v7593_v16  ;;  %v7919_v2 = vld [vmem:[#allocation8 + $0x2e8] sm:$0xf] }
 0x227   :  { %4035 = vmatmul.bf16.vlgmr.msra.gmra.mxu2 %v10135_v56  ;;  %v7849_v12 = vld [vmem:[#allocation8 + $0x270] sm:$0xf0]  ;;  %v9315_v22 = vld [vmem:[#allocation8 + $0x364] sm:$0xf]  ;;  %v7724_v43 = vor.u32 %v9251_v9, %v7721_v49  ;;  %v9302_v26 = vld [vmem:[#allocation8 + $0x2f4] sm:$0xf0] }
 0x228   :  { %4083 = vmatpush.bf16.msrb.mxu2 %v7916_v27  ;;  %4056 = vmatpush.bf16.msrb.mxu0 %v7644_v14  ;;  %v7977_v25 = vld [vmem:[#allocation8 + $0x370] sm:$0xf0]  ;;  %v7852_v53 = vor.u32 %v9283_v3, %v7849_v12  ;;  %v9215_v35 = vld [vmem:[#allocation8 + $0x44] sm:$0xf]  ;;  %v9334_v11 = vld [vmem:[#allocation8 + $0x3f4] sm:$0xf0]  ;;  %v7920_v49 = vor.u32 %v9302_v26, %v7919_v2 }
 0x229   :  { %4049 = vmatmul.bf16.vlgmr.msra.gmra.mxu3 %v10137_v4  ;;  %v7577_v23 = vld [vmem:[#allocation8 + $0x50] sm:$0xf0]  ;;  %v9247_v8 = vld [vmem:[#allocation8 + $0x144] sm:$0xf]  ;;  %v7980_v27 = vor.u32 %v9315_v22, %v7977_v25  ;;  %v7647_v3 = vld [vmem:[#allocation8 + $0xc8] sm:$0xf]  ;;  %v10147_v25 = vpop.f32.mrf.mxu2 }
 0x22a   :  { %4097 = vmatpush.bf16.msrb.mxu3 %v8044_v45  ;;  %4070 = vmatpush.bf16.msrb.mxu1 %v7772_v62  ;;  %v7705_v24 = vld [vmem:[#allocation8 + $0x150] sm:$0xf0]  ;;  %v9279_v15 = vld [vmem:[#allocation8 + $0x244] sm:$0xf]  ;;  %v7580_v63 = vor.u32 %v9215_v35, %v7577_v23  ;;  %v9234_v12 = vld [vmem:[#allocation8 + $0xd4] sm:$0xf0]  ;;  %v10149_v23 = vpop.f32.mrf.mxu3 }
 0x22b   :  { %v7833_v0 = vld [vmem:[#allocation8 + $0x250] sm:$0xf0]  ;;  %v9311_v10 = vld [vmem:[#allocation8 + $0x344] sm:$0xf]  ;;  %v7708_v45 = vor.u32 %v9247_v8, %v7705_v24  ;;  %v7775_v22 = vld [vmem:[#allocation8 + $0x1c8] sm:$0xf]  ;;  %v7648_v24 = vor.u32 %v9234_v12, %v7647_v3 }
 0x22c   :  { %4084 = vmatpush.bf16.msrb.mxu2 %v7900_v55  ;;  %4057 = vmatpush.bf16.msrb.mxu0 %v7628_v51  ;;  %v7961_v40 = vld [vmem:[#allocation8 + $0x350] sm:$0xf0]  ;;  %v7836_v39 = vor.u32 %v9279_v15, %v7833_v0  ;;  %v9211_v48 = vld [vmem:[#allocation8 + $0x24] sm:$0xf]  ;;  %v9298_v35 = vld [vmem:[#allocation8 + $0x2d4] sm:$0xf0] }
 0x22d   :  { %v7561_v31 = vld [vmem:[#allocation8 + $0x30] sm:$0xf0]  ;;  %v9243_v61 = vld [vmem:[#allocation8 + $0x124] sm:$0xf]  ;;  %v7964_v59 = vor.u32 %v9311_v10, %v7961_v40  ;;  %v8031_v8 = vld [vmem:[#allocation8 + $0x3c8] sm:$0xf] }
 0x22e   :  { %4098 = vmatpush.bf16.msrb.mxu3 %v8028_v1  ;;  %4071 = vmatpush.bf16.msrb.mxu1 %v7756_v6  ;;  %v7689_v41 = vld [vmem:[#allocation8 + $0x130] sm:$0xf0]  ;;  %v9275_v44 = vld [vmem:[#allocation8 + $0x224] sm:$0xf]  ;;  %v7564_v7 = vor.u32 %v9211_v48, %v7561_v31  ;;  %v7631_v10 = vld [vmem:[#allocation8 + $0xa8] sm:$0xf] }
 0x22f   :  { %v7817_v14 = vld [vmem:[#allocation8 + $0x230] sm:$0xf0]  ;;  %v9307_v62 = vld [vmem:[#allocation8 + $0x324] sm:$0xf]  ;;  %v7692_v54 = vor.u32 %v9243_v61, %v7689_v41  ;;  %v9230_v40 = vld [vmem:[#allocation8 + $0xb4] sm:$0xf0]  ;;  %v10152_v61 = vpop.f32.mrf.mxu0 }
 0x230   :  { %4085 = vmatpush.bf16.msrb.mxu2 %v7884_v30  ;;  %4058 = vmatpush.bf16.msrb.mxu0 %v7612_v52  ;;  %v7945_v55 = vld [vmem:[#allocation8 + $0x330] sm:$0xf0]  ;;  %v9207_v18 = vld [vmem:[#allocation8 + $0x4] sm:$0xf]  ;;  %v7820_v60 = vor.u32 %v9275_v44, %v7817_v14  ;;  %v7887_v48 = vld [vmem:[#allocation8 + $0x2a8] sm:$0xf]  ;;  %v10156_v44 = vpop.f32.mrf.mxu1  ;;  %v7632_v14 = vor.u32 %v9230_v40, %v7631_v10 }
 0x231   :  { %v7545_v1 = vld [vmem:[#allocation8 + $0x10] sm:$0xf0]  ;;  %v9239_v42 = vld [vmem:[#allocation8 + $0x104] sm:$0xf]  ;;  %v7948_v6 = vor.u32 %v9307_v62, %v7945_v55  ;;  %v9294_v31 = vld [vmem:[#allocation8 + $0x2b4] sm:$0xf0] }
 0x232   :  { %4099 = vmatpush.bf16.msrb.mxu3 %v8012_v29  ;;  %4072 = vmatpush.bf16.msrb.mxu1 %v7740_v28  ;;  %v7673_v36 = vld [vmem:[#allocation8 + $0x110] sm:$0xf0]  ;;  %v9271_v51 = vld [vmem:[#allocation8 + $0x204] sm:$0xf]  ;;  %v9238_v29 = vld [vmem:[#allocation8 + $0xf4] sm:$0xf0]  ;;  %v7548_v37 = vor.u32 %v9207_v18, %v7545_v1  ;;  %v7888_v55 = vor.u32 %v9294_v31, %v7887_v48 }
 0x233   :  { %v7801_v30 = vld [vmem:[#allocation8 + $0x210] sm:$0xf0]  ;;  %v9303_v17 = vld [vmem:[#allocation8 + $0x304] sm:$0xf]  ;;  %v7676_v52 = vor.u32 %v9239_v42, %v7673_v36  ;;  %v7664_v9 = vor.u32 %v9238_v29, %v7663_v20  ;;  %v9326_v41 = vld [vmem:[#allocation8 + $0x3b4] sm:$0xf0] }
 0x234   :  { %4086 = vmatpush.bf16.msrb.mxu2 %v7868_v32  ;;  %4059 = vmatpush.bf16.msrb.mxu0 %v7596_v58  ;;  %v7929_v13 = vld [vmem:[#allocation8 + $0x310] sm:$0xf0]  ;;  %v7804_v28 = vor.u32 %v9271_v51, %v7801_v30  ;;  %v8047_v32 = vld [vmem:[#allocation8 + $0x3e8] sm:$0xf]  ;;  %v9226_v18 = vld [vmem:[#allocation8 + $0x94] sm:$0xf0]  ;;  %v10159_v30 = vpop.f32.mrf.mxu2 }
 0x235   :  { %v7932_v16 = vor.u32 %v9303_v17, %v7929_v13  ;;  %v8048_v58 = vor.u32 %v9334_v11, %v8047_v32  ;;  %v7743_v1 = vld [vmem:[#allocation8 + $0x188] sm:$0xf]  ;;  %v9290_v36 = vld [vmem:[#allocation8 + $0x294] sm:$0xf0]  ;;  %v10161_v13 = vpop.f32.mrf.mxu3 }
 0x236   :  { %4100 = vmatpush.bf16.msrb.mxu3 %v7996_v34  ;;  %4073 = vmatpush.bf16.msrb.mxu1 %v7724_v43  ;;  %v7792_v34 = vor.u32 %v9270_v21, %v7791_v47  ;;  %v9266_v43 = vld [vmem:[#allocation8 + $0x1d4] sm:$0xf0]  ;;  %v7871_v42 = vld [vmem:[#allocation8 + $0x288] sm:$0xf] }
 0x237   :  { %v7776_v15 = vor.u32 %v9266_v43, %v7775_v22  ;;  %v7999_v51 = vld [vmem:[#allocation8 + $0x388] sm:$0xf]  ;;  %v7872_v29 = vor.u32 %v9290_v36, %v7871_v42  ;;  %v9254_v26 = vld [vmem:[#allocation8 + $0x174] sm:$0xf0]  ;;  %v10163_v32 = vpop.f32.mrf.mxu0 }
 0x238   :  { %4087 = vmatpush.bf16.msrb.mxu2 %v7852_v53  ;;  %4060 = vmatpush.bf16.msrb.mxu0 %v7580_v63  ;;  %v7903_v53 = vld [vmem:[#allocation8 + $0x2c8] sm:$0xf]  ;;  %v9218_v22 = vld [vmem:[#allocation8 + $0x54] sm:$0xf0] }
 0x239   :  { %v7904_v0 = vor.u32 %v9298_v35, %v7903_v53  ;;  %v7759_v63 = vld [vmem:[#allocation8 + $0x1a8] sm:$0xf]  ;;  %v9250_v53 = vld [vmem:[#allocation8 + $0x154] sm:$0xf0] }
 0x23a   :  { %4101 = vmatpush.bf16.msrb.mxu3 %v7980_v27  ;;  %4074 = vmatpush.bf16.msrb.mxu1 %v7708_v45  ;;  %v9330_v27 = vld [vmem:[#allocation8 + $0x3d4] sm:$0xf0]  ;;  %v7599_v47 = vld [vmem:[#allocation8 + $0x68] sm:$0xf] }
 0x23b   :  { %v8032_v45 = vor.u32 %v9330_v27, %v8031_v8  ;;  %v7727_v21 = vld [vmem:[#allocation8 + $0x168] sm:$0xf]  ;;  %v9282_v8 = vld [vmem:[#allocation8 + $0x254] sm:$0xf0] }
 0x23c   :  { %4088 = vmatpush.bf16.msrb.mxu2 %v7836_v39  ;;  %4061 = vmatpush.bf16.msrb.mxu0 %v7564_v7  ;;  %v9262_v39 = vld [vmem:[#allocation8 + $0x1b4] sm:$0xf0]  ;;  %v7615_v7 = vld [vmem:[#allocation8 + $0x88] sm:$0xf] }
 0x23d   :  { %v7760_v62 = vor.u32 %v9262_v39, %v7759_v63  ;;  %v7616_v17 = vor.u32 %v9226_v18, %v7615_v7  ;;  %v7983_v11 = vld [vmem:[#allocation8 + $0x368] sm:$0xf]  ;;  %v9214_v63 = vld [vmem:[#allocation8 + $0x34] sm:$0xf0]  ;;  %v10167_v39 = vpop.f32.mrf.mxu2 }
 0x23e   :  { %4102 = vmatpush.bf16.msrb.mxu3 %v7964_v59  ;;  %4075 = vmatpush.bf16.msrb.mxu1 %v7692_v54  ;;  %v8015_v59 = vld [vmem:[#allocation8 + $0x3a8] sm:$0xf]  ;;  %v9246_v31 = vld [vmem:[#allocation8 + $0x134] sm:$0xf0] }
 0x23f   :  { %v8016_v54 = vor.u32 %v9326_v41, %v8015_v59  ;;  %v7583_v12 = vld [vmem:[#allocation8 + $0x48] sm:$0xf]  ;;  %v9278_v41 = vld [vmem:[#allocation8 + $0x234] sm:$0xf0] }
 0x240   :  { %4089 = vmatpush.bf16.msrb.mxu2 %v7820_v60  ;;  %4062 = vmatpush.bf16.msrb.mxu0 %v7548_v37  ;;  %v9258_v60 = vld [vmem:[#allocation8 + $0x194] sm:$0xf0]  ;;  %v7839_v35 = vld [vmem:[#allocation8 + $0x248] sm:$0xf] }
 0x241   :  { %v7744_v20 = vor.u32 %v9258_v60, %v7743_v1  ;;  %v9222_v37 = vld [vmem:[#allocation8 + $0x74] sm:$0xf0]  ;;  %v7967_v27 = vld [vmem:[#allocation8 + $0x348] sm:$0xf]  ;;  %v7840_v10 = vor.u32 %v9282_v8, %v7839_v35  ;;  %v9232_v35 = vld [vmem:[#allocation8 + $0xcc] sm:$0xf] }
 0x242   :  { %4103 = vmatpush.bf16.msrb.mxu3 %v7948_v6  ;;  %4076 = vmatpush.bf16.msrb.mxu1 %v7676_v52  ;;  %v9322_v6 = vld [vmem:[#allocation8 + $0x394] sm:$0xf0]  ;;  %v7855_v52 = vld [vmem:[#allocation8 + $0x268] sm:$0xf]  ;;  %v7649_v8 = vld [vmem:[#allocation8 + $0xd8] sm:$0xf0] }
 0x243   :  { %4063 = vmatmul.bf16.vlgmr.msrb.gmra.mxu0 %v10131_v38  ;;  %v8000_v2 = vor.u32 %v9322_v6, %v7999_v51  ;;  %v7567_v40 = vld [vmem:[#allocation8 + $0x28] sm:$0xf]  ;;  %v9210_v1 = vld [vmem:[#allocation8 + $0x14] sm:$0xf0] }
 0x244   :  { %4090 = vmatpush.bf16.msrb.mxu2 %v7804_v28  ;;  %4111 = vmatpush.bf16.msra.mxu0 %v7664_v9  ;;  %v9286_v28 = vld [vmem:[#allocation8 + $0x274] sm:$0xf0]  ;;  %v10165_v9 = vpop.f32.mrf.mxu1  ;;  %v7823_v59 = vld [vmem:[#allocation8 + $0x228] sm:$0xf]  ;;  %v7568_v7 = vor.u32 %v9214_v63, %v7567_v40  ;;  %v7905_v40 = vld [vmem:[#allocation8 + $0x2d8] sm:$0xf0] }
 0x245   :  { %4077 = vmatmul.bf16.vlgmr.msrb.gmra.mxu1 %v10133_v33  ;;  %v7856_v3 = vor.u32 %v9286_v28, %v7855_v52  ;;  %v7551_v18 = vld [vmem:[#allocation8 + $0x8] sm:$0xf]  ;;  %v7824_v42 = vor.u32 %v9278_v41, %v7823_v59  ;;  %v9242_v51 = vld [vmem:[#allocation8 + $0x114] sm:$0xf0]  ;;  %v7793_v28 = vld [vmem:[#allocation8 + $0x1f8] sm:$0xf0]  ;;  %v7652_v41 = vor.u32 %v9232_v35, %v7649_v8 }
 0x246   :  { %4104 = vmatpush.bf16.msrb.mxu3 %v7932_v16  ;;  %4125 = vmatpush.bf16.msra.mxu1 %v7792_v34  ;;  %v9318_v16 = vld [vmem:[#allocation8 + $0x374] sm:$0xf0]  ;;  %v7600_v34 = vor.u32 %v9222_v37, %v7599_v47  ;;  %v7679_v36 = vld [vmem:[#allocation8 + $0x108] sm:$0xf]  ;;  %v7552_v52 = vor.u32 %v9210_v1, %v7551_v18  ;;  %v7633_v18 = vld [vmem:[#allocation8 + $0xb8] sm:$0xf0] }
 0x247   :  { %4091 = vmatmul.bf16.vlgmr.msrb.gmra.mxu2 %v10135_v56  ;;  %v7984_v43 = vor.u32 %v9318_v16, %v7983_v11  ;;  %v7807_v6 = vld [vmem:[#allocation8 + $0x208] sm:$0xf]  ;;  %v9306_v37 = vld [vmem:[#allocation8 + $0x314] sm:$0xf0]  ;;  %v9300_v11 = vld [vmem:[#allocation8 + $0x2ec] sm:$0xf] }
 0x248   :  { %4139 = vmatpush.bf16.msra.mxu2 %v7920_v49  ;;  %4112 = vmatpush.bf16.msra.mxu0 %v7648_v24  ;;  %v7728_v49 = vor.u32 %v9254_v26, %v7727_v21  ;;  %v9314_v24 = vld [vmem:[#allocation8 + $0x354] sm:$0xf0]  ;;  %v7935_v47 = vld [vmem:[#allocation8 + $0x308] sm:$0xf]  ;;  %v9236_v21 = vld [vmem:[#allocation8 + $0xec] sm:$0xf] }
 0x249   :  { %4105 = vmatmul.bf16.vlgmr.msrb.gmra.mxu3 %v10137_v4  ;;  %v7968_v48 = vor.u32 %v9314_v24, %v7967_v27  ;;  %v9268_v26 = vld [vmem:[#allocation8 + $0x1ec] sm:$0xf]  ;;  %v7921_v16 = vld [vmem:[#allocation8 + $0x2f8] sm:$0xf0]  ;;  %v10175_v24 = vpop.f32.mrf.mxu2 }
 0x24a   :  { %4153 = vmatpush.bf16.msra.mxu3 %v8048_v58  ;;  %4126 = vmatpush.bf16.msra.mxu1 %v7776_v15  ;;  %v7711_v58 = vld [vmem:[#allocation8 + $0x148] sm:$0xf]  ;;  %v7584_v15 = vor.u32 %v9218_v22, %v7583_v12  ;;  %v8049_v12 = vld [vmem:[#allocation8 + $0x3f8] sm:$0xf0]  ;;  %v7936_v22 = vor.u32 %v9306_v37, %v7935_v47  ;;  %v9264_v27 = vld [vmem:[#allocation8 + $0x1cc] sm:$0xf] }
 0x24b   :  { %v9260_v1 = vld [vmem:[#allocation8 + $0x1ac] sm:$0xf]  ;;  %v7601_v8 = vld [vmem:[#allocation8 + $0x78] sm:$0xf0] }
 0x24c   :  { %4140 = vmatpush.bf16.msra.mxu2 %v7904_v0  ;;  %4113 = vmatpush.bf16.msra.mxu0 %v7632_v14  ;;  %v7712_v0 = vor.u32 %v9250_v53, %v7711_v58  ;;  %v10169_v14 = vpop.f32.mrf.mxu3  ;;  %v7924_v53 = vor.u32 %v9300_v11, %v7921_v16  ;;  %v7745_v11 = vld [vmem:[#allocation8 + $0x198] sm:$0xf0]  ;;  %v9288_v16 = vld [vmem:[#allocation8 + $0x28c] sm:$0xf] }
 0x24d   :  { %v9220_v35 = vld [vmem:[#allocation8 + $0x6c] sm:$0xf] }
 0x24e   :  { %4154 = vmatpush.bf16.msra.mxu3 %v8032_v45  ;;  %4127 = vmatpush.bf16.msra.mxu1 %v7760_v62  ;;  %v7695_v45 = vld [vmem:[#allocation8 + $0x128] sm:$0xf] }
 0x24f   :  { %v7951_v62 = vld [vmem:[#allocation8 + $0x328] sm:$0xf]  ;;  %v7696_v60 = vor.u32 %v9246_v31, %v7695_v45  ;;  %v8033_v31 = vld [vmem:[#allocation8 + $0x3d8] sm:$0xf0] }
 0x250   :  { %4141 = vmatpush.bf16.msra.mxu2 %v7888_v55  ;;  %4114 = vmatpush.bf16.msra.mxu0 %v7616_v17  ;;  %v9310_v55 = vld [vmem:[#allocation8 + $0x334] sm:$0xf0]  ;;  %v10173_v17 = vpop.f32.mrf.mxu1 }
 0x252   :  { %4155 = vmatpush.bf16.msra.mxu3 %v8016_v54  ;;  %4128 = vmatpush.bf16.msra.mxu1 %v7744_v20  ;;  %v10171_v54 = vpop.f32.mrf.mxu0  ;;  %v7952_v20 = vor.u32 %v9310_v55, %v7951_v62 }
 0x254   :  { %4142 = vmatpush.bf16.msra.mxu2 %v7872_v29  ;;  %4115 = vmatpush.bf16.msra.mxu0 %v7600_v34  ;;  %v9274_v29 = vld [vmem:[#allocation8 + $0x214] sm:$0xf0]  ;;  %v7680_v34 = vor.u32 %v9242_v51, %v7679_v36  ;;  %v10177_v63 = vpop.f32.mrf.mxu3  ;;  %v9292_v36 = vld [vmem:[#allocation8 + $0x2ac] sm:$0xf]  ;;  %v7889_v51 = vld [vmem:[#allocation8 + $0x2b8] sm:$0xf0] }
 0x255   :  { %v7892_v37 = vor.u32 %v9292_v36, %v7889_v51  ;;  %v7713_v36 = vld [vmem:[#allocation8 + $0x158] sm:$0xf0]  ;;  %v9280_v51 = vld [vmem:[#allocation8 + $0x24c] sm:$0xf] }
 0x256   :  { %4156 = vmatpush.bf16.msra.mxu3 %v8000_v2  ;;  %4129 = vmatpush.bf16.msra.mxu1 %v7728_v49  ;;  %v7665_v2 = vld [vmem:[#allocation8 + $0xf8] sm:$0xf0]  ;;  %v7808_v49 = vor.u32 %v9274_v29, %v7807_v6  ;;  %v9324_v6 = vld [vmem:[#allocation8 + $0x3ac] sm:$0xf] }
 0x257   :  { %v7668_v58 = vor.u32 %v9236_v21, %v7665_v2  ;;  %v9224_v21 = vld [vmem:[#allocation8 + $0x8c] sm:$0xf]  ;;  %v7617_v2 = vld [vmem:[#allocation8 + $0x98] sm:$0xf0] }
 0x258   :  { %4143 = vmatpush.bf16.msra.mxu2 %v7856_v3  ;;  %4116 = vmatpush.bf16.msra.mxu0 %v7584_v15  ;;  %v9332_v3 = vld [vmem:[#allocation8 + $0x3ec] sm:$0xf]  ;;  %v10181_v59 = vpop.f32.mrf.mxu1 }
 0x259   :  { %v8052_v15 = vor.u32 %v9332_v3, %v8049_v12  ;;  %v9320_v3 = vld [vmem:[#allocation8 + $0x38c] sm:$0xf]  ;;  %v8001_v12 = vld [vmem:[#allocation8 + $0x398] sm:$0xf0] }
 0x25a   :  { %4157 = vmatpush.bf16.msra.mxu3 %v7984_v43  ;;  %4130 = vmatpush.bf16.msra.mxu1 %v7712_v0  ;;  %v7796_v43 = vor.u32 %v9268_v26, %v7793_v28  ;;  %v7777_v0 = vld [vmem:[#allocation8 + $0x1d8] sm:$0xf0]  ;;  %v10179_v45 = vpop.f32.mrf.mxu0  ;;  %v9256_v26 = vld [vmem:[#allocation8 + $0x18c] sm:$0xf] }
 0x25b   :  { %v7780_v62 = vor.u32 %v9264_v27, %v7777_v0  ;;  %v9252_v27 = vld [vmem:[#allocation8 + $0x16c] sm:$0xf]  ;;  %v8004_v0 = vor.u32 %v9320_v3, %v8001_v12 }
 0x25c   :  { %4144 = vmatpush.bf16.msra.mxu2 %v7840_v10  ;;  %4117 = vmatpush.bf16.msra.mxu0 %v7568_v7  ;;  %v9296_v10 = vld [vmem:[#allocation8 + $0x2cc] sm:$0xf] }
 0x25d   :  { %v7908_v55 = vor.u32 %v9296_v10, %v7905_v40  ;;  %v9228_v7 = vld [vmem:[#allocation8 + $0xac] sm:$0xf]  ;;  %v7729_v10 = vld [vmem:[#allocation8 + $0x178] sm:$0xf0] }
 0x25e   :  { %4158 = vmatpush.bf16.msra.mxu3 %v7968_v48  ;;  %4131 = vmatpush.bf16.msra.mxu1 %v7696_v60  ;;  %v9328_v48 = vld [vmem:[#allocation8 + $0x3cc] sm:$0xf]  ;;  %v7636_v29 = vor.u32 %v9228_v7, %v7633_v18 }
 0x25f   :  { %v8036_v60 = vor.u32 %v9328_v48, %v8033_v31  ;;  %v9284_v40 = vld [vmem:[#allocation8 + $0x26c] sm:$0xf]  ;;  %v7857_v48 = vld [vmem:[#allocation8 + $0x278] sm:$0xf0] }
 0x260   :  { %4145 = vmatpush.bf16.msra.mxu2 %v7824_v42  ;;  %4118 = vmatpush.bf16.msra.mxu0 %v7552_v52  ;;  %v7761_v42 = vld [vmem:[#allocation8 + $0x1b8] sm:$0xf0]  ;;  %v10187_v52 = vpop.f32.mrf.mxu2  ;;  %v9316_v31 = vld [vmem:[#allocation8 + $0x36c] sm:$0xf]  ;;  %v7860_v7 = vor.u32 %v9284_v40, %v7857_v48 }
 0x261   :  { %v7764_v47 = vor.u32 %v9260_v1, %v7761_v42  ;;  %v9216_v18 = vld [vmem:[#allocation8 + $0x4c] sm:$0xf]  ;;  %v7585_v1 = vld [vmem:[#allocation8 + $0x58] sm:$0xf0] }
 0x262   :  { %4159 = vmatpush.bf16.msra.mxu3 %v7952_v20  ;;  %4132 = vmatpush.bf16.msra.mxu1 %v7680_v34  ;;  %v8017_v20 = vld [vmem:[#allocation8 + $0x3b8] sm:$0xf0]  ;;  %v9244_v3 = vld [vmem:[#allocation8 + $0x12c] sm:$0xf] }
 0x263   :  { %4119 = vmatmul.bf16.vlgmr.msra.gmra.mxu0 %v10131_v38  ;;  %v8020_v28 = vor.u32 %v9324_v6, %v8017_v20  ;;  %v7873_v34 = vld [vmem:[#allocation8 + $0x298] sm:$0xf0]  ;;  %v9312_v20 = vld [vmem:[#allocation8 + $0x34c] sm:$0xf] }
 0x264   :  { %4146 = vmatpush.bf16.msra.mxu2 %v7808_v49  ;;  %4167 = vmatpush.bf16.msrb.mxu0 %v7668_v58  ;;  %v10189_v49 = vpop.f32.mrf.mxu3  ;;  %v10191_v58 = vpop.f32.mrf.mxu0  ;;  %v7841_v6 = vld [vmem:[#allocation8 + $0x258] sm:$0xf0] }
 0x265   :  { %4133 = vmatmul.bf16.vlgmr.msra.gmra.mxu1 %v10133_v33 }
 0x266   :  { %4160 = vmatpush.bf16.msra.mxu3 %v7936_v22  ;;  %4181 = vmatpush.bf16.msrb.mxu1 %v7796_v43  ;;  %v7620_v22 = vor.u32 %v9224_v21, %v7617_v2  ;;  %v7748_v43 = vor.u32 %v9256_v26, %v7745_v11  ;;  %v7588_v2 = vor.u32 %v9216_v18, %v7585_v1  ;;  %v9240_v1 = vld [vmem:[#allocation8 + $0x10c] sm:$0xf] }
 0x267   :  { %4147 = vmatmul.bf16.vlgmr.msra.gmra.mxu2 %v10135_v56  ;;  %v7844_v11 = vor.u32 %v9280_v51, %v7841_v6  ;;  %v9304_v6 = vld [vmem:[#allocation8 + $0x30c] sm:$0xf] }
 0x268   :  { %4195 = vmatpush.bf16.msrb.mxu2 %v7924_v53  ;;  %4168 = vmatpush.bf16.msrb.mxu0 %v7652_v41  ;;  %v7876_v53 = vor.u32 %v9288_v16, %v7873_v34  ;;  %v7985_v41 = vld [vmem:[#allocation8 + $0x378] sm:$0xf0]  ;;  %v10198_v21 = vpop.f32.mrf.mxu2  ;;  %v9212_v16 = vld [vmem:[#allocation8 + $0x2c] sm:$0xf] }
 0x269   :  { %4161 = vmatmul.bf16.vlgmr.msra.gmra.mxu3 %v10137_v4  ;;  %v7988_v42 = vor.u32 %v9316_v31, %v7985_v41  ;;  %v7569_v34 = vld [vmem:[#allocation8 + $0x38] sm:$0xf0] }
 0x26a   :  { %4209 = vmatpush.bf16.msrb.mxu3 %v8052_v15  ;;  %4182 = vmatpush.bf16.msrb.mxu1 %v7780_v62  ;;  %v10193_v15 = vpop.f32.mrf.mxu1  ;;  %v7604_v62 = vor.u32 %v9220_v35, %v7601_v8  ;;  %v9308_v8 = vld [vmem:[#allocation8 + $0x32c] sm:$0xf]  ;;  %v7572_v41 = vor.u32 %v9212_v16, %v7569_v34  ;;  %v9397_v34 = vld [vmem:[#allocation11 + $0x1ec] sm:$0xf0] }
 0x26c   :  { %4196 = vmatpush.bf16.msrb.mxu2 %v7908_v55  ;;  %4169 = vmatpush.bf16.msrb.mxu0 %v7636_v29  ;;  %v7732_v55 = vor.u32 %v9252_v27, %v7729_v10  ;;  %v7969_v29 = vld [vmem:[#allocation8 + $0x358] sm:$0xf0]  ;;  %v10200_v26 = vpop.f32.mrf.mxu3  ;;  %v10202_v35 = vpop.f32.mrf.mxu0 }
 0x26d   :  { %v7972_v12 = vor.u32 %v9312_v20, %v7969_v29  ;;  %v7953_v27 = vld [vmem:[#allocation8 + $0x338] sm:$0xf0]  ;;  %v8167_v29 = vld [vmem:[#allocation11 + $0xe0] sm:$0xf] }
 0x26e   :  { %4210 = vmatpush.bf16.msrb.mxu3 %v8036_v60  ;;  %4183 = vmatpush.bf16.msrb.mxu1 %v7764_v47  ;;  %v9248_v60 = vld [vmem:[#allocation8 + $0x14c] sm:$0xf]  ;;  %v10195_v47 = vld [vmem:[#allocation7] sm:$0xff]  ;;  %v7956_v51 = vor.u32 %v9308_v8, %v7953_v27  ;;  %v8551_v8 = vld [vmem:[#allocation11 + $0x3e0] sm:$0xf] }
 0x26f   :  { %v575_v48 = vperm.slane %v10195_v47, 6  ;;  %v7937_v20 = vld [vmem:[#allocation8 + $0x318] sm:$0xf0]  ;;  %v9461_v27 = vld [vmem:[#allocation11 + $0x3ec] sm:$0xf0] }
 0x270   :  { %4197 = vmatpush.bf16.msrb.mxu2 %v7892_v37  ;;  %4170 = vmatpush.bf16.msrb.mxu0 %v7620_v22  ;;  %v574_v37 = vperm.slane %v10195_v47, 5  ;;  %v7697_v22 = vld [vmem:[#allocation8 + $0x138] sm:$0xf0] }
 0x272   :  { %4211 = vmatpush.bf16.msrb.mxu3 %v8020_v28  ;;  %4184 = vmatpush.bf16.msrb.mxu1 %v7748_v43  ;;  %v7716_v28 = vor.u32 %v9248_v60, %v7713_v36  ;;  %v9276_v43 = vld [vmem:[#allocation8 + $0x22c] sm:$0xf]  ;;  %v10208_v31 = vpop.f32.mrf.mxu1  ;;  %v7681_v60 = vld [vmem:[#allocation8 + $0x118] sm:$0xf0]  ;;  %v2935_v36 = vadd.f32 %v10147_v25, %v574_v37  ;;  %v3019_v25 = vadd.f32 %v10179_v45, %v575_v48 }
 0x273   :  { %10415 = vst [vmem:[#allocation28_spill] sm:$0xff] %v10208_v31  ;;  %v8279_v31 = vld [vmem:[#allocation11 + $0x1c0] sm:$0xf] }
 0x274   :  { %4198 = vmatpush.bf16.msrb.mxu2 %v7876_v53  ;;  %4171 = vmatpush.bf16.msrb.mxu0 %v7604_v62  ;;  %v7825_v53 = vld [vmem:[#allocation8 + $0x238] sm:$0xf0]  ;;  %v9208_v62 = vld [vmem:[#allocation8 + $0xc] sm:$0xf]  ;;  %v2949_v19 = vadd.f32 %v10149_v23, %v2935_v36  ;;  %v3033_v23 = vadd.f32 %v10181_v59, %v3019_v25  ;;  %v3021_v36 = vadd.f32 %v10191_v58, %v575_v48  ;;  %v8135_v48 = vld [vmem:[#allocation11 + $0xa0] sm:$0xf] }
 0x275   :  { %v7828_v18 = vor.u32 %v9276_v43, %v7825_v53  ;;  %v3102_v43 = vpop.f32.mrf.mxu2 }
 0x276   :  { %4212 = vmatpush.bf16.msrb.mxu3 %v8004_v0  ;;  %4185 = vmatpush.bf16.msrb.mxu1 %v7732_v55  ;;  %v10413_v0 = vld [vmem:[#allocation36_spill] sm:$0xff] }
 0x277   :  { %v10414_v10 = vperm.slane %v10413_v0, 4  ;;  %v7553_v55 = vld [vmem:[#allocation8 + $0x18] sm:$0xf0]  ;;  %v9365_v0 = vld [vmem:[#allocation11 + $0xec] sm:$0xf0] }
 0x278   :  { %4199 = vmatpush.bf16.msrb.mxu2 %v7860_v7  ;;  %4172 = vmatpush.bf16.msrb.mxu0 %v7588_v2  ;;  %v7700_v7 = vor.u32 %v9244_v3, %v7697_v22  ;;  %v8295_v2 = vld [vmem:[#allocation11 + $0x1e0] sm:$0xf]  ;;  %v9429_v22 = vld [vmem:[#allocation11 + $0x2ec] sm:$0xf0] }
 0x279   :  { %v2853_v40 = vadd.f32 %v10079_v57, %v10414_v10  ;;  %v7809_v57 = vld [vmem:[#allocation8 + $0x218] sm:$0xf0]  ;;  %v8423_v3 = vld [vmem:[#allocation11 + $0x2e0] sm:$0xf]  ;;  %v3116_v10 = vpop.f32.mrf.mxu3 }
 0x27a   :  { %4213 = vmatpush.bf16.msrb.mxu3 %v7988_v42  ;;  %4186 = vmatpush.bf16.msrb.mxu1 %v7716_v28  ;;  %v9272_v42 = vld [vmem:[#allocation8 + $0x20c] sm:$0xf]  ;;  %v2937_v28 = vadd.f32 %v10159_v30, %v574_v37  ;;  %v8168_v30 = vor.u32 %v9365_v0, %v8167_v29  ;;  %v576_v37 = vperm.slane %v10195_v47, 7  ;;  %v9357_v0 = vld [vmem:[#allocation11 + $0xac] sm:$0xf0] }
 0x27b   :  { %v2867_v16 = vadd.f32 %v10085_v50, %v2853_v40  ;;  %v7812_v53 = vor.u32 %v9272_v42, %v7809_v57  ;;  %v7940_v50 = vor.u32 %v9304_v6, %v7937_v20  ;;  %v8296_v40 = vor.u32 %v9397_v34, %v8295_v2  ;;  %v8535_v57 = vld [vmem:[#allocation11 + $0x3c0] sm:$0xf]  ;;  %v9457_v6 = vld [vmem:[#allocation11 + $0x3cc] sm:$0xf0] }
 0x27c   :  { %4200 = vmatpush.bf16.msrb.mxu2 %v7844_v11  ;;  %4173 = vmatpush.bf16.msrb.mxu0 %v7572_v41  ;;  %v7556_v11 = vor.u32 %v9208_v62, %v7553_v55  ;;  %v8424_v41 = vor.u32 %v9429_v22, %v8423_v3  ;;  %v8151_v62 = vld [vmem:[#allocation11 + $0xc0] sm:$0xf]  ;;  %v9361_v55 = vld [vmem:[#allocation11 + $0xcc] sm:$0xf0]  ;;  %v2951_v45 = vadd.f32 %v10161_v13, %v2937_v28  ;;  %v10223_v13 = vpop.f32.mrf.mxu1 }
 0x27d   :  { %v2881_v42 = vadd.f32 %v10143_v46, %v2867_v16  ;;  %v2963_v20 = vadd.f32 %v10163_v32, %v2949_v19  ;;  %v3103_v29 = vadd.f32 %v3102_v43, %v576_v37  ;;  %v8152_v46 = vor.u32 %v9361_v55, %v8151_v62  ;;  %v8263_v2 = vld [vmem:[#allocation11 + $0x1a0] sm:$0xf]  ;;  %v9389_v32 = vld [vmem:[#allocation11 + $0x1ac] sm:$0xf0] }
 0x27e   :  { %4214 = vmatpush.bf16.msrb.mxu3 %v7972_v12  ;;  %4187 = vmatpush.bf16.msrb.mxu1 %v7700_v7  ;;  %v7684_v12 = vor.u32 %v9240_v1, %v7681_v60  ;;  %v8552_v7 = vor.u32 %v9461_v27, %v8551_v8  ;;  %v8407_v1 = vld [vmem:[#allocation11 + $0x2c0] sm:$0xf]  ;;  %v9425_v60 = vld [vmem:[#allocation11 + $0x2cc] sm:$0xf0]  ;;  %v2965_v16 = vadd.f32 %v10171_v54, %v2951_v45 }
 0x27f   :  { %v8408_v58 = vor.u32 %v9425_v60, %v8407_v1  ;;  %v8536_v19 = vor.u32 %v9457_v6, %v8535_v57  ;;  %v8391_v28 = vld [vmem:[#allocation11 + $0x2a0] sm:$0xf]  ;;  %v2895_v34 = vadd.f32 %v10145_v5, %v2881_v42  ;;  %v3035_v3 = vadd.f32 %v10193_v15, %v3021_v36  ;;  %v9453_v43 = vld [vmem:[#allocation11 + $0x3ac] sm:$0xf0] }
 0x280   :  { %4201 = vmatpush.bf16.msrb.mxu2 %v7828_v18  ;;  %4174 = vmatpush.bf16.msrb.mxu0 %v7556_v11  ;;  %v9393_v18 = vld [vmem:[#allocation11 + $0x1cc] sm:$0xf0]  ;;  %v3047_v22 = vadd.f32 %v10187_v52, %v3033_v23  ;;  %v2977_v54 = vadd.f32 %v10165_v9, %v2963_v20  ;;  %v8136_v25 = vor.u32 %v9357_v0, %v8135_v48  ;;  %v8119_v52 = vld [vmem:[#allocation11 + $0x80] sm:$0xf] }
 0x281   :  { %v8280_v59 = vor.u32 %v9393_v18, %v8279_v31  ;;  %v9421_v11 = vld [vmem:[#allocation11 + $0x2ac] sm:$0xf0]  ;;  %v8519_v31 = vld [vmem:[#allocation11 + $0x3a0] sm:$0xf]  ;;  %v8264_v5 = vor.u32 %v9389_v32, %v8263_v2 }
 0x282   :  { %4215 = vmatpush.bf16.msrb.mxu3 %v7956_v51  ;;  %v10220_v51 = vpop.f32.mrf.mxu0  ;;  %4188 = vmatpush.bf16.msrb.mxu1 %v7684_v12  ;;  %v3104_v12 = vpop.f32.mrf.mxu2  ;;  %v8392_v15 = vor.u32 %v9421_v11, %v8391_v28  ;;  %v9353_v8 = vld [vmem:[#allocation11 + $0x8c] sm:$0xf0]  ;;  %v8520_v27 = vor.u32 %v9453_v43, %v8519_v31  ;;  %v8375_v9 = vld [vmem:[#allocation11 + $0x280] sm:$0xf]  ;;  %v2991_v45 = vadd.f32 %v10167_v39, %v2977_v54 }
 0x283   :  { %4175 = vmatmul.bf16.vlgmr.msrb.gmra.mxu0 %v10131_v38  ;;  %v3117_v38 = vadd.f32 %v3116_v10, %v3103_v29  ;;  %v3061_v10 = vadd.f32 %v10189_v49, %v3047_v22  ;;  %v8503_v62 = vld [vmem:[#allocation11 + $0x380] sm:$0xf]  ;;  %v9449_v55 = vld [vmem:[#allocation11 + $0x38c] sm:$0xf0]  ;;  %v8120_v18 = vor.u32 %v9353_v8, %v8119_v52 }
 0x284   :  { %4202 = vmatpush.bf16.msrb.mxu2 %v7812_v53  ;;  %5033 = vmatpush.bf16.msra.mxu0 %v8168_v30  ;;  %v3118_v53 = vpop.f32.mrf.mxu3  ;;  %v9417_v30 = vld [vmem:[#allocation11 + $0x28c] sm:$0xf0]  ;;  %v3144_v1 = vpop.f32.mrf.mxu1  ;;  %v8103_v42 = vld [vmem:[#allocation11 + $0x60] sm:$0xf]  ;;  %v8504_v36 = vor.u32 %v9449_v55, %v8503_v62 }
 0x285   :  { %4189 = vmatmul.bf16.vlgmr.msrb.gmra.mxu1 %v10133_v33  ;;  %v8247_v33 = vld [vmem:[#allocation11 + $0x180] sm:$0xf]  ;;  %v8376_v49 = vor.u32 %v9417_v30, %v8375_v9  ;;  %v9381_v57 = vld [vmem:[#allocation11 + $0x16c] sm:$0xf0] }
 0x286   :  { %4216 = vmatpush.bf16.msrb.mxu3 %v7940_v50  ;;  %5047 = vmatpush.bf16.msra.mxu1 %v8296_v40  ;;  %v9385_v50 = vld [vmem:[#allocation11 + $0x18c] sm:$0xf0]  ;;  %v3049_v40 = vadd.f32 %v10198_v21, %v3035_v3  ;;  %v8231_v23 = vld [vmem:[#allocation11 + $0x160] sm:$0xf] }
 0x287   :  { %4203 = vmatmul.bf16.vlgmr.msrb.gmra.mxu2 %v10135_v56  ;;  %v2979_v56 = vadd.f32 %v10173_v17, %v2965_v16  ;;  %v8248_v60 = vor.u32 %v9385_v50, %v8247_v33  ;;  %v9349_v21 = vld [vmem:[#allocation11 + $0x6c] sm:$0xf0]  ;;  %v8359_v39 = vld [vmem:[#allocation11 + $0x260] sm:$0xf]  ;;  %v8232_v2 = vor.u32 %v9381_v57, %v8231_v23 }
 0x288   :  { %5061 = vmatpush.bf16.msra.mxu2 %v8424_v41  ;;  %5034 = vmatpush.bf16.msra.mxu0 %v8152_v46  ;;  %v9413_v6 = vld [vmem:[#allocation11 + $0x26c] sm:$0xf0]  ;;  %v3063_v20 = vadd.f32 %v10200_v26, %v3049_v40  ;;  %v8487_v46 = vld [vmem:[#allocation11 + $0x360] sm:$0xf]  ;;  %v8104_v48 = vor.u32 %v9349_v21, %v8103_v42 }
 0x289   :  { %4217 = vmatmul.bf16.vlgmr.msrb.gmra.mxu3 %v10137_v4  ;;  %v2909_v4 = vadd.f32 %v10152_v61, %v2895_v34  ;;  %v3105_v61 = vadd.f32 %v3104_v12, %v576_v37  ;;  %v10248_v37 = vadd.f32 %v10169_v14, %v2991_v45  ;;  %v8360_v16 = vor.u32 %v9413_v6, %v8359_v39  ;;  %v8215_v26 = vld [vmem:[#allocation11 + $0x140] sm:$0xf]  ;;  %v9377_v11 = vld [vmem:[#allocation11 + $0x14c] sm:$0xf0]  ;;  %v10416_v14 = vld [vmem:[#allocation28_spill] sm:$0xff] }
 0x28a   :  { %5075 = vmatpush.bf16.msra.mxu3 %v8552_v7  ;;  %5048 = vmatpush.bf16.msra.mxu1 %v8280_v59  ;;  %v3130_v41 = vpop.f32.mrf.mxu0  ;;  %v2993_v7 = vadd.f32 %v10175_v24, %v2979_v56  ;;  %v3075_v24 = vadd.f32 %v10202_v35, %v3061_v10  ;;  %v9445_v59 = vld [vmem:[#allocation11 + $0x36c] sm:$0xf0]  ;;  %v8087_v35 = vld [vmem:[#allocation11 + $0x40] sm:$0xf]  ;;  %v3158_v28 = vpop.f32.mrf.mxu2  ;;  %v8216_v52 = vor.u32 %v9377_v11, %v8215_v26 }
 0x28b   :  { %v3131_v17 = vadd.f32 %v3130_v41, %v3117_v38  ;;  %v2923_v47 = vadd.f32 %v10156_v44, %v2909_v4  ;;  %v3119_v0 = vadd.f32 %v3118_v53, %v3105_v61  ;;  %v8488_v32 = vor.u32 %v9445_v59, %v8487_v46  ;;  %v8343_v44 = vld [vmem:[#allocation11 + $0x240] sm:$0xf]  ;;  %v9409_v34 = vld [vmem:[#allocation11 + $0x24c] sm:$0xf0] }
 0x28c   :  { %5062 = vmatpush.bf16.msra.mxu2 %v8408_v58  ;;  %5035 = vmatpush.bf16.msra.mxu0 %v8136_v25  ;;  %v3007_v58 = vadd.f32 %v10177_v63, %v2993_v7  ;;  %v10252_v3 = vadd.f32 %v10416_v14, %v3075_v24  ;;  %v3077_v63 = vadd.f32 %v10220_v51, %v3063_v20  ;;  %v3172_v43 = vpop.f32.mrf.mxu3  ;;  %v8471_v54 = vld [vmem:[#allocation11 + $0x340] sm:$0xf]  ;;  %v9441_v38 = vld [vmem:[#allocation11 + $0x34c] sm:$0xf0]  ;;  %v3182_v12 = vmax.f32 %v10248_v37, 0.0  ;;  %v3146_v50 = vpop.f32.mrf.mxu1 }
 0x28d   :  { %v3145_v29 = vadd.f32 %v3144_v1, %v3131_v17  ;;  %v3189_v25 = vmax.f32 %v2923_v47, 0.0  ;;  %v8344_v8 = vor.u32 %v9409_v34, %v8343_v44  ;;  %v8071_v33 = vld [vmem:[#allocation11 + $0x20] sm:$0xf]  ;;  %v9341_v56 = vld [vmem:[#allocation11 + $0x2c] sm:$0xf0]  ;;  %v8472_v51 = vor.u32 %v9441_v38, %v8471_v54 }
 0x28e   :  { %5076 = vmatpush.bf16.msra.mxu3 %v8536_v19  ;;  %5049 = vmatpush.bf16.msra.mxu1 %v8264_v5  ;;  %v9345_v19 = vld [vmem:[#allocation11 + $0x4c] sm:$0xf0]  ;;  %v3190_v5 = vmax.f32 %v3007_v58, 0.0  ;;  %v8327_v30 = vld [vmem:[#allocation11 + $0x220] sm:$0xf]  ;;  %v3183_v41 = vmax.f32 %v10252_v3, 0.0  ;;  %v10259_v62 = vadd.f32 %v10223_v13, %v3077_v63 }
 0x28f   :  { %v3159_v22 = vadd.f32 %v3158_v28, %v3145_v29  ;;  %v9373_v9 = vld [vmem:[#allocation11 + $0x12c] sm:$0xf0]  ;;  %v8455_v45 = vld [vmem:[#allocation11 + $0x320] sm:$0xf]  ;;  %v9363_v29 = vld [vmem:[#allocation11 + $0xe4] sm:$0xf] }
 0x290   :  { %5063 = vmatpush.bf16.msra.mxu2 %v8392_v15  ;;  %5036 = vmatpush.bf16.msra.mxu0 %v8120_v18  ;;  %v8088_v15 = vor.u32 %v9345_v19, %v8087_v35  ;;  %v9405_v4 = vld [vmem:[#allocation11 + $0x22c] sm:$0xf0]  ;;  %v3199_v17 = vpack.c.bf16 %v3190_v5, %v3189_v25  ;;  %v8072_v18 = vor.u32 %v9341_v56, %v8071_v33  ;;  %v8055_v1 = vld [vmem:[#allocation11] sm:$0xf]  ;;  %v3191_v46 = vmax.f32 %v10259_v62, 0.0 }
 0x291   :  { %v10417_v10 = vld [vmem:[#allocation27_spill] sm:$0xff]  ;;  %v3173_v55 = vadd.f32 %v3172_v43, %v3159_v22  ;;  %v8328_v21 = vor.u32 %v9405_v4, %v8327_v30  ;;  %v8439_v24 = vld [vmem:[#allocation11 + $0x300] sm:$0xf]  ;;  %v9427_v35 = vld [vmem:[#allocation11 + $0x2e4] sm:$0xf] }
 0x292   :  { %5077 = vmatpush.bf16.msra.mxu3 %v8520_v27  ;;  %5050 = vmatpush.bf16.msra.mxu1 %v8248_v60  ;;  %v3132_v31 = vpop.f32.mrf.mxu0  ;;  %v8199_v27 = vld [vmem:[#allocation11 + $0x120] sm:$0xf]  ;;  %v3181_v40 = vmax.f32 %v10417_v10, 0.0  ;;  %v9437_v7 = vld [vmem:[#allocation11 + $0x32c] sm:$0xf0]  ;;  %v3160_v6 = vpop.f32.mrf.mxu2  ;;  %v4382_v26 = vunpack.c.h.b16 %v3199_v17 }
 0x293   :  { %v3133_v53 = vadd.f32 %v3132_v31, %v3119_v0  ;;  %v9337_v61 = vld [vmem:[#allocation11 + $0xc] sm:$0xf0]  ;;  %v8183_v60 = vld [vmem:[#allocation11 + $0x100] sm:$0xf]  ;;  %v8200_v42 = vor.u32 %v9373_v9, %v8199_v27  ;;  %v8456_v13 = vor.u32 %v9437_v7, %v8455_v45  ;;  %v3184_v59 = vmax.f32 %v3173_v55, 0.0 }
 0x294   :  { %5064 = vmatpush.bf16.msra.mxu2 %v8376_v49  ;;  %5037 = vmatpush.bf16.msra.mxu0 %v8104_v48  ;;  %v9369_v23 = vld [vmem:[#allocation11 + $0x10c] sm:$0xf0]  ;;  %v3195_v39 = vpack.c.bf16 %v3182_v12, %v3181_v40  ;;  %v3174_v37 = vpop.f32.mrf.mxu3  ;;  %v8169_v58 = vld [vmem:[#allocation11 + $0xf0] sm:$0xf0]  ;;  %v9395_v48 = vld [vmem:[#allocation11 + $0x1e4] sm:$0xf]  ;;  %v4381_v0 = vunpack.c.l.b16 %v3199_v17 }
 0x295   :  { %v3147_v49 = vadd.f32 %v3146_v50, %v3133_v53  ;;  %v9401_v57 = vld [vmem:[#allocation11 + $0x20c] sm:$0xf0]  ;;  %v8425_v19 = vld [vmem:[#allocation11 + $0x2f0] sm:$0xf0]  ;;  %v8184_v28 = vor.u32 %v9369_v23, %v8183_v60  ;;  %v9459_v44 = vld [vmem:[#allocation11 + $0x3e4] sm:$0xf]  ;;  %v8172_v31 = vor.u32 %v9363_v29, %v8169_v58  ;;  %v3196_v25 = vpack.c.bf16 %v3184_v59, %v3183_v41 }
 0x296   :  { %5078 = vmatpush.bf16.msra.mxu3 %v8504_v36  ;;  %5051 = vmatpush.bf16.msra.mxu1 %v8232_v2  ;;  %v8311_v36 = vld [vmem:[#allocation11 + $0x200] sm:$0xf]  ;;  %v9433_v20 = vld [vmem:[#allocation11 + $0x30c] sm:$0xf0]  ;;  %v8056_v2 = vor.u32 %v9337_v61, %v8055_v1  ;;  %v8553_v34 = vld [vmem:[#allocation11 + $0x3f0] sm:$0xf0]  ;;  %v4377_v3 = vunpack.c.l.b16 %v3195_v39  ;;  %v4378_v63 = vunpack.c.h.b16 %v3195_v39 }
 0x297   :  { %v3161_v47 = vadd.f32 %v3160_v6, %v3147_v49  ;;  %v8312_v11 = vor.u32 %v9401_v57, %v8311_v36  ;;  %v9359_v14 = vld [vmem:[#allocation11 + $0xc4] sm:$0xf]  ;;  %v8440_v22 = vor.u32 %v9433_v20, %v8439_v24  ;;  %v8153_v43 = vld [vmem:[#allocation11 + $0xd0] sm:$0xf0]  ;;  %v4379_v10 = vunpack.c.l.b16 %v3196_v25 }
 0x298   :  { %5065 = vmatpush.bf16.msra.mxu2 %v8360_v16  ;;  %5038 = vmatpush.bf16.msra.mxu0 %v8088_v15  ;;  %v8297_v16 = vld [vmem:[#allocation11 + $0x1f0] sm:$0xf0]  ;;  %v9391_v54 = vld [vmem:[#allocation11 + $0x1c4] sm:$0xf]  ;;  %v8428_v15 = vor.u32 %v9427_v35, %v8425_v19  ;;  %v10262_v33 = vpack.c.b16 %v4381_v0, %v4377_v3  ;;  %v10264_v56 = vpack.c.b16 %v4382_v26, %v4378_v63  ;;  %v4380_v40 = vunpack.c.h.b16 %v3196_v25 }
 0x299   :  { %v8281_v38 = vld [vmem:[#allocation11 + $0x1d0] sm:$0xf0]  ;;  %v8300_v5 = vor.u32 %v9395_v48, %v8297_v16  ;;  %v9423_v53 = vld [vmem:[#allocation11 + $0x2c4] sm:$0xf]  ;;  %v8156_v9 = vor.u32 %v9359_v14, %v8153_v43 }
 0x29a   :  { %5079 = vmatpush.bf16.msra.mxu3 %v8488_v32  ;;  %5052 = vmatpush.bf16.msra.mxu1 %v8216_v52  ;;  %v3175_v32 = vadd.f32 %v3174_v37, %v3161_v47  ;;  %v8409_v52 = vld [vmem:[#allocation11 + $0x2d0] sm:$0xf0]  ;;  %v8284_v30 = vor.u32 %v9391_v54, %v8281_v38  ;;  %v9355_v55 = vld [vmem:[#allocation11 + $0xa4] sm:$0xf] }
 0x29b   :  { %v8537_v50 = vld [vmem:[#allocation11 + $0x3d0] sm:$0xf0]  ;;  %v8412_v4 = vor.u32 %v9423_v53, %v8409_v52  ;;  %v9387_v7 = vld [vmem:[#allocation11 + $0x1a4] sm:$0xf] }
 0x29c   :  { %5066 = vmatpush.bf16.msra.mxu2 %v8344_v8  ;;  %5039 = vmatpush.bf16.msra.mxu0 %v8072_v18  ;;  %v3192_v12 = vmax.f32 %v3175_v32, 0.0  ;;  %v8556_v8 = vor.u32 %v9459_v44, %v8553_v34  ;;  %v8137_v45 = vld [vmem:[#allocation11 + $0xb0] sm:$0xf0]  ;;  %v9419_v1 = vld [vmem:[#allocation11 + $0x2a4] sm:$0xf] }
 0x29d   :  { %v8265_v18 = vld [vmem:[#allocation11 + $0x1b0] sm:$0xf0]  ;;  %v8140_v23 = vor.u32 %v9355_v55, %v8137_v45  ;;  %v9351_v39 = vld [vmem:[#allocation11 + $0x84] sm:$0xf] }
 0x29e   :  { %5080 = vmatpush.bf16.msra.mxu3 %v8472_v51  ;;  %5053 = vmatpush.bf16.msra.mxu1 %v8200_v42  ;;  %v3200_v27 = vpack.c.bf16 %v3192_v12, %v3191_v46  ;;  %v9455_v51 = vld [vmem:[#allocation11 + $0x3c4] sm:$0xf]  ;;  %v8393_v61 = vld [vmem:[#allocation11 + $0x2b0] sm:$0xf0]  ;;  %v8268_v36 = vor.u32 %v9387_v7, %v8265_v18 }
 0x29f   :  { %v8540_v17 = vor.u32 %v9455_v51, %v8537_v50  ;;  %v9451_v42 = vld [vmem:[#allocation11 + $0x3a4] sm:$0xf]  ;;  %v8396_v57 = vor.u32 %v9419_v1, %v8393_v61  ;;  %v8249_v20 = vld [vmem:[#allocation11 + $0x190] sm:$0xf0] }
 0x2a0   :  { %5067 = vmatpush.bf16.msra.mxu2 %v8328_v21  ;;  %5040 = vmatpush.bf16.msra.mxu0 %v8056_v2  ;;  %v4383_v41 = vunpack.c.l.b16 %v3200_v27  ;;  %v4384_v62 = vunpack.c.h.b16 %v3200_v27  ;;  %v8521_v21 = vld [vmem:[#allocation11 + $0x3b0] sm:$0xf0]  ;;  %v9383_v6 = vld [vmem:[#allocation11 + $0x184] sm:$0xf] }
 0x2a1   :  { %v8524_v24 = vor.u32 %v9451_v42, %v8521_v21  ;;  %v9415_v29 = vld [vmem:[#allocation11 + $0x284] sm:$0xf]  ;;  %v8377_v46 = vld [vmem:[#allocation11 + $0x290] sm:$0xf0]  ;;  %v8252_v58 = vor.u32 %v9383_v6, %v8249_v20  ;;  %v8431_v6 = vld [vmem:[#allocation11 + $0x2e8] sm:$0xf] }
 0x2a2   :  { %5081 = vmatpush.bf16.msra.mxu3 %v8456_v13  ;;  %5054 = vmatpush.bf16.msra.mxu1 %v8184_v28  ;;  %v10267_v60 = vpack.c.b16 %v4383_v41, %v4379_v10  ;;  %v10269_v49 = vpack.c.b16 %v4384_v62, %v4380_v40  ;;  %v8121_v13 = vld [vmem:[#allocation11 + $0x90] sm:$0xf0]  ;;  %v9447_v59 = vld [vmem:[#allocation11 + $0x384] sm:$0xf]  ;;  %v8380_v48 = vor.u32 %v9415_v29, %v8377_v46  ;;  %v8559_v46 = vld [vmem:[#allocation11 + $0x3e8] sm:$0xf] }
 0x2a3   :  { %5041 = vmatmul.bf16.vlgmr.msra.gmra.mxu0 %v10262_v33  ;;  %v8505_v47 = vld [vmem:[#allocation11 + $0x390] sm:$0xf0]  ;;  %v8124_v37 = vor.u32 %v9351_v39, %v8121_v13  ;;  %v9347_v0 = vld [vmem:[#allocation11 + $0x64] sm:$0xf]  ;;  %v9398_v13 = vld [vmem:[#allocation11 + $0x1f4] sm:$0xf0] }
 0x2a4   :  { %5068 = vmatpush.bf16.msra.mxu2 %v8312_v11  ;;  %5089 = vmatpush.bf16.msrb.mxu0 %v8172_v31  ;;  %v8105_v2 = vld [vmem:[#allocation11 + $0x70] sm:$0xf0]  ;;  %v9379_v16 = vld [vmem:[#allocation11 + $0x164] sm:$0xf]  ;;  %v8508_v35 = vor.u32 %v9447_v59, %v8505_v47  ;;  %v9462_v59 = vld [vmem:[#allocation11 + $0x3f4] sm:$0xf0] }
 0x2a5   :  { %5055 = vmatmul.bf16.vlgmr.msra.gmra.mxu1 %v10264_v56  ;;  %v8233_v19 = vld [vmem:[#allocation11 + $0x170] sm:$0xf0]  ;;  %v9411_v26 = vld [vmem:[#allocation11 + $0x264] sm:$0xf]  ;;  %v8108_v44 = vor.u32 %v9347_v0, %v8105_v2  ;;  %v8159_v0 = vld [vmem:[#allocation11 + $0xc8] sm:$0xf] }
 0x2a6   :  { %5082 = vmatpush.bf16.msra.mxu3 %v8440_v22  ;;  %5103 = vmatpush.bf16.msrb.mxu1 %v8300_v5  ;;  %v8361_v32 = vld [vmem:[#allocation11 + $0x270] sm:$0xf0]  ;;  %v9443_v28 = vld [vmem:[#allocation11 + $0x364] sm:$0xf]  ;;  %v8236_v34 = vor.u32 %v9379_v16, %v8233_v19  ;;  %v9362_v2 = vld [vmem:[#allocation11 + $0xd4] sm:$0xf0] }
 0x2a7   :  { %5069 = vmatmul.bf16.vlgmr.msra.gmra.mxu2 %v10267_v60  ;;  %v8489_v11 = vld [vmem:[#allocation11 + $0x370] sm:$0xf0]  ;;  %v8364_v14 = vor.u32 %v9411_v26, %v8361_v32  ;;  %v9343_v3 = vld [vmem:[#allocation11 + $0x44] sm:$0xf]  ;;  %v8287_v16 = vld [vmem:[#allocation11 + $0x1c8] sm:$0xf] }
 0x2a8   :  { %5117 = vmatpush.bf16.msrb.mxu2 %v8428_v15  ;;  %5090 = vmatpush.bf16.msrb.mxu0 %v8156_v9  ;;  %v8089_v63 = vld [vmem:[#allocation11 + $0x50] sm:$0xf0]  ;;  %v9375_v22 = vld [vmem:[#allocation11 + $0x144] sm:$0xf]  ;;  %v8492_v31 = vor.u32 %v9443_v28, %v8489_v11  ;;  %v9394_v19 = vld [vmem:[#allocation11 + $0x1d4] sm:$0xf0] }
 0x2a9   :  { %5083 = vmatmul.bf16.vlgmr.msra.gmra.mxu3 %v10269_v49  ;;  %v8217_v43 = vld [vmem:[#allocation11 + $0x150] sm:$0xf0]  ;;  %v9407_v54 = vld [vmem:[#allocation11 + $0x244] sm:$0xf]  ;;  %v8092_v5 = vor.u32 %v9343_v3, %v8089_v63  ;;  %v8415_v26 = vld [vmem:[#allocation11 + $0x2c8] sm:$0xf] }
 0x2aa   :  { %5131 = vmatpush.bf16.msrb.mxu3 %v8556_v8  ;;  %5104 = vmatpush.bf16.msrb.mxu1 %v8284_v30  ;;  %v8345_v38 = vld [vmem:[#allocation11 + $0x250] sm:$0xf0]  ;;  %v9439_v25 = vld [vmem:[#allocation11 + $0x344] sm:$0xf]  ;;  %v8220_v15 = vor.u32 %v9375_v22, %v8217_v43  ;;  %v9426_v32 = vld [vmem:[#allocation11 + $0x2d4] sm:$0xf0] }
 0x2ab   :  { %v8473_v12 = vld [vmem:[#allocation11 + $0x350] sm:$0xf0]  ;;  %v8348_v53 = vor.u32 %v9407_v54, %v8345_v38  ;;  %v9339_v52 = vld [vmem:[#allocation11 + $0x24] sm:$0xf]  ;;  %v8543_v28 = vld [vmem:[#allocation11 + $0x3c8] sm:$0xf] }
 0x2ac   :  { %5118 = vmatpush.bf16.msrb.mxu2 %v8412_v4  ;;  %5091 = vmatpush.bf16.msrb.mxu0 %v8140_v23  ;;  %v8073_v8 = vld [vmem:[#allocation11 + $0x30] sm:$0xf0]  ;;  %v9371_v27 = vld [vmem:[#allocation11 + $0x124] sm:$0xf]  ;;  %v8476_v51 = vor.u32 %v9439_v25, %v8473_v12  ;;  %v8175_v23 = vld [vmem:[#allocation11 + $0xe8] sm:$0xf] }
 0x2ad   :  { %v8201_v50 = vld [vmem:[#allocation11 + $0x130] sm:$0xf0]  ;;  %v9403_v9 = vld [vmem:[#allocation11 + $0x224] sm:$0xf]  ;;  %v8076_v40 = vor.u32 %v9339_v52, %v8073_v8  ;;  %v9458_v11 = vld [vmem:[#allocation11 + $0x3d4] sm:$0xf0] }
 0x2ae   :  { %5132 = vmatpush.bf16.msrb.mxu3 %v8540_v17  ;;  %5105 = vmatpush.bf16.msrb.mxu1 %v8268_v36  ;;  %v8329_v30 = vld [vmem:[#allocation11 + $0x230] sm:$0xf0]  ;;  %v9435_v4 = vld [vmem:[#allocation11 + $0x324] sm:$0xf]  ;;  %v8204_v55 = vor.u32 %v9371_v27, %v8201_v50  ;;  %v9366_v36 = vld [vmem:[#allocation11 + $0xf4] sm:$0xf0] }
 0x2af   :  { %v8457_v10 = vld [vmem:[#allocation11 + $0x330] sm:$0xf0]  ;;  %v9335_v41 = vld [vmem:[#allocation11 + $0x4] sm:$0xf]  ;;  %v8332_v45 = vor.u32 %v9403_v9, %v8329_v30  ;;  %v8143_v3 = vld [vmem:[#allocation11 + $0xa8] sm:$0xf] }
 0x2b0   :  { %5119 = vmatpush.bf16.msrb.mxu2 %v8396_v57  ;;  %5092 = vmatpush.bf16.msrb.mxu0 %v8124_v37  ;;  %v8057_v62 = vld [vmem:[#allocation11 + $0x10] sm:$0xf0]  ;;  %v9367_v7 = vld [vmem:[#allocation11 + $0x104] sm:$0xf]  ;;  %v8460_v1 = vor.u32 %v9435_v4, %v8457_v10  ;;  %v8303_v57 = vld [vmem:[#allocation11 + $0x1e8] sm:$0xf]  ;;  %v8176_v37 = vor.u32 %v9366_v36, %v8175_v23  ;;  %v10278_v36 = vpop.f32.mrf.mxu0 }
 0x2b1   :  { %v8185_v17 = vld [vmem:[#allocation11 + $0x110] sm:$0xf0]  ;;  %v9399_v18 = vld [vmem:[#allocation11 + $0x204] sm:$0xf]  ;;  %v8060_v39 = vor.u32 %v9335_v41, %v8057_v62  ;;  %v9358_v63 = vld [vmem:[#allocation11 + $0xb4] sm:$0xf0] }
 0x2b2   :  { %5133 = vmatpush.bf16.msrb.mxu3 %v8524_v24  ;;  %5106 = vmatpush.bf16.msrb.mxu1 %v8252_v58  ;;  %v8313_v61 = vld [vmem:[#allocation11 + $0x210] sm:$0xf0]  ;;  %v9431_v42 = vld [vmem:[#allocation11 + $0x304] sm:$0xf]  ;;  %v9430_v24 = vld [vmem:[#allocation11 + $0x2f4] sm:$0xf0]  ;;  %v8188_v20 = vor.u32 %v9367_v7, %v8185_v17  ;;  %v8304_v58 = vor.u32 %v9398_v13, %v8303_v57 }
 0x2b3   :  { %v8441_v21 = vld [vmem:[#allocation11 + $0x310] sm:$0xf0]  ;;  %v8316_v29 = vor.u32 %v9399_v18, %v8313_v61  ;;  %v8271_v22 = vld [vmem:[#allocation11 + $0x1a8] sm:$0xf]  ;;  %v9390_v43 = vld [vmem:[#allocation11 + $0x1b4] sm:$0xf0] }
 0x2b4   :  { %5120 = vmatpush.bf16.msrb.mxu2 %v8380_v48  ;;  %5093 = vmatpush.bf16.msrb.mxu0 %v8108_v44  ;;  %v8444_v47 = vor.u32 %v9431_v42, %v8441_v21  ;;  %v8432_v48 = vor.u32 %v9430_v24, %v8431_v6  ;;  %v8160_v44 = vor.u32 %v9362_v2, %v8159_v0  ;;  %v8399_v54 = vld [vmem:[#allocation11 + $0x2a8] sm:$0xf]  ;;  %v9422_v38 = vld [vmem:[#allocation11 + $0x2b4] sm:$0xf0] }
 0x2b5   :  { %v8527_v25 = vld [vmem:[#allocation11 + $0x3a8] sm:$0xf]  ;;  %v9454_v12 = vld [vmem:[#allocation11 + $0x3b4] sm:$0xf0] }
 0x2b6   :  { %5134 = vmatpush.bf16.msrb.mxu3 %v8508_v35  ;;  %5107 = vmatpush.bf16.msrb.mxu1 %v8236_v34  ;;  %v8560_v35 = vor.u32 %v9462_v59, %v8559_v46  ;;  %v8288_v34 = vor.u32 %v9394_v19, %v8287_v16  ;;  %v8127_v52 = vld [vmem:[#allocation11 + $0x88] sm:$0xf]  ;;  %v9354_v8 = vld [vmem:[#allocation11 + $0x94] sm:$0xf0] }
 0x2b7   :  { %v8255_v27 = vld [vmem:[#allocation11 + $0x188] sm:$0xf]  ;;  %v9386_v50 = vld [vmem:[#allocation11 + $0x194] sm:$0xf0] }
 0x2b8   :  { %5121 = vmatpush.bf16.msrb.mxu2 %v8364_v14  ;;  %5094 = vmatpush.bf16.msrb.mxu0 %v8092_v5  ;;  %v8416_v14 = vor.u32 %v9426_v32, %v8415_v26  ;;  %v8144_v5 = vor.u32 %v9358_v63, %v8143_v3  ;;  %v8383_v9 = vld [vmem:[#allocation11 + $0x288] sm:$0xf]  ;;  %v9418_v30 = vld [vmem:[#allocation11 + $0x294] sm:$0xf0]  ;;  %v8256_v41 = vor.u32 %v9386_v50, %v8255_v27  ;;  %v9364_v27 = vld [vmem:[#allocation11 + $0xec] sm:$0xf] }
 0x2b9   :  { %v8511_v4 = vld [vmem:[#allocation11 + $0x388] sm:$0xf]  ;;  %v9450_v10 = vld [vmem:[#allocation11 + $0x394] sm:$0xf0]  ;;  %v8384_v62 = vor.u32 %v9418_v30, %v8383_v9  ;;  %v9396_v50 = vld [vmem:[#allocation11 + $0x1ec] sm:$0xf] }
 0x2ba   :  { %5135 = vmatpush.bf16.msrb.mxu3 %v8492_v31  ;;  %5108 = vmatpush.bf16.msrb.mxu1 %v8220_v15  ;;  %v8544_v31 = vor.u32 %v9458_v11, %v8543_v28  ;;  %v8272_v15 = vor.u32 %v9390_v43, %v8271_v22  ;;  %v8239_v7 = vld [vmem:[#allocation11 + $0x168] sm:$0xf]  ;;  %v8512_v17 = vor.u32 %v9450_v10, %v8511_v4  ;;  %v9382_v18 = vld [vmem:[#allocation11 + $0x174] sm:$0xf0]  ;;  %v8305_v30 = vld [vmem:[#allocation11 + $0x1f8] sm:$0xf0] }
 0x2bb   :  { %v9414_v61 = vld [vmem:[#allocation11 + $0x274] sm:$0xf0]  ;;  %v8495_v42 = vld [vmem:[#allocation11 + $0x368] sm:$0xf]  ;;  %v8240_v57 = vor.u32 %v9382_v18, %v8239_v7  ;;  %v9428_v4 = vld [vmem:[#allocation11 + $0x2ec] sm:$0xf]  ;;  %v8308_v18 = vor.u32 %v9396_v50, %v8305_v30 }
 0x2bc   :  { %5122 = vmatpush.bf16.msrb.mxu2 %v8348_v53  ;;  %5095 = vmatpush.bf16.msrb.mxu0 %v8076_v40  ;;  %v8400_v53 = vor.u32 %v9422_v38, %v8399_v54  ;;  %v8128_v40 = vor.u32 %v9354_v8, %v8127_v52  ;;  %v9446_v21 = vld [vmem:[#allocation11 + $0x374] sm:$0xf0]  ;;  %v8095_v13 = vld [vmem:[#allocation11 + $0x48] sm:$0xf]  ;;  %v10286_v8 = vpop.f32.mrf.mxu0  ;;  %v8433_v10 = vld [vmem:[#allocation11 + $0x2f8] sm:$0xf0] }
 0x2bd   :  { %v9346_v6 = vld [vmem:[#allocation11 + $0x54] sm:$0xf0]  ;;  %v8223_v24 = vld [vmem:[#allocation11 + $0x148] sm:$0xf]  ;;  %v8113_v30 = vld [vmem:[#allocation11 + $0x78] sm:$0xf0] }
 0x2be   :  { %5136 = vmatpush.bf16.msrb.mxu3 %v8476_v51  ;;  %5109 = vmatpush.bf16.msrb.mxu1 %v8204_v55  ;;  %v8528_v51 = vor.u32 %v9454_v12, %v8527_v25  ;;  %v8111_v55 = vld [vmem:[#allocation11 + $0x68] sm:$0xf]  ;;  %v9410_v59 = vld [vmem:[#allocation11 + $0x254] sm:$0xf0] }
 0x2bf   :  { %v8351_v46 = vld [vmem:[#allocation11 + $0x248] sm:$0xf]  ;;  %v9374_v32 = vld [vmem:[#allocation11 + $0x134] sm:$0xf0] }
 0x2c0   :  { %5123 = vmatpush.bf16.msrb.mxu2 %v8332_v45  ;;  %5096 = vmatpush.bf16.msrb.mxu0 %v8060_v39  ;;  %v9350_v45 = vld [vmem:[#allocation11 + $0x74] sm:$0xf0]  ;;  %v8352_v2 = vor.u32 %v9410_v59, %v8351_v46  ;;  %v8079_v16 = vld [vmem:[#allocation11 + $0x28] sm:$0xf] }
 0x2c1   :  { %v8112_v23 = vor.u32 %v9350_v45, %v8111_v55  ;;  %v8207_v19 = vld [vmem:[#allocation11 + $0x128] sm:$0xf]  ;;  %v9406_v11 = vld [vmem:[#allocation11 + $0x234] sm:$0xf0]  ;;  %v8561_v55 = vld [vmem:[#allocation11 + $0x3f8] sm:$0xf0] }
 0x2c2   :  { %5137 = vmatpush.bf16.msrb.mxu3 %v8460_v1  ;;  %5110 = vmatpush.bf16.msrb.mxu1 %v8188_v20  ;;  %v8367_v1 = vld [vmem:[#allocation11 + $0x268] sm:$0xf]  ;;  %v8496_v20 = vor.u32 %v9446_v21, %v8495_v42  ;;  %v9338_v22 = vld [vmem:[#allocation11 + $0x14] sm:$0xf0]  ;;  %v8208_v43 = vor.u32 %v9374_v32, %v8207_v19  ;;  %v8161_v42 = vld [vmem:[#allocation11 + $0xd8] sm:$0xf0] }
 0x2c3   :  { %5097 = vmatmul.bf16.vlgmr.msrb.gmra.mxu0 %v10262_v33  ;;  %v8368_v39 = vor.u32 %v9414_v61, %v8367_v1  ;;  %v8335_v28 = vld [vmem:[#allocation11 + $0x228] sm:$0xf]  ;;  %v9370_v25 = vld [vmem:[#allocation11 + $0x114] sm:$0xf0]  ;;  %v8436_v1 = vor.u32 %v9428_v4, %v8433_v10  ;;  %v9360_v61 = vld [vmem:[#allocation11 + $0xcc] sm:$0xf] }
 0x2c4   :  { %5124 = vmatpush.bf16.msrb.mxu2 %v8316_v29  ;;  %5145 = vmatpush.bf16.msra.mxu0 %v8176_v37  ;;  %v9378_v29 = vld [vmem:[#allocation11 + $0x154] sm:$0xf0]  ;;  %v8063_v63 = vld [vmem:[#allocation11 + $0x8] sm:$0xf]  ;;  %v8336_v54 = vor.u32 %v9406_v11, %v8335_v28  ;;  %v9392_v21 = vld [vmem:[#allocation11 + $0x1cc] sm:$0xf]  ;;  %v10294_v59 = vpop.f32.mrf.mxu0 }
 0x2c5   :  { %5111 = vmatmul.bf16.vlgmr.msrb.gmra.mxu1 %v10264_v56  ;;  %v9442_v37 = vld [vmem:[#allocation11 + $0x354] sm:$0xf0]  ;;  %v8224_v0 = vor.u32 %v9378_v29, %v8223_v24  ;;  %v8191_v38 = vld [vmem:[#allocation11 + $0x108] sm:$0xf]  ;;  %v8064_v9 = vor.u32 %v9338_v22, %v8063_v63  ;;  %v8545_v24 = vld [vmem:[#allocation11 + $0x3d8] sm:$0xf0]  ;;  %v8164_v29 = vor.u32 %v9360_v61, %v8161_v42 }
 0x2c6   :  { %5138 = vmatpush.bf16.msrb.mxu3 %v8444_v47  ;;  %5159 = vmatpush.bf16.msra.mxu1 %v8304_v58  ;;  %v8479_v47 = vld [vmem:[#allocation11 + $0x348] sm:$0xf]  ;;  %v10280_v58 = vpop.f32.mrf.mxu1  ;;  %v9434_v52 = vld [vmem:[#allocation11 + $0x314] sm:$0xf0]  ;;  %v9420_v19 = vld [vmem:[#allocation11 + $0x2ac] sm:$0xf] }
 0x2c7   :  { %5125 = vmatmul.bf16.vlgmr.msrb.gmra.mxu2 %v10267_v60  ;;  %v8480_v26 = vor.u32 %v9442_v37, %v8479_v47  ;;  %v8319_v12 = vld [vmem:[#allocation11 + $0x208] sm:$0xf]  ;;  %v9452_v32 = vld [vmem:[#allocation11 + $0x3ac] sm:$0xf]  ;;  %v8529_v28 = vld [vmem:[#allocation11 + $0x3b8] sm:$0xf0] }
 0x2c8   :  { %5173 = vmatpush.bf16.msra.mxu2 %v8432_v48  ;;  %5146 = vmatpush.bf16.msra.mxu0 %v8160_v44  ;;  %v8096_v48 = vor.u32 %v9346_v6, %v8095_v13  ;;  %v8463_v44 = vld [vmem:[#allocation11 + $0x328] sm:$0xf]  ;;  %v8417_v13 = vld [vmem:[#allocation11 + $0x2d8] sm:$0xf0]  ;;  %v9456_v6 = vld [vmem:[#allocation11 + $0x3cc] sm:$0xf] }
 0x2c9   :  { %5139 = vmatmul.bf16.vlgmr.msrb.gmra.mxu3 %v10269_v49  ;;  %v9352_v63 = vld [vmem:[#allocation11 + $0x8c] sm:$0xf]  ;;  %v8129_v22 = vld [vmem:[#allocation11 + $0x98] sm:$0xf0] }
 0x2ca   :  { %5187 = vmatpush.bf16.msra.mxu3 %v8560_v35  ;;  %5160 = vmatpush.bf16.msra.mxu1 %v8288_v34  ;;  %v9342_v35 = vld [vmem:[#allocation11 + $0x34] sm:$0xf0]  ;;  %v9380_v4 = vld [vmem:[#allocation11 + $0x16c] sm:$0xf] }
 0x2cb   :  { %v9438_v34 = vld [vmem:[#allocation11 + $0x334] sm:$0xf0]  ;;  %v8080_v3 = vor.u32 %v9342_v35, %v8079_v16  ;;  %v8548_v16 = vor.u32 %v9456_v6, %v8545_v24  ;;  %v8273_v35 = vld [vmem:[#allocation11 + $0x1b8] sm:$0xf0]  ;;  %v9344_v42 = vld [vmem:[#allocation11 + $0x4c] sm:$0xf] }
 0x2cc   :  { %5174 = vmatpush.bf16.msra.mxu2 %v8416_v14  ;;  %5147 = vmatpush.bf16.msra.mxu0 %v8144_v5  ;;  %v10282_v14 = vpop.f32.mrf.mxu2  ;;  %v8464_v5 = vor.u32 %v9438_v34, %v8463_v44  ;;  %v9408_v6 = vld [vmem:[#allocation11 + $0x24c] sm:$0xf]  ;;  %v8353_v24 = vld [vmem:[#allocation11 + $0x258] sm:$0xf0] }
 0x2ce   :  { %5188 = vmatpush.bf16.msra.mxu3 %v8544_v31  ;;  %5161 = vmatpush.bf16.msra.mxu1 %v8272_v15  ;;  %v10284_v31 = vpop.f32.mrf.mxu3  ;;  %v9402_v15 = vld [vmem:[#allocation11 + $0x214] sm:$0xf0]  ;;  %v10288_v45 = vpop.f32.mrf.mxu1 }
 0x2d0   :  { %5175 = vmatpush.bf16.msra.mxu2 %v8400_v53  ;;  %5148 = vmatpush.bf16.msra.mxu0 %v8128_v40  ;;  %v8447_v53 = vld [vmem:[#allocation11 + $0x308] sm:$0xf]  ;;  %v8192_v40 = vor.u32 %v9370_v25, %v8191_v38  ;;  %v8257_v38 = vld [vmem:[#allocation11 + $0x198] sm:$0xf0]  ;;  %v9416_v25 = vld [vmem:[#allocation11 + $0x28c] sm:$0xf] }
 0x2d1   :  { %v8448_v7 = vor.u32 %v9434_v52, %v8447_v53  ;;  %v8132_v52 = vor.u32 %v9352_v63, %v8129_v22  ;;  %v9436_v63 = vld [vmem:[#allocation11 + $0x32c] sm:$0xf]  ;;  %v8465_v22 = vld [vmem:[#allocation11 + $0x338] sm:$0xf0] }
 0x2d2   :  { %5189 = vmatpush.bf16.msra.mxu3 %v8528_v51  ;;  %5162 = vmatpush.bf16.msra.mxu1 %v8256_v41  ;;  %v8177_v51 = vld [vmem:[#allocation11 + $0xf8] sm:$0xf0]  ;;  %v8320_v41 = vor.u32 %v9402_v15, %v8319_v12 }
 0x2d3   :  { %v8385_v12 = vld [vmem:[#allocation11 + $0x298] sm:$0xf0] }
 0x2d4   :  { %5176 = vmatpush.bf16.msra.mxu2 %v8384_v62  ;;  %5149 = vmatpush.bf16.msra.mxu0 %v8112_v23  ;;  %v9460_v62 = vld [vmem:[#allocation11 + $0x3ec] sm:$0xf]  ;;  %v8513_v15 = vld [vmem:[#allocation11 + $0x398] sm:$0xf0]  ;;  %v8388_v50 = vor.u32 %v9416_v25, %v8385_v12 }
 0x2d5   :  { %v8564_v23 = vor.u32 %v9460_v62, %v8561_v55  ;;  %v8369_v62 = vld [vmem:[#allocation11 + $0x278] sm:$0xf0]  ;;  %v10306_v55 = vpop.f32.mrf.mxu0  ;;  %v9336_v25 = vld [vmem:[#allocation11 + $0xc] sm:$0xf] }
 0x2d6   :  { %5190 = vmatpush.bf16.msra.mxu3 %v8512_v17  ;;  %5163 = vmatpush.bf16.msra.mxu1 %v8240_v57  ;;  %v8180_v17 = vor.u32 %v9364_v27, %v8177_v51  ;;  %v8289_v57 = vld [vmem:[#allocation11 + $0x1d8] sm:$0xf0]  ;;  %v10292_v46 = vpop.f32.mrf.mxu3  ;;  %v10299_v11 = vpop.f32.mrf.mxu1 }
 0x2d7   :  { %v8292_v47 = vor.u32 %v9392_v21, %v8289_v57  ;;  %v8097_v21 = vld [vmem:[#allocation11 + $0x58] sm:$0xf0] }
 0x2d8   :  { %5177 = vmatpush.bf16.msra.mxu2 %v8368_v39  ;;  %5150 = vmatpush.bf16.msra.mxu0 %v8096_v48  ;;  %v9424_v39 = vld [vmem:[#allocation11 + $0x2cc] sm:$0xf]  ;;  %v8065_v12 = vld [vmem:[#allocation11 + $0x18] sm:$0xf0] }
 0x2d9   :  { %v8420_v37 = vor.u32 %v9424_v39, %v8417_v13  ;;  %v9356_v48 = vld [vmem:[#allocation11 + $0xac] sm:$0xf]  ;;  %v8225_v13 = vld [vmem:[#allocation11 + $0x158] sm:$0xf0] }
 0x2da   :  { %5191 = vmatpush.bf16.msra.mxu3 %v8496_v20  ;;  %5164 = vmatpush.bf16.msra.mxu1 %v8224_v0  ;;  %v10290_v20 = vpop.f32.mrf.mxu2  ;;  %v8145_v0 = vld [vmem:[#allocation11 + $0xb8] sm:$0xf0] }
 0x2db   :  { %v8148_v44 = vor.u32 %v9356_v48, %v8145_v0  ;;  %v8356_v0 = vor.u32 %v9408_v6, %v8353_v24  ;;  %v9477_v6 = vld [vmem:[#allocation14 + $0x70] sm:$0xff] }
 0x2dc   :  { %5178 = vmatpush.bf16.msra.mxu2 %v8352_v2  ;;  %5151 = vmatpush.bf16.msra.mxu0 %v8080_v3  ;;  %v9388_v2 = vld [vmem:[#allocation11 + $0x1ac] sm:$0xf] }
 0x2dd   :  { %v8276_v34 = vor.u32 %v9388_v2, %v8273_v35  ;;  %v9340_v2 = vld [vmem:[#allocation11 + $0x2c] sm:$0xf] }
 0x2de   :  { %5192 = vmatpush.bf16.msra.mxu3 %v8480_v26  ;;  %5165 = vmatpush.bf16.msra.mxu1 %v8208_v43  ;;  %v8401_v26 = vld [vmem:[#allocation11 + $0x2b8] sm:$0xf0]  ;;  %v9384_v43 = vld [vmem:[#allocation11 + $0x18c] sm:$0xf]  ;;  %v10304_v27 = vpop.f32.mrf.mxu3  ;;  %v10308_v57 = vpop.f32.mrf.mxu1 }
 0x2df   :  { %v8404_v3 = vor.u32 %v9420_v19, %v8401_v26  ;;  %v8260_v51 = vor.u32 %v9384_v43, %v8257_v38  ;;  %v9372_v35 = vld [vmem:[#allocation11 + $0x12c] sm:$0xf] }
 0x2e0   :  { %5179 = vmatpush.bf16.msra.mxu2 %v8336_v54  ;;  %5152 = vmatpush.bf16.msra.mxu0 %v8064_v9  ;;  %v8532_v54 = vor.u32 %v9452_v32, %v8529_v28  ;;  %v9348_v9 = vld [vmem:[#allocation11 + $0x6c] sm:$0xf]  ;;  %v8209_v32 = vld [vmem:[#allocation11 + $0x138] sm:$0xf0] }
 0x2e1   :  { %v9404_v28 = vld [vmem:[#allocation11 + $0x22c] sm:$0xf] }
 0x2e2   :  { %5193 = vmatpush.bf16.msra.mxu3 %v8464_v5  ;;  %5166 = vmatpush.bf16.msra.mxu1 %v8192_v40  ;;  %v9448_v5 = vld [vmem:[#allocation11 + $0x38c] sm:$0xf]  ;;  %v10302_v53 = vpop.f32.mrf.mxu2  ;;  %v8241_v40 = vld [vmem:[#allocation11 + $0x178] sm:$0xf0] }
 0x2e3   :  { %5153 = vmatmul.bf16.vlgmr.msra.gmra.mxu0 %v10262_v33  ;;  %v8516_v10 = vor.u32 %v9448_v5, %v8513_v15  ;;  %v9368_v5 = vld [vmem:[#allocation11 + $0x10c] sm:$0xf] }
 0x2e4   :  { %5180 = vmatpush.bf16.msra.mxu2 %v8320_v41  ;;  %5201 = vmatpush.bf16.msrb.mxu0 %v8180_v17  ;;  %v9412_v41 = vld [vmem:[#allocation11 + $0x26c] sm:$0xf]  ;;  %v8497_v17 = vld [vmem:[#allocation11 + $0x378] sm:$0xf0] }
 0x2e5   :  { %5167 = vmatmul.bf16.vlgmr.msra.gmra.mxu1 %v10264_v56  ;;  %v8372_v61 = vor.u32 %v9412_v41, %v8369_v62 }
 0x2e6   :  { %5194 = vmatpush.bf16.msra.mxu3 %v8448_v7  ;;  %5215 = vmatpush.bf16.msrb.mxu1 %v8308_v18  ;;  %v9444_v7 = vld [vmem:[#allocation11 + $0x36c] sm:$0xf]  ;;  %v8116_v18 = vor.u32 %v9348_v9, %v8113_v30  ;;  %v10316_v15 = vpop.f32.mrf.mxu1  ;;  %v8321_v9 = vld [vmem:[#allocation11 + $0x218] sm:$0xf0] }
 0x2e7   :  { %5181 = vmatmul.bf16.vlgmr.msra.gmra.mxu2 %v10267_v60  ;;  %v8500_v39 = vor.u32 %v9444_v7, %v8497_v17  ;;  %v9432_v30 = vld [vmem:[#allocation11 + $0x30c] sm:$0xf]  ;;  %v9470_v17 = vld [vmem:[#allocation14 + $0x38] sm:$0xff] }
 0x2e8   :  { %5229 = vmatpush.bf16.msrb.mxu2 %v8436_v1  ;;  %5202 = vmatpush.bf16.msrb.mxu0 %v8164_v29  ;;  %v8244_v1 = vor.u32 %v9380_v4, %v8241_v40  ;;  %v9440_v29 = vld [vmem:[#allocation11 + $0x34c] sm:$0xf]  ;;  %v8449_v4 = vld [vmem:[#allocation11 + $0x318] sm:$0xf0] }
 0x2e9   :  { %5195 = vmatmul.bf16.vlgmr.msra.gmra.mxu3 %v10269_v49  ;;  %v8452_v7 = vor.u32 %v9432_v30, %v8449_v4 }
 0x2ea   :  { %5243 = vmatpush.bf16.msrb.mxu3 %v8564_v23  ;;  %5216 = vmatpush.bf16.msrb.mxu1 %v8292_v47  ;;  %v9376_v23 = vld [vmem:[#allocation11 + $0x14c] sm:$0xf]  ;;  %v8481_v47 = vld [vmem:[#allocation11 + $0x358] sm:$0xf0]  ;;  %v10310_v19 = vpop.f32.mrf.mxu2 }
 0x2eb   :  { %v8228_v48 = vor.u32 %v9376_v23, %v8225_v13  ;;  %v8484_v26 = vor.u32 %v9440_v29, %v8481_v47  ;;  %v9469_v23 = vld [vmem:[#allocation14 + $0x30] sm:$0xff] }
 0x2ec   :  { %5230 = vmatpush.bf16.msrb.mxu2 %v8420_v37  ;;  %5203 = vmatpush.bf16.msrb.mxu0 %v8148_v44  ;;  %v8100_v37 = vor.u32 %v9344_v42, %v8097_v21  ;;  %v8337_v44 = vld [vmem:[#allocation11 + $0x238] sm:$0xf0] }
 0x2ed   :  { %v8340_v38 = vor.u32 %v9404_v28, %v8337_v44  ;;  %v9486_v21 = vld [vmem:[#allocation14 + $0xb8] sm:$0xff]  ;;  %v9484_v28 = vld [vmem:[#allocation14 + $0xa8] sm:$0xff] }
 0x2ee   :  { %5244 = vmatpush.bf16.msrb.mxu3 %v8548_v16  ;;  %5217 = vmatpush.bf16.msrb.mxu1 %v8276_v34  ;;  %v8081_v16 = vld [vmem:[#allocation11 + $0x38] sm:$0xf0]  ;;  %v10312_v34 = vpop.f32.mrf.mxu3  ;;  %v10327_v29 = vpop.f32.mrf.mxu1 }
 0x2ef   :  { %v8084_v43 = vor.u32 %v9340_v2, %v8081_v16  ;;  %v9476_v16 = vld [vmem:[#allocation14 + $0x68] sm:$0xff] }
 0x2f0   :  { %5231 = vmatpush.bf16.msrb.mxu2 %v8404_v3  ;;  %5204 = vmatpush.bf16.msrb.mxu0 %v8132_v52  ;;  %v10314_v3 = vpop.f32.mrf.mxu0  ;;  %v8468_v52 = vor.u32 %v9436_v63, %v8465_v22 }
 0x2f2   :  { %5245 = vmatpush.bf16.msrb.mxu3 %v8532_v54  ;;  %5218 = vmatpush.bf16.msrb.mxu1 %v8260_v51  ;;  %v8212_v54 = vor.u32 %v9372_v35, %v8209_v32  ;;  %v8193_v51 = vld [vmem:[#allocation11 + $0x118] sm:$0xf0]  ;;  %v10318_v62 = vpop.f32.mrf.mxu2 }
 0x2f3   :  { %v8196_v40 = vor.u32 %v9368_v5, %v8193_v51  ;;  %v9483_v5 = vld [vmem:[#allocation14 + $0xa0] sm:$0xff] }
 0x2f4   :  { %5232 = vmatpush.bf16.msrb.mxu2 %v8388_v50  ;;  %5205 = vmatpush.bf16.msrb.mxu0 %v8116_v18  ;;  %v9400_v50 = vld [vmem:[#allocation11 + $0x20c] sm:$0xf] }
 0x2f5   :  { %v8324_v41 = vor.u32 %v9400_v50, %v8321_v9 }
 0x2f6   :  { %5246 = vmatpush.bf16.msrb.mxu3 %v8516_v10  ;;  %5219 = vmatpush.bf16.msrb.mxu1 %v8244_v1  ;;  %v8068_v10 = vor.u32 %v9336_v25, %v8065_v12  ;;  %v10320_v18 = vpop.f32.mrf.mxu3  ;;  %v9478_v1 = vld [vmem:[#allocation14 + $0x78] sm:$0xff] }
 0x2f8   :  { %5233 = vmatpush.bf16.msrb.mxu2 %v8372_v61  ;;  %5206 = vmatpush.bf16.msrb.mxu0 %v8100_v37  ;;  %v10322_v61 = vld [vmem:[#allocation10] sm:$0xf]  ;;  %v4122_v42 = vpop.f32.mrf.mxu0  ;;  %v9485_v37 = vld [vmem:[#allocation14 + $0xb0] sm:$0xff] }
 0x2f9   :  { %v3332_v13 = vperm.slane %v10322_v61, 1  ;;  %v3331_v24 = vperm.slane %v10322_v61, 0 }
 0x2fa   :  { %5247 = vmatpush.bf16.msrb.mxu3 %v8500_v39  ;;  %5220 = vmatpush.bf16.msrb.mxu1 %v8228_v48  ;;  %v9494_v39 = vld [vmem:[#allocation14 + $0xf8] sm:$0xff]  ;;  %v9468_v48 = vld [vmem:[#allocation14 + $0x28] sm:$0xff]  ;;  %v4150_v35 = vpop.f32.mrf.mxu2 }
 0x2fb   :  { %v4067_v47 = vadd.f32 %v10306_v55, %v3332_v13  ;;  %v4065_v2 = vadd.f32 %v10294_v59, %v3332_v13  ;;  %v9492_v59 = vld [vmem:[#allocation14 + $0xe8] sm:$0xff]  ;;  %v9489_v13 = vld [vmem:[#allocation14 + $0xd0] sm:$0xff] }
 0x2fc   :  { %5234 = vmatpush.bf16.msrb.mxu2 %v8356_v0  ;;  %5207 = vmatpush.bf16.msrb.mxu0 %v8084_v43  ;;  %v9493_v0 = vld [vmem:[#allocation14 + $0xf0] sm:$0xff] }
 0x2fd   :  { %v4081_v55 = vadd.f32 %v10308_v57, %v4067_v47  ;;  %v4079_v63 = vadd.f32 %v10299_v11, %v4065_v2  ;;  %v9475_v57 = vld [vmem:[#allocation14 + $0x60] sm:$0xff]  ;;  %v9466_v11 = vld [vmem:[#allocation14 + $0x18] sm:$0xff] }
 0x2fe   :  { %5248 = vmatpush.bf16.msrb.mxu3 %v8484_v26  ;;  %5221 = vmatpush.bf16.msrb.mxu1 %v8212_v54  ;;  %v10339_v26 = vpop.f32.mrf.mxu3 }
 0x2ff   :  { %v4093_v25 = vadd.f32 %v10302_v53, %v4079_v63 }
 0x300   :  { %5235 = vmatpush.bf16.msrb.mxu2 %v8340_v38  ;;  %5208 = vmatpush.bf16.msrb.mxu0 %v8068_v10  ;;  %v4176_v32 = vpop.f32.mrf.mxu0  ;;  %v9482_v10 = vld [vmem:[#allocation14 + $0x98] sm:$0xff] }
 0x301   :  { %v4107_v53 = vadd.f32 %v10304_v27, %v4093_v25 }
 0x302   :  { %5249 = vmatpush.bf16.msrb.mxu3 %v8468_v52  ;;  %5222 = vmatpush.bf16.msrb.mxu1 %v8196_v40  ;;  %v4190_v54 = vpop.f32.mrf.mxu1 }
 0x303   :  { %5209 = vmatmul.bf16.vlgmr.msrb.gmra.mxu0 %v10262_v33  ;;  %v4011_v33 = vadd.f32 %v10286_v8, %v3331_v24  ;;  %v9467_v8 = vld [vmem:[#allocation14 + $0x20] sm:$0xff] }
 0x304   :  { %5236 = vmatpush.bf16.msrb.mxu2 %v8324_v41  ;;  %5825 = vmatpush.bf16.msra.mxu0 %v9470_v17  ;;  %v9490_v41 = vld [vmem:[#allocation14 + $0xd8] sm:$0xff] }
 0x305   :  { %5223 = vmatmul.bf16.vlgmr.msrb.gmra.mxu1 %v10264_v56  ;;  %v3334_v56 = vperm.slane %v10322_v61, 3  ;;  %v4025_v44 = vadd.f32 %v10288_v45, %v4011_v33 }
 0x306   :  { %5250 = vmatpush.bf16.msrb.mxu3 %v8452_v7  ;;  %5839 = vmatpush.bf16.msra.mxu1 %v9478_v1  ;;  %v9473_v1 = vld [vmem:[#allocation14 + $0x50] sm:$0xff] }
 0x307   :  { %5237 = vmatmul.bf16.vlgmr.msrb.gmra.mxu2 %v10267_v60  ;;  %v4009_v60 = vadd.f32 %v10278_v36, %v3331_v24  ;;  %v4095_v36 = vadd.f32 %v10310_v19, %v4081_v55  ;;  %v4177_v22 = vadd.f32 %v4176_v32, %v3334_v56  ;;  %v4039_v38 = vadd.f32 %v10290_v20, %v4025_v44  ;;  %v9491_v19 = vld [vmem:[#allocation14 + $0xe0] sm:$0xff] }
 0x308   :  { %5853 = vmatpush.bf16.msra.mxu2 %v9486_v21  ;;  %5826 = vmatpush.bf16.msra.mxu0 %v9469_v23  ;;  %v9481_v23 = vld [vmem:[#allocation14 + $0x90] sm:$0xff]  ;;  %v9471_v32 = vld [vmem:[#allocation14 + $0x40] sm:$0xff] }
 0x309   :  { %5251 = vmatmul.bf16.vlgmr.msrb.gmra.mxu3 %v10269_v49  ;;  %v3333_v49 = vperm.slane %v10322_v61, 2  ;;  %v4023_v43 = vadd.f32 %v10280_v58, %v4009_v60  ;;  %v4109_v52 = vadd.f32 %v10312_v34, %v4095_v36  ;;  %v4191_v50 = vadd.f32 %v4190_v54, %v4177_v22  ;;  %v9474_v58 = vld [vmem:[#allocation14 + $0x58] sm:$0xff]  ;;  %v9465_v34 = vld [vmem:[#allocation14 + $0x10] sm:$0xff]  ;;  %v9463_v60 = vld [vmem:[#allocation14] sm:$0xff] }
 0x30a   :  { %5867 = vmatpush.bf16.msra.mxu3 %v9494_v39  ;;  %5840 = vmatpush.bf16.msra.mxu1 %v9477_v6  ;;  %v4204_v9 = vpop.f32.mrf.mxu2  ;;  %v4053_v20 = vadd.f32 %v10292_v46, %v4039_v38  ;;  %v4224_v61 = vmax.f32 %v4107_v53, 0.0  ;;  %v4192_v39 = vpop.f32.mrf.mxu1  ;;  %v9487_v22 = vld [vmem:[#allocation14 + $0xc0] sm:$0xff] }
 0x30b   :  { %v4121_v12 = vadd.f32 %v10314_v3, %v3333_v49  ;;  %v4037_v45 = vadd.f32 %v10282_v14, %v4023_v43  ;;  %v4123_v51 = vadd.f32 %v4122_v42, %v3333_v49  ;;  %v4205_v30 = vadd.f32 %v4204_v9, %v4191_v50  ;;  %v4178_v14 = vpop.f32.mrf.mxu0  ;;  %v9510_v43 = vld [vmem:[#allocation14 + $0x178] sm:$0xff]  ;;  %v9509_v50 = vld [vmem:[#allocation14 + $0x170] sm:$0xff]  ;;  %v9508_v9 = vld [vmem:[#allocation14 + $0x168] sm:$0xff] }
 0x30c   :  { %5854 = vmatpush.bf16.msra.mxu2 %v9485_v37  ;;  %5827 = vmatpush.bf16.msra.mxu0 %v9468_v48  ;;  %v4218_v4 = vpop.f32.mrf.mxu3  ;;  %v4228_v7 = vmax.f32 %v4109_v52, 0.0  ;;  %v4179_v27 = vadd.f32 %v4178_v14, %v3334_v56  ;;  %v9507_v53 = vld [vmem:[#allocation14 + $0x160] sm:$0xff] }
 0x30d   :  { %v4135_v3 = vadd.f32 %v10316_v15, %v4121_v12  ;;  %v4051_v40 = vadd.f32 %v10284_v31, %v4037_v45  ;;  %v4137_v46 = vadd.f32 %v10327_v29, %v4123_v51  ;;  %v4227_v15 = vmax.f32 %v4053_v20, 0.0  ;;  %v9464_v31 = vld [vmem:[#allocation14 + $0x8] sm:$0xff]  ;;  %v9501_v51 = vld [vmem:[#allocation14 + $0x130] sm:$0xff]  ;;  %v9499_v20 = vld [vmem:[#allocation14 + $0x120] sm:$0xff] }
 0x30e   :  { %5868 = vmatpush.bf16.msra.mxu3 %v9493_v0  ;;  %5841 = vmatpush.bf16.msra.mxu1 %v9476_v16  ;;  %v4219_v21 = vadd.f32 %v4218_v4, %v4205_v30  ;;  %v4193_v47 = vadd.f32 %v4192_v39, %v4179_v27  ;;  %v9472_v29 = vld [vmem:[#allocation14 + $0x48] sm:$0xff]  ;;  %v9506_v30 = vld [vmem:[#allocation14 + $0x158] sm:$0xff]  ;;  %v9495_v27 = vld [vmem:[#allocation14 + $0x100] sm:$0xff] }
 0x30f   :  { %v4149_v17 = vadd.f32 %v10318_v62, %v4135_v3  ;;  %v4151_v42 = vadd.f32 %v4150_v35, %v4137_v46  ;;  %v4223_v6 = vmax.f32 %v4051_v40, 0.0  ;;  %v4233_v24 = vpack.c.bf16 %v4228_v7, %v4227_v15  ;;  %v9480_v16 = vld [vmem:[#allocation14 + $0x88] sm:$0xff]  ;;  %v9498_v3 = vld [vmem:[#allocation14 + $0x118] sm:$0xff]  ;;  %v9505_v40 = vld [vmem:[#allocation14 + $0x150] sm:$0xff] }
 0x310   :  { %5855 = vmatpush.bf16.msra.mxu2 %v9484_v28  ;;  %5828 = vmatpush.bf16.msra.mxu0 %v9467_v8  ;;  %v4226_v33 = vmax.f32 %v4219_v21, 0.0  ;;  %v9488_v35 = vld [vmem:[#allocation14 + $0xc8] sm:$0xff] }
 0x311   :  { %v4163_v62 = vadd.f32 %v10320_v18, %v4149_v17  ;;  %v4231_v48 = vpack.c.bf16 %v4224_v61, %v4223_v6  ;;  %v4165_v0 = vadd.f32 %v10339_v26, %v4151_v42  ;;  %v5277_v55 = vunpack.c.l.b16 %v4233_v24  ;;  %v9479_v26 = vld [vmem:[#allocation14 + $0x80] sm:$0xff]  ;;  %v9504_v7 = vld [vmem:[#allocation14 + $0x148] sm:$0xff]  ;;  %v10358_v61 = vld [vmem:[#allocation13] sm:$0xf] }
 0x312   :  { %5869 = vmatpush.bf16.msra.mxu3 %v9492_v59  ;;  %5842 = vmatpush.bf16.msra.mxu1 %v9475_v57  ;;  %v4206_v37 = vpop.f32.mrf.mxu2  ;;  %v5278_v28 = vunpack.c.h.b16 %v4233_v24  ;;  %v9502_v57 = vld [vmem:[#allocation14 + $0x138] sm:$0xff]  ;;  %v4366_v42 = vperm.slane %v10358_v61, 1 }
 0x313   :  { %v4207_v2 = vadd.f32 %v4206_v37, %v4193_v47  ;;  %v4225_v49 = vmax.f32 %v4163_v62, 0.0  ;;  %v5273_v8 = vunpack.c.l.b16 %v4231_v48  ;;  %v4229_v59 = vmax.f32 %v4165_v0, 0.0 }
 0x314   :  { %5856 = vmatpush.bf16.msra.mxu2 %v9483_v5  ;;  %5829 = vmatpush.bf16.msra.mxu0 %v9466_v11  ;;  %v4220_v56 = vpop.f32.mrf.mxu3  ;;  %v5274_v36 = vunpack.c.h.b16 %v4231_v48 }
 0x315   :  { %v4221_v18 = vadd.f32 %v4220_v56, %v4207_v2  ;;  %v4232_v44 = vpack.c.bf16 %v4226_v33, %v4225_v49  ;;  %v5281_v54 = vpack.c.b16 %v5277_v55, %v5273_v8 }
 0x316   :  { %5870 = vmatpush.bf16.msra.mxu3 %v9491_v19  ;;  %5843 = vmatpush.bf16.msra.mxu1 %v9474_v58  ;;  %v5282_v25 = vpack.c.b16 %v5278_v28, %v5274_v36  ;;  %v9500_v58 = vld [vmem:[#allocation14 + $0x128] sm:$0xff]  ;;  %v9518_v36 = vld [vmem:[#allocation14 + $0x1b8] sm:$0xff] }
 0x317   :  { %v4230_v63 = vmax.f32 %v4221_v18, 0.0  ;;  %v5275_v12 = vunpack.c.l.b16 %v4232_v44  ;;  %v5276_v5 = vunpack.c.h.b16 %v4232_v44 }
 0x318   :  { %5857 = vmatpush.bf16.msra.mxu2 %v9482_v10  ;;  %5830 = vmatpush.bf16.msra.mxu0 %v9465_v34  ;;  %v9497_v10 = vld [vmem:[#allocation14 + $0x110] sm:$0xff] }
 0x319   :  { %v4234_v38 = vpack.c.bf16 %v4230_v63, %v4229_v59 }
 0x31a   :  { %5871 = vmatpush.bf16.msra.mxu3 %v9490_v41  ;;  %5844 = vmatpush.bf16.msra.mxu1 %v9473_v1  ;;  %v9496_v41 = vld [vmem:[#allocation14 + $0x108] sm:$0xff]  ;;  %v9503_v1 = vld [vmem:[#allocation14 + $0x140] sm:$0xff] }
 0x31b   :  { %v5279_v45 = vunpack.c.l.b16 %v4234_v38  ;;  %v5280_v11 = vunpack.c.h.b16 %v4234_v38 }
 0x31c   :  { %5858 = vmatpush.bf16.msra.mxu2 %v9481_v23  ;;  %5831 = vmatpush.bf16.msra.mxu0 %v9464_v31  ;;  %v4365_v23 = vperm.slane %v10358_v61, 0 }
 0x31d   :  { %v5283_v19 = vpack.c.b16 %v5279_v45, %v5275_v12  ;;  %v5284_v52 = vpack.c.b16 %v5280_v11, %v5276_v5 }
 0x31e   :  { %5872 = vmatpush.bf16.msra.mxu3 %v9489_v13  ;;  %5845 = vmatpush.bf16.msra.mxu1 %v9472_v29 }
 0x320   :  { %5859 = vmatpush.bf16.msra.mxu2 %v9480_v16  ;;  %5832 = vmatpush.bf16.msra.mxu0 %v9463_v60  ;;  %v5042_v4 = vpop.f32.mrf.mxu0 }
 0x321   :  { %v5043_v24 = vadd.f32 %v5042_v4, %v4365_v23  ;;  %v9513_v4 = vld [vmem:[#allocation14 + $0x190] sm:$0xff] }
 0x322   :  { %5873 = vmatpush.bf16.msra.mxu3 %v9488_v35  ;;  %5846 = vmatpush.bf16.msra.mxu1 %v9471_v32  ;;  %v5056_v14 = vpop.f32.mrf.mxu1 }
 0x323   :  { %5833 = vmatmul.bf16.vlgmr.msra.gmra.mxu0 %v5281_v54  ;;  %v5057_v37 = vadd.f32 %v5056_v14, %v5043_v24  ;;  %v9521_v14 = vld [vmem:[#allocation14 + $0x1d0] sm:$0xff] }
 0x324   :  { %5881 = vmatpush.bf16.msrb.mxu0 %v9502_v57  ;;  %5860 = vmatpush.bf16.msra.mxu2 %v9479_v26 }
 0x325   :  { %5847 = vmatmul.bf16.vlgmr.msra.gmra.mxu1 %v5282_v25 }
 0x326   :  { %5895 = vmatpush.bf16.msrb.mxu1 %v9510_v43  ;;  %5874 = vmatpush.bf16.msra.mxu3 %v9487_v22  ;;  %v9526_v22 = vld [vmem:[#allocation14 + $0x1f8] sm:$0xff] }
 0x327   :  { %5861 = vmatmul.bf16.vlgmr.msra.gmra.mxu2 %v5283_v19 }
 0x328   :  { %5882 = vmatpush.bf16.msrb.mxu0 %v9501_v51  ;;  %v5044_v46 = vpop.f32.mrf.mxu0  ;;  %5909 = vmatpush.bf16.msrb.mxu2 %v9518_v36  ;;  %v9525_v51 = vld [vmem:[#allocation14 + $0x1f0] sm:$0xff] }
 0x329   :  { %5875 = vmatmul.bf16.vlgmr.msra.gmra.mxu3 %v5284_v52  ;;  %v5045_v62 = vadd.f32 %v5044_v46, %v4365_v23  ;;  %v9517_v52 = vld [vmem:[#allocation14 + $0x1b0] sm:$0xff]  ;;  %v9511_v46 = vld [vmem:[#allocation14 + $0x180] sm:$0xff] }
 0x32a   :  { %5896 = vmatpush.bf16.msrb.mxu1 %v9509_v50  ;;  %v5070_v34 = vpop.f32.mrf.mxu2  ;;  %v5058_v15 = vpop.f32.mrf.mxu1  ;;  %5923 = vmatpush.bf16.msrb.mxu3 %v9526_v22  ;;  %v9516_v50 = vld [vmem:[#allocation14 + $0x1a8] sm:$0xff] }
 0x32b   :  { %v5059_v2 = vadd.f32 %v5058_v15, %v5045_v62  ;;  %v5071_v16 = vadd.f32 %v5070_v34, %v5057_v37  ;;  %v9520_v34 = vld [vmem:[#allocation14 + $0x1c8] sm:$0xff]  ;;  %v4368_v15 = vperm.slane %v10358_v61, 3 }
 0x32c   :  { %5883 = vmatpush.bf16.msrb.mxu0 %v9500_v58  ;;  %v5084_v17 = vpop.f32.mrf.mxu3  ;;  %5910 = vmatpush.bf16.msrb.mxu2 %v9517_v52  ;;  %v9524_v58 = vld [vmem:[#allocation14 + $0x1e8] sm:$0xff] }
 0x32d   :  { %v5085_v49 = vadd.f32 %v5084_v17, %v5071_v16 }
 0x32e   :  { %5897 = vmatpush.bf16.msrb.mxu1 %v9508_v9  ;;  %5924 = vmatpush.bf16.msrb.mxu3 %v9525_v51  ;;  %v9515_v9 = vld [vmem:[#allocation14 + $0x1a0] sm:$0xff] }
 0x32f   :  { %v5257_v63 = vmax.f32 %v5085_v49, 0.0 }
 0x330   :  { %5884 = vmatpush.bf16.msrb.mxu0 %v9499_v20  ;;  %5911 = vmatpush.bf16.msrb.mxu2 %v9516_v50  ;;  %v9523_v20 = vld [vmem:[#allocation14 + $0x1e0] sm:$0xff] }
 0x332   :  { %5898 = vmatpush.bf16.msrb.mxu1 %v9507_v53  ;;  %v5072_v21 = vpop.f32.mrf.mxu2  ;;  %5925 = vmatpush.bf16.msrb.mxu3 %v9524_v58  ;;  %v9514_v53 = vld [vmem:[#allocation14 + $0x198] sm:$0xff] }
 0x333   :  { %v5073_v60 = vadd.f32 %v5072_v21, %v5059_v2  ;;  %v4367_v21 = vperm.slane %v10358_v61, 2 }
 0x334   :  { %5885 = vmatpush.bf16.msrb.mxu0 %v9498_v3  ;;  %v5086_v39 = vpop.f32.mrf.mxu3  ;;  %5912 = vmatpush.bf16.msrb.mxu2 %v9515_v9  ;;  %v9522_v3 = vld [vmem:[#allocation14 + $0x1d8] sm:$0xff] }
 0x335   :  { %v5087_v28 = vadd.f32 %v5086_v39, %v5073_v60 }
 0x336   :  { %5899 = vmatpush.bf16.msrb.mxu1 %v9506_v30  ;;  %5926 = vmatpush.bf16.msrb.mxu3 %v9523_v20 }
 0x337   :  { %v5261_v57 = vmax.f32 %v5087_v28, 0.0 }
 0x338   :  { %5886 = vmatpush.bf16.msrb.mxu0 %v9497_v10  ;;  %5913 = vmatpush.bf16.msrb.mxu2 %v9514_v53 }
 0x33a   :  { %5900 = vmatpush.bf16.msrb.mxu1 %v9505_v40  ;;  %5927 = vmatpush.bf16.msrb.mxu3 %v9522_v3  ;;  %v9512_v40 = vld [vmem:[#allocation14 + $0x188] sm:$0xff] }
 0x33c   :  { %5887 = vmatpush.bf16.msrb.mxu0 %v9496_v41  ;;  %5914 = vmatpush.bf16.msrb.mxu2 %v9513_v4 }
 0x33e   :  { %5901 = vmatpush.bf16.msrb.mxu1 %v9504_v7  ;;  %5928 = vmatpush.bf16.msrb.mxu3 %v9521_v14 }
 0x340   :  { %5888 = vmatpush.bf16.msrb.mxu0 %v9495_v27  ;;  %v5098_v31 = vpop.f32.mrf.mxu0  ;;  %5915 = vmatpush.bf16.msrb.mxu2 %v9512_v40  ;;  %v9519_v27 = vld [vmem:[#allocation14 + $0x1c0] sm:$0xff] }
 0x341   :  { %v5099_v13 = vadd.f32 %v5098_v31, %v4366_v42 }
 0x342   :  { %5902 = vmatpush.bf16.msrb.mxu1 %v9503_v1  ;;  %v5112_v6 = vpop.f32.mrf.mxu1  ;;  %5929 = vmatpush.bf16.msrb.mxu3 %v9520_v34 }
 0x343   :  { %v5113_v47 = vadd.f32 %v5112_v6, %v5099_v13 }
 0x344   :  { %5916 = vmatpush.bf16.msrb.mxu2 %v9511_v46 }
 0x346   :  { %5930 = vmatpush.bf16.msrb.mxu3 %v9519_v27 }
 0x348   :  { %v5100_v33 = vpop.f32.mrf.mxu0 }
 0x349   :  { %v5101_v56 = vadd.f32 %v5100_v33, %v4366_v42 }
 0x34a   :  { %v5126_v29 = vpop.f32.mrf.mxu2  ;;  %v5114_v55 = vpop.f32.mrf.mxu1 }
 0x34b   :  { %v5127_v48 = vadd.f32 %v5126_v29, %v5113_v47  ;;  %v5115_v18 = vadd.f32 %v5114_v55, %v5101_v56 }
 0x34c   :  { %v5140_v0 = vpop.f32.mrf.mxu3 }
 0x34d   :  { %v5141_v35 = vadd.f32 %v5140_v0, %v5127_v48 }
 0x34f   :  { %v5258_v8 = vmax.f32 %v5141_v35, 0.0 }
 0x351   :  { %v5265_v43 = vpack.c.bf16 %v5258_v8, %v5257_v63 }
 0x352   :  { %v5128_v32 = vpop.f32.mrf.mxu2 }
 0x353   :  { %v5129_v59 = vadd.f32 %v5128_v32, %v5115_v18  ;;  %v5293_v25 = vunpack.c.l.b16 %v5265_v43  ;;  %v5294_v12 = vunpack.c.h.b16 %v5265_v43 }
 0x354   :  { %v5142_v44 = vpop.f32.mrf.mxu3 }
 0x355   :  { %v5143_v26 = vadd.f32 %v5142_v44, %v5129_v59 }
 0x357   :  { %v5262_v54 = vmax.f32 %v5143_v26, 0.0 }
 0x359   :  { %v5267_v38 = vpack.c.bf16 %v5262_v54, %v5261_v57 }
 0x35b   :  { %v5297_v5 = vunpack.c.l.b16 %v5267_v38  ;;  %v5298_v45 = vunpack.c.h.b16 %v5267_v38 }
 0x35d   :  { %v5301_v11 = vpack.c.b16 %v5297_v5, %v5293_v25  ;;  %v5302_v19 = vpack.c.b16 %v5298_v45, %v5294_v12 }
 0x35f   :  { %5889 = vmatmul.bf16.vlgmr.msrb.gmra.mxu0 %v5301_v11  ;;  %5903 = vmatmul.bf16.vlgmr.msrb.gmra.mxu1 %v5302_v19  ;;  %v9547_v11 = vld [vmem:[#allocation16] ss:$0 sm:$0xff] }
 0x360   :  { %v5154_v30 = vpop.f32.mrf.mxu0 }
 0x361   :  { %v5155_v6 = vadd.f32 %v5154_v30, %v4367_v21 }
 0x362   :  { %v5168_v10 = vpop.f32.mrf.mxu1 }
 0x363   :  { %v5169_v29 = vadd.f32 %v5168_v10, %v5155_v6 }
 0x368   :  { %v5156_v17 = vpop.f32.mrf.mxu0 }
 0x369   :  { %v5157_v24 = vadd.f32 %v5156_v17, %v4367_v21 }
 0x36a   :  { %v5182_v41 = vpop.f32.mrf.mxu2  ;;  %v5170_v1 = vpop.f32.mrf.mxu1 }
 0x36b   :  { %v5183_v33 = vadd.f32 %v5182_v41, %v5169_v29  ;;  %v5171_v2 = vadd.f32 %v5170_v1, %v5157_v24 }
 0x36c   :  { %v5196_v7 = vpop.f32.mrf.mxu3 }
 0x36d   :  { %v5197_v55 = vadd.f32 %v5196_v7, %v5183_v33  ;;  %v5937_v33 = vlaneseq }
 0x36f   :  { %v5259_v59 = vmax.f32 %v5197_v55, 0.0 }
 0x372   :  { %v5184_v42 = vpop.f32.mrf.mxu2 }
 0x373   :  { %v5185_v56 = vadd.f32 %v5184_v42, %v5171_v2 }
 0x374   :  { %v5198_v23 = vpop.f32.mrf.mxu3 }
 0x375   :  { %v5199_v18 = vadd.f32 %v5198_v23, %v5185_v56 }
 0x377   :  { %v5263_v63 = vmax.f32 %v5199_v18, 0.0 }
 0x380   :  { %v5210_v39 = vpop.f32.mrf.mxu0 }
 0x381   :  { %v5211_v31 = vadd.f32 %v5210_v39, %v4368_v15 }
 0x382   :  { %v5224_v13 = vpop.f32.mrf.mxu1 }
 0x383   :  { %v5225_v62 = vadd.f32 %v5224_v13, %v5211_v31 }
 0x388   :  { %v5212_v0 = vpop.f32.mrf.mxu0 }
 0x389   :  { %v5213_v16 = vadd.f32 %v5212_v0, %v4368_v15 }
 0x38a   :  { %v5238_v47 = vpop.f32.mrf.mxu2  ;;  %v5226_v35 = vpop.f32.mrf.mxu1 }
 0x38b   :  { %v5239_v37 = vadd.f32 %v5238_v47, %v5225_v62  ;;  %v5227_v61 = vadd.f32 %v5226_v35, %v5213_v16 }
 0x38c   :  { %v5252_v48 = vpop.f32.mrf.mxu3 }
 0x38d   :  { %v5253_v60 = vadd.f32 %v5252_v48, %v5239_v37 }
 0x38f   :  { %v5260_v32 = vmax.f32 %v5253_v60, 0.0  ;;  %v5938_v60 = vand.u32 127, %v5937_v33 }
 0x391   :  { %v5266_v26 = vpack.c.bf16 %v5260_v32, %v5259_v59  ;;  %vm5939_vm2 = vcmp.eq.s32.totalorder %v5938_v60, 31 }
 0x392   :  { %v5240_v49 = vpop.f32.mrf.mxu2 }
 0x393   :  { %v5241_v28 = vadd.f32 %v5240_v49, %v5227_v61  ;;  %v5295_v57 = vunpack.c.l.b16 %v5266_v26  ;;  %v5296_v43 = vunpack.c.h.b16 %v5266_v26 }
 0x394   :  { %v5254_v8 = vpop.f32.mrf.mxu3 }
 0x395   :  { %v5255_v44 = vadd.f32 %v5254_v8, %v5241_v28 }
 0x397   :  { %v5264_v36 = vmax.f32 %v5255_v44, 0.0 }
 0x399   :  { %v5268_v22 = vpack.c.bf16 %v5264_v36, %v5263_v63 }
 0x39b   :  { %v5299_v54 = vunpack.c.l.b16 %v5268_v22  ;;  %v5300_v38 = vunpack.c.h.b16 %v5268_v22 }
 0x39d   :  { %v5303_v25 = vpack.c.b16 %v5299_v54, %v5295_v57  ;;  %v5304_v12 = vpack.c.b16 %v5300_v38, %v5296_v43 }
 0x39f   :  { %5917 = vmatmul.bf16.vlgmr.msrb.gmra.mxu2 %v5303_v25  ;;  %5931 = vmatmul.bf16.vlgmr.msrb.gmra.mxu3 %v5304_v12 }
 0x3a0   :  { %v5834_v5 = vpop.f32.mrf.mxu0 }
 0x3a1   :  { %v5835_v50 = vadd.f32 %v9547_v11, %v5834_v5 }
 0x3a2   :  { %v5848_v45 = vpop.f32.mrf.mxu1 }
 0x3a3   :  { %v5849_v58 = vadd.f32 %v5848_v45, %v5835_v50 }
 0x3a8   :  { %v5836_v19 = vpop.f32.mrf.mxu0 }
 0x3a9   :  { %v5837_v3 = vadd.f32 %v9547_v11, %v5836_v19 }
 0x3aa   :  { %v5862_v52 = vpop.f32.mrf.mxu2  ;;  %v5850_v9 = vpop.f32.mrf.mxu1 }
 0x3ab   :  { %v5863_v20 = vadd.f32 %v5862_v52, %v5849_v58  ;;  %v5851_v10 = vadd.f32 %v5850_v9, %v5837_v3 }
 0x3ac   :  { %v5876_v51 = vpop.f32.mrf.mxu3 }
 0x3ad   :  { %v5877_v14 = vadd.f32 %v5876_v51, %v5863_v20 }
 0x3b2   :  { %v5864_v30 = vpop.f32.mrf.mxu2 }
 0x3b3   :  { %v5865_v41 = vadd.f32 %v5864_v30, %v5851_v10 }
 0x3b4   :  { %v5878_v4 = vpop.f32.mrf.mxu3 }
 0x3b5   :  { %v5879_v1 = vadd.f32 %v5878_v4, %v5865_v41 }
 0x3dc   :  { %v5890_v53 = vpop.f32.mrf.mxu0  ;;  %v5904_v34 = vpop.f32.mrf.mxu1 }
 0x3dd   :  { %v5891_v40 = vadd.f32 %v5890_v53, %v5877_v14 }
 0x3df   :  { %v5905_v7 = vadd.f32 %v5904_v34, %v5891_v40 }
 0x3e4   :  { %v5892_v17 = vpop.f32.mrf.mxu0  ;;  %v5906_v39 = vpop.f32.mrf.mxu1 }
 0x3e5   :  { %v5893_v42 = vadd.f32 %v5892_v17, %v5879_v1 }
 0x3e7   :  { %v5907_v31 = vadd.f32 %v5906_v39, %v5893_v42 }
 0x422   :  { %v5918_v46 = vpop.f32.mrf.mxu2  ;;  %v5932_v27 = vpop.f32.mrf.mxu3 }
 0x423   :  { %v5919_v15 = vadd.f32 %v5918_v46, %v5905_v7 }
 0x425   :  { %v5933_v21 = vadd.f32 %v5932_v27, %v5919_v15 }
 0x427   :  { %v8821_v23 = vmul.f32 -1.442695, %v5933_v21 }
 0x429   :  { %9548 = vpow2.f32 %v8821_v23 }
 0x42a   :  { %v5920_v13 = vpop.f32.mrf.mxu2  ;;  %v5934_v24 = vpop.f32.mrf.mxu3 }
 0x42b   :  { %v5921_v6 = vadd.f32 %v5920_v13, %v5907_v31 }
 0x42d   :  { %v5935_v62 = vadd.f32 %v5934_v24, %v5921_v6 }
 0x42f   :  { %v9549_v47 = vpop.eup %9548  ;;  %v8822_v29 = vmul.f32 -1.442695, %v5935_v62 }
 0x430   :  { %v5946_v37 = vadd.f32 1.0, %v9549_v47 }
 0x431   :  { %9550 = vpow2.f32 %v8822_v29 }
 0x432   :  { %9552 = vrcp.f32 %v5946_v37  ;;  %v5959_v35 = vand.u32 2147483648, %v5946_v37  ;;  %v5957_v61 = vand.u32 2147483647, %v5946_v37  ;;  %vm5953_vm1 = vweird.f32 %v5946_v37 }
 0x434   :  { %v5960_v32 = vor.u32 1.1754944e-38, %v5959_v35  ;;  %vm5958_vm4 = vcmp.eq.f32.partialorder %v5957_v61, 8.507059e+37 }
 0x437   :  { %v9551_v48 = vpop.eup %9550 }
 0x438   :  { %v9553_v0 = vpop.eup %9552  ;;  %v5947_v2 = vadd.f32 1.0, %v9551_v48 }
 0x439   :  { %v5949_v16 = vmul.f32 %v9553_v0, %v5946_v37  ;;  %vm5954_vm0 = vweird.f32 %v9553_v0 }
 0x43a   :  { %9554 = vrcp.f32 %v5947_v2  ;;  %vm5955_vm3 = vmor %vm5953_vm1, %vm5954_vm0  ;;  %v5974_v26 = vand.u32 2147483648, %v5947_v2  ;;  %v5972_v22 = vand.u32 2147483647, %v5947_v2  ;;  %vm5968_vm6 = vweird.f32 %v5947_v2 }
 0x43b   :  { %v5950_v56 = vsub.f32 1.0, %v5949_v16 }
 0x43c   :  { %v5975_v43 = vor.u32 1.1754944e-38, %v5974_v26  ;;  %vm5973_vm8 = vcmp.eq.f32.partialorder %v5972_v22, 8.507059e+37 }
 0x43d   :  { %v5951_v55 = vmul.f32 %v9553_v0, %v5950_v56 }
 0x43f   :  { %v5952_v49 = vadd.f32 %v9553_v0, %v5951_v55 }
 0x440   :  { %v9555_v18 = vpop.eup %9554 }
 0x441   :  { %v5956_v28 = vsel %vm5955_vm3, %v9553_v0, %v5952_v49  ;;  %v5964_v8 = vmul.f32 %v9555_v18, %v5947_v2  ;;  %vm5969_vm5 = vweird.f32 %v9555_v18 }
 0x442   :  { %v5961_v59 = vsel %vm5958_vm4, %v5960_v32, %v5956_v28  ;;  %vm5970_vm7 = vmor %vm5968_vm6, %vm5969_vm5 }
 0x443   :  { %v5978_v44 = vsel %vm5939_vm2, %v5961_v59, %v5933_v21  ;;  %v5965_v63 = vsub.f32 1.0, %v5964_v8 }
 0x444   :  { %5980 = vst [vmem:[#allocation17] sm:$0xff] %v5978_v44 }
 0x445   :  { %v5966_v36 = vmul.f32 %v9555_v18, %v5965_v63 }
 0x447   :  { %v5967_v57 = vadd.f32 %v9555_v18, %v5966_v36 }
 0x449   :  { %v5971_v54 = vsel %vm5970_vm7, %v9555_v18, %v5967_v57 }
 0x44a   :  { %v5976_v38 = vsel %vm5973_vm8, %v5975_v43, %v5971_v54 }
 0x44b   :  { %v5979_v25 = vsel %vm5939_vm2, %v5976_v38, %v5935_v62 }
 0x44c   :  { %5981 = vst [vmem:[#allocation17 + $0x8] sm:$0xff] %v5979_v25 }
 0x44d   :  { %5994 = dma.vmem_to_hbm [thread:$0]  %s5987_s8, 256, %s5989_s13, [#allocation4], %s9828_s5, %s9828_s5, %s9829_s14  }
 0x44e   :  { %9808 = dma.done.wait [#allocation4], 256  }
 0x44f   :  { %9809 = vsyncadd [#allocation4], 4294967040 }
 0x450   :  { %5999 = vsyncpa [#allocation3], 1 }
 0x451   :  { %6000 = vsyncpa [#allocation6], 1 }
 0x452   :  { %6001 = vsyncpa [#allocation9], 1 }
 0x453   :  { %6002 = vsyncpa [#allocation12], 1 }
 0x454   :  { %6003 = vsyncpa [#allocation15], 1 }
 0x455   :  { %6004 = vsyncpa [#allocation4], 1 }

</bundles_post_ra>
